<compile_context>
chip_gen: v7x
topology: tpu7x:2x2x1
jax: 0.10.0
libtpu: 0.0.40
codegen_flags: <defaults>
</compile_context>

<pallas_src>
import functools

import numpy as np
import jax
import jax.numpy as jnp
from jax.experimental import pallas as pl
from jax.experimental.pallas import tpu as pltpu


# ------------------------------ fused kernel ------------------------------- #

def _cnn_kernel(cols1_ref, w1bd_ref, b1bd_ref, w2bd_ref, b2l_ref, psel_ref,
                w1f_ref, bf1_ref, w2f_ref, bf2_ref, w3f_ref, bf3_ref,
                out_ref, p1_ref):
    """One grid step = TB samples.  p1_ref: VMEM scratch (272, TB*8) bf16."""
    f32 = jnp.float32
    bf16 = jnp.bfloat16
    TB = out_ref.shape[2]

    # ---- conv1 (block-diagonal GEMM, batch in lanes) fused with 2x2 max-pool.
    # cols1 rows are pool-parity-major: row = (ipar*2+jpar)*256 + h*16 + w, so
    # the 2x2 max-pool is an elementwise max of the four 256-row quarters.
    w1bd = w1bd_ref[...]                                       # (TB*25, TB*8)
    m = jnp.dot(cols1_ref[0:256, :], w1bd, preferred_element_type=f32)
    for q in range(1, 4):
        y = jnp.dot(cols1_ref[q * 256:(q + 1) * 256, :], w1bd,
                    preferred_element_type=f32)
        m = jnp.maximum(m, y)
    p1 = jnp.maximum(m + b1bd_ref[...], 0.0)                   # (256, TB*8)
    p1_ref[0:256, :] = p1.astype(bf16)
    p1_ref[256:272, :] = jnp.zeros((16, TB * 8), bf16)         # pad rows

    # ---- conv2: 25 per-tap GEMMs on shifted, contiguous slices of p1.
    # acc[i*16+j, oc*TB+b]; columns j>=12 wrap into the next h row and are
    # never selected by the pool2 selectors below (full-width trick).
    acc = jnp.zeros((192, TB * 16), f32)
    for di in range(5):
        for dj in range(5):
            t = di * 5 + dj
            s_t = di * 16 + dj
            lhs = p1_ref[s_t:s_t + 192, :]                     # (192, TB*8)
            acc = acc + jnp.dot(lhs, w2bd_ref[t], preferred_element_type=f32)
    c2 = jnp.maximum(acc + b2l_ref[...], 0.0).astype(bf16)     # (192, TB*16)

    # ---- pool2: max over the four 2x2-parity selection GEMMs (constants).
    p2 = jnp.dot(psel_ref[0], c2, preferred_element_type=f32)
    for k in range(1, 4):
        p2 = jnp.maximum(p2, jnp.dot(psel_ref[k], c2,
                                     preferred_element_type=f32))
    # p2: (48, TB*16), rows = h2*6 + w2 (36 valid), lanes = oc*TB + b

    # ---- fc1: accumulate 16 per-channel GEMMs (32,48)@(48,TB), batch in lanes.
    h1 = jnp.dot(w1f_ref[0], p2[:, 0:TB].astype(bf16),
                 preferred_element_type=f32)
    for oc in range(1, 16):
        h1 = h1 + jnp.dot(w1f_ref[oc],
                          p2[:, oc * TB:(oc + 1) * TB].astype(bf16),
                          preferred_element_type=f32)
    h1 = jnp.maximum(h1 + bf1_ref[...], 0.0)                   # (32, TB)

    # ---- fc2 / fc3 (tiny, f32).
    h2 = jnp.maximum(jnp.dot(w2f_ref[...], h1, preferred_element_type=f32)
                     + bf2_ref[...], 0.0)                      # (16, TB)
    h3 = jnp.dot(w3f_ref[...], h2, preferred_element_type=f32) + bf3_ref[...]
    out_ref[0] = h3                                            # (2, TB)


# --------------------------------- wrapper ---------------------------------- #

def pick_tb(B, cap=8):
    """Largest divisor of B that is <= cap (keeps grid length B // TB >= 2
    whenever B > cap, so v7x's two TensorCores both get work)."""
    for tb in range(min(cap, B), 0, -1):
        if B % tb == 0:
            return tb
    return 1


def cnn_forward_pallas(x, prepped, *, TB):
    """x: (B, 1, 36, 36) float32 NCHW -> (B, 2) logits."""
    B = x.shape[0]
    assert B % TB == 0, (B, TB)
    G = B // TB

    # conv1 im2col (input prep only; everything downstream is fused).
    # Rows: g*1024 + (ipar*2+jpar)*256 + h*16 + w  (i = 2h+ipar, j = 2w+jpar)
    # Lanes: bb*25 + tap  (bb = sample index within the block, tap = di*5+dj)
    xs = x[:, 0]                                               # (B, 36, 36)
    taps = jnp.stack([xs[:, di:di + 32, dj:dj + 32]
                      for di in range(5) for dj in range(5)], axis=-1)
    t6 = taps.reshape(B, 16, 2, 16, 2, 25).transpose(0, 2, 4, 1, 3, 5)
    t7 = t6.reshape(G, TB, 2, 2, 16, 16, 25).transpose(0, 2, 3, 4, 5, 1, 6)
    cols1 = t7.reshape(G * 1024, TB * 25).astype(jnp.bfloat16)

    const2 = lambda g: (0, 0)
    const3 = lambda g: (0, 0, 0)

    grid_spec = pltpu.PrefetchScalarGridSpec(
        num_scalar_prefetch=0,
        grid=(G,),
        in_specs=[
            pl.BlockSpec((1024, TB * 25), lambda g: (g, 0)),      # cols1
            pl.BlockSpec((TB * 25, TB * 8), const2),              # w1bd
            pl.BlockSpec((1, TB * 8), const2),                    # b1bd
            pl.BlockSpec((25, TB * 8, TB * 16), const3),          # w2bd
            pl.BlockSpec((1, TB * 16), const2),                   # b2l
            pl.BlockSpec((4, 48, 192), const3),                   # psel
            pl.BlockSpec((16, 32, 48), const3),                   # w1f
            pl.BlockSpec((32, 1), const2),                        # bf1
            pl.BlockSpec((16, 32), const2),                       # w2f
            pl.BlockSpec((16, 1), const2),                        # bf2
            pl.BlockSpec((2, 16), const2),                        # w3f
            pl.BlockSpec((2, 1), const2),                         # bf3
        ],
        out_specs=pl.BlockSpec((1, 2, TB), lambda g: (g, 0, 0)),
        scratch_shapes=[pltpu.VMEM((272, TB * 8), jnp.bfloat16)],
    )

    out = pl.pallas_call(
        _cnn_kernel,
        out_shape=jax.ShapeDtypeStruct((G, 2, TB), jnp.float32),
        grid_spec=grid_spec,
        compiler_params=pltpu.CompilerParams(
            dimension_semantics=("parallel",)),
    )(cols1, prepped["w1bd"], prepped["b1bd"], prepped["w2bd"], prepped["b2l"],
      prepped["psel"], prepped["w1f"], prepped["bf1"], prepped["w2f"],
      prepped["bf2"], prepped["w3f"], prepped["bf3"])

    return out.transpose(0, 2, 1).reshape(B, 2)


# -------------------- one-time weight/layout preparation -------------------- #

def prepare_inputs(params, TB):
    """Fold all layout permutations (block-diagonal batching, tap ordering,
    NCHW flatten order, torch Linear transposes) into the weights so the
    kernel never transposes anything at runtime."""
    f32 = np.float32
    c1w = np.asarray(params["conv1_w"], f32)   # (6, 1, 5, 5)
    c1b = np.asarray(params["conv1_b"], f32)
    c2w = np.asarray(params["conv2_w"], f32)   # (16, 6, 5, 5)
    c2b = np.asarray(params["conv2_b"], f32)
    f1w = np.asarray(params["fc1_w"], f32)     # (32, 576)
    f1b = np.asarray(params["fc1_b"], f32)
    f2w = np.asarray(params["fc2_w"], f32)     # (16, 32)
    f2b = np.asarray(params["fc2_b"], f32)
    f3w = np.asarray(params["fc3_w"], f32)     # (2, 16)
    f3b = np.asarray(params["fc3_b"], f32)

    # conv1 block-diagonal GEMM weight: rows = b*25+tap, cols = b*8+c.
    w1r = c1w.reshape(6, 25).T                                  # (25, 6)
    w1bd = np.zeros((TB, 25, TB, 8), f32)
    for b in range(TB):
        w1bd[b, :, b, :6] = w1r
    w1bd = w1bd.reshape(TB * 25, TB * 8)

    b1bd = np.zeros((1, TB, 8), f32)
    b1bd[0, :, :6] = c1b
    b1bd = b1bd.reshape(1, TB * 8)

    # conv2 per-tap block weights: [tap, b*8+c, oc*TB+b].
    w2r = c2w.reshape(16, 6, 25).transpose(2, 1, 0)             # (25, 6, 16)
    w2bd = np.zeros((25, TB, 8, 16, TB), f32)
    for b in range(TB):
        w2bd[:, b, :6, :, b] = w2r
    w2bd = w2bd.reshape(25, TB * 8, 16 * TB)

    b2l = np.repeat(c2b, TB).reshape(1, 16 * TB)                # lane = oc*TB+b

    # pool2 2x2 parity selectors: [parity, h2*6+w2, i*16+j] (rows >= 36 zero).
    psel = np.zeros((4, 48, 192), f32)
    for ip in range(2):
        for jp in range(2):
            k = ip * 2 + jp
            for h2 in range(6):
                for w2 in range(6):
                    psel[k, h2 * 6 + w2, (2 * h2 + ip) * 16 + (2 * w2 + jp)] = 1.0

    # fc1 weights per conv2 channel: [oc, u, s] with s = h2*6+w2 (s >= 36 zero).
    w1f = np.zeros((16, 32, 48), f32)
    w1f[:, :, :36] = f1w.reshape(32, 16, 36).transpose(1, 0, 2)

    bf16 = jnp.bfloat16
    return {
        "w1bd": jnp.asarray(w1bd, bf16),
        "b1bd": jnp.asarray(b1bd, jnp.float32),
        "w2bd": jnp.asarray(w2bd, bf16),
        "b2l": jnp.asarray(b2l, jnp.float32),
        "psel": jnp.asarray(psel, bf16),
        "w1f": jnp.asarray(w1f, bf16),
        "bf1": jnp.asarray(f1b.reshape(32, 1), jnp.float32),
        "w2f": jnp.asarray(f2w, jnp.float32),
        "bf2": jnp.asarray(f2b.reshape(16, 1), jnp.float32),
        "w3f": jnp.asarray(f3w, jnp.float32),
        "bf3": jnp.asarray(f3b.reshape(2, 1), jnp.float32),
    }


# ---------------------------- pure-JAX reference ---------------------------- #

def ref_forward(x, p):
    def conv(x, w, b):
        y = jax.lax.conv_general_dilated(
            x, w, (1, 1), "VALID", dimension_numbers=("NCHW", "OIHW", "NCHW"))
        return y + b[None, :, None, None]

    def pool(x):
        return jax.lax.reduce_window(x, -jnp.inf, jax.lax.max,
                                     (1, 1, 2, 2), (1, 1, 2, 2), "VALID")

    y = pool(jnp.maximum(conv(x, p["conv1_w"], p["conv1_b"]), 0.0))
    y = pool(jnp.maximum(conv(y, p["conv2_w"], p["conv2_b"]), 0.0))
    y = y.reshape(y.shape[0], -1)
    y = jnp.maximum(y @ p["fc1_w"].T + p["fc1_b"], 0.0)
    y = jnp.maximum(y @ p["fc2_w"].T + p["fc2_b"], 0.0)
    return y @ p["fc3_w"].T + p["fc3_b"]


# ---------------------------------- main ------------------------------------ #

def init_params(key):
    ks = jax.random.split(key, 10)
    s = 0.1
    return {
        "conv1_w": jax.random.normal(ks[0], (6, 1, 5, 5), jnp.float32) * s,
        "conv1_b": jax.random.normal(ks[1], (6,), jnp.float32) * s,
        "conv2_w": jax.random.normal(ks[2], (16, 6, 5, 5), jnp.float32) * s,
        "conv2_b": jax.random.normal(ks[3], (16,), jnp.float32) * s,
        "fc1_w": jax.random.normal(ks[4], (32, 16 * 6 * 6), jnp.float32) * s,
        "fc1_b": jax.random.normal(ks[5], (32,), jnp.float32) * s,
        "fc2_w": jax.random.normal(ks[6], (16, 32), jnp.float32) * s,
        "fc2_b": jax.random.normal(ks[7], (16,), jnp.float32) * s,
        "fc3_w": jax.random.normal(ks[8], (2, 16), jnp.float32) * s,
        "fc3_b": jax.random.normal(ks[9], (2,), jnp.float32) * s,
    }


if __name__ == "__main__":
    key = jax.random.PRNGKey(0)
    pkey, xkey = jax.random.split(key)
    params = init_params(pkey)

    # batch=16, channels=1, 36x36 so the flatten is exactly 16*6*6 as in the
    # module.  TB=8 -> grid of 2 steps (both v7x TensorCores get equal work).
    B = 16
    x = jax.random.normal(xkey, (B, 1, 36, 36), jnp.float32)

    TB = pick_tb(B)
    prepped = prepare_inputs(params, TB)

    fwd = jax.jit(functools.partial(cnn_forward_pallas, TB=TB))
    out = jax.block_until_ready(fwd(x, prepped))
    ref = jax.block_until_ready(jax.jit(ref_forward)(x, params))

    assert out.shape == (B, 2), out.shape
    max_err = float(np.max(np.abs(np.asarray(out) - np.asarray(ref))))
    assert jnp.allclose(out, ref, rtol=3e-2, atol=3e-2), max_err
    print("KERNEL_OK")
</pallas_src>

<mosaic_0001>
module attributes {stable_mosaic.version = 11 : i64} {
  func.func @_cnn_kernel(%arg0: i32, %arg1: memref<1024x200xbf16, #tpu.memory_space<vmem>>, %arg2: memref<200x64xbf16, #tpu.memory_space<vmem>>, %arg3: memref<1x64xf32, #tpu.memory_space<vmem>>, %arg4: memref<25x64x128xbf16, #tpu.memory_space<vmem>>, %arg5: memref<1x128xf32, #tpu.memory_space<vmem>>, %arg6: memref<4x48x192xbf16, #tpu.memory_space<vmem>>, %arg7: memref<16x32x48xbf16, #tpu.memory_space<vmem>>, %arg8: memref<32x1xf32, #tpu.memory_space<vmem>>, %arg9: memref<16x32xf32, #tpu.memory_space<vmem>>, %arg10: memref<16x1xf32, #tpu.memory_space<vmem>>, %arg11: memref<2x16xf32, #tpu.memory_space<vmem>>, %arg12: memref<2x1xf32, #tpu.memory_space<vmem>>, %arg13: memref<1x2x8xf32, #tpu.memory_space<vmem>>, %arg14: memref<272x64xbf16, #tpu.memory_space<vmem>>) attributes {dimension_semantics = [#tpu.dimension_semantics<parallel>], iteration_bounds = array<i64: 2>, scalar_prefetch = 0 : i64, scratch_operands = 1 : i64, tpu.core_type = #tpu.core_type<tc>, window_params = [{transform_indices = @transform_0, window_bounds = array<i64: 1024, 200>}, {pipeline_mode = #tpu.pipeline_mode<synchronous>, transform_indices = @transform_1, window_bounds = array<i64: 200, 64>}, {pipeline_mode = #tpu.pipeline_mode<synchronous>, transform_indices = @transform_2, window_bounds = array<i64: 1, 64>}, {pipeline_mode = #tpu.pipeline_mode<synchronous>, transform_indices = @transform_3, window_bounds = array<i64: 25, 64, 128>}, {pipeline_mode = #tpu.pipeline_mode<synchronous>, transform_indices = @transform_4, window_bounds = array<i64: 1, 128>}, {pipeline_mode = #tpu.pipeline_mode<synchronous>, transform_indices = @transform_5, window_bounds = array<i64: 4, 48, 192>}, {pipeline_mode = #tpu.pipeline_mode<synchronous>, transform_indices = @transform_6, window_bounds = array<i64: 16, 32, 48>}, {pipeline_mode = #tpu.pipeline_mode<synchronous>, transform_indices = @transform_7, window_bounds = array<i64: 32, 1>}, {pipeline_mode = #tpu.pipeline_mode<synchronous>, transform_indices = @transform_8, window_bounds = array<i64: 16, 32>}, {pipeline_mode = #tpu.pipeline_mode<synchronous>, transform_indices = @transform_9, window_bounds = array<i64: 16, 1>}, {pipeline_mode = #tpu.pipeline_mode<synchronous>, transform_indices = @transform_10, window_bounds = array<i64: 2, 16>}, {pipeline_mode = #tpu.pipeline_mode<synchronous>, transform_indices = @transform_11, window_bounds = array<i64: 2, 1>}, {transform_indices = @transform_12, window_bounds = array<i64: 1, 2, 8>}]} {
    %c0 = arith.constant 0 : index
    %c0_0 = arith.constant 0 : index
    %0 = vector.load %arg2[%c0, %c0_0] : memref<200x64xbf16, #tpu.memory_space<vmem>>, vector<200x64xbf16>
    %c0_1 = arith.constant 0 : index
    %c0_2 = arith.constant 0 : index
    %1 = vector.load %arg1[%c0_1, %c0_2] : memref<1024x200xbf16, #tpu.memory_space<vmem>>, vector<256x200xbf16>
    %cst = arith.constant dense<0.000000e+00> : vector<256x64xf32>
    %2 = tpu.matmul %1, %0, %cst {dimension_numbers = #tpu.dot_dimension_numbers<[1], [0], [0], [1], [0, 0, 1, 1], [], []>} : vector<256x200xbf16>, vector<200x64xbf16>, vector<256x64xf32> -> vector<256x64xf32>
    %c256 = arith.constant 256 : index
    %c0_3 = arith.constant 0 : index
    %3 = vector.load %arg1[%c256, %c0_3] : memref<1024x200xbf16, #tpu.memory_space<vmem>>, vector<256x200xbf16>
    %cst_4 = arith.constant dense<0.000000e+00> : vector<256x64xf32>
    %4 = tpu.matmul %3, %0, %cst_4 {dimension_numbers = #tpu.dot_dimension_numbers<[1], [0], [0], [1], [0, 0, 1, 1], [], []>} : vector<256x200xbf16>, vector<200x64xbf16>, vector<256x64xf32> -> vector<256x64xf32>
    %5 = arith.maximumf %2, %4 : vector<256x64xf32>
    %c512 = arith.constant 512 : index
    %c0_5 = arith.constant 0 : index
    %6 = vector.load %arg1[%c512, %c0_5] : memref<1024x200xbf16, #tpu.memory_space<vmem>>, vector<256x200xbf16>
    %cst_6 = arith.constant dense<0.000000e+00> : vector<256x64xf32>
    %7 = tpu.matmul %6, %0, %cst_6 {dimension_numbers = #tpu.dot_dimension_numbers<[1], [0], [0], [1], [0, 0, 1, 1], [], []>} : vector<256x200xbf16>, vector<200x64xbf16>, vector<256x64xf32> -> vector<256x64xf32>
    %8 = arith.maximumf %5, %7 : vector<256x64xf32>
    %c768 = arith.constant 768 : index
    %c0_7 = arith.constant 0 : index
    %9 = vector.load %arg1[%c768, %c0_7] : memref<1024x200xbf16, #tpu.memory_space<vmem>>, vector<256x200xbf16>
    %cst_8 = arith.constant dense<0.000000e+00> : vector<256x64xf32>
    %10 = tpu.matmul %9, %0, %cst_8 {dimension_numbers = #tpu.dot_dimension_numbers<[1], [0], [0], [1], [0, 0, 1, 1], [], []>} : vector<256x200xbf16>, vector<200x64xbf16>, vector<256x64xf32> -> vector<256x64xf32>
    %11 = arith.maximumf %8, %10 : vector<256x64xf32>
    %c0_9 = arith.constant 0 : index
    %c0_10 = arith.constant 0 : index
    %12 = vector.load %arg3[%c0_9, %c0_10] : memref<1x64xf32, #tpu.memory_space<vmem>>, vector<1x64xf32>
    %13 = vector.broadcast %12 : vector<1x64xf32> to vector<256x64xf32>
    %14 = arith.addf %11, %13 : vector<256x64xf32>
    %cst_11 = arith.constant 0.000000e+00 : f32
    %15 = vector.broadcast %cst_11 : f32 to vector<256x64xf32>
    %16 = arith.maximumf %14, %15 : vector<256x64xf32>
    %17 = arith.truncf %16 : vector<256x64xf32> to vector<256x64xbf16>
    %c0_12 = arith.constant 0 : index
    %c0_13 = arith.constant 0 : index
    %18 = vector.load %arg14[%c0_12, %c0_13] : memref<272x64xbf16, #tpu.memory_space<vmem>>, vector<256x64xbf16>
    tpu.vector_store %arg14[%c0_12, %c0_13], %17 {strides = array<i32>} : memref<272x64xbf16, #tpu.memory_space<vmem>>, vector<256x64xbf16>,
    %cst_14 = arith.constant 0.000000e+00 : bf16
    %19 = vector.broadcast %cst_14 : bf16 to vector<16x64xbf16>
    %c256_15 = arith.constant 256 : index
    %c0_16 = arith.constant 0 : index
    %20 = vector.load %arg14[%c256_15, %c0_16] : memref<272x64xbf16, #tpu.memory_space<vmem>>, vector<16x64xbf16>
    tpu.vector_store %arg14[%c256_15, %c0_16], %19 {strides = array<i32>} : memref<272x64xbf16, #tpu.memory_space<vmem>>, vector<16x64xbf16>,
    %cst_17 = arith.constant 0.000000e+00 : f32
    %21 = vector.broadcast %cst_17 : f32 to vector<192x128xf32>
    %c0_18 = arith.constant 0 : index
    %c0_19 = arith.constant 0 : index
    %22 = vector.load %arg14[%c0_18, %c0_19] : memref<272x64xbf16, #tpu.memory_space<vmem>>, vector<192x64xbf16>
    %c0_20 = arith.constant 0 : index
    %c0_21 = arith.constant 0 : index
    %c0_22 = arith.constant 0 : index
    %23 = vector.load %arg4[%c0_20, %c0_21, %c0_22] : memref<25x64x128xbf16, #tpu.memory_space<vmem>>, vector<1x64x128xbf16>
    %24 = vector.shape_cast %23 : vector<1x64x128xbf16> to vector<64x128xbf16>
    %cst_23 = arith.constant dense<0.000000e+00> : vector<192x128xf32>
    %25 = tpu.matmul %22, %24, %cst_23 {dimension_numbers = #tpu.dot_dimension_numbers<[1], [0], [0], [1], [0, 0, 1, 1], [], []>} : vector<192x64xbf16>, vector<64x128xbf16>, vector<192x128xf32> -> vector<192x128xf32>
    %26 = arith.addf %21, %25 : vector<192x128xf32>
    %c1 = arith.constant 1 : index
    %c0_24 = arith.constant 0 : index
    %27 = vector.load %arg14[%c1, %c0_24] : memref<272x64xbf16, #tpu.memory_space<vmem>>, vector<192x64xbf16>
    %c1_25 = arith.constant 1 : index
    %c0_26 = arith.constant 0 : index
    %c0_27 = arith.constant 0 : index
    %28 = vector.load %arg4[%c1_25, %c0_26, %c0_27] : memref<25x64x128xbf16, #tpu.memory_space<vmem>>, vector<1x64x128xbf16>
    %29 = vector.shape_cast %28 : vector<1x64x128xbf16> to vector<64x128xbf16>
    %cst_28 = arith.constant dense<0.000000e+00> : vector<192x128xf32>
    %30 = tpu.matmul %27, %29, %cst_28 {dimension_numbers = #tpu.dot_dimension_numbers<[1], [0], [0], [1], [0, 0, 1, 1], [], []>} : vector<192x64xbf16>, vector<64x128xbf16>, vector<192x128xf32> -> vector<192x128xf32>
    %31 = arith.addf %26, %30 : vector<192x128xf32>
    %c2 = arith.constant 2 : index
    %c0_29 = arith.constant 0 : index
    %32 = vector.load %arg14[%c2, %c0_29] : memref<272x64xbf16, #tpu.memory_space<vmem>>, vector<192x64xbf16>
    %c2_30 = arith.constant 2 : index
    %c0_31 = arith.constant 0 : index
    %c0_32 = arith.constant 0 : index
    %33 = vector.load %arg4[%c2_30, %c0_31, %c0_32] : memref<25x64x128xbf16, #tpu.memory_space<vmem>>, vector<1x64x128xbf16>
    %34 = vector.shape_cast %33 : vector<1x64x128xbf16> to vector<64x128xbf16>
    %cst_33 = arith.constant dense<0.000000e+00> : vector<192x128xf32>
    %35 = tpu.matmul %32, %34, %cst_33 {dimension_numbers = #tpu.dot_dimension_numbers<[1], [0], [0], [1], [0, 0, 1, 1], [], []>} : vector<192x64xbf16>, vector<64x128xbf16>, vector<192x128xf32> -> vector<192x128xf32>
    %36 = arith.addf %31, %35 : vector<192x128xf32>
    %c3 = arith.constant 3 : index
    %c0_34 = arith.constant 0 : index
    %37 = vector.load %arg14[%c3, %c0_34] : memref<272x64xbf16, #tpu.memory_space<vmem>>, vector<192x64xbf16>
    %c3_35 = arith.constant 3 : index
    %c0_36 = arith.constant 0 : index
    %c0_37 = arith.constant 0 : index
    %38 = vector.load %arg4[%c3_35, %c0_36, %c0_37] : memref<25x64x128xbf16, #tpu.memory_space<vmem>>, vector<1x64x128xbf16>
    %39 = vector.shape_cast %38 : vector<1x64x128xbf16> to vector<64x128xbf16>
    %cst_38 = arith.constant dense<0.000000e+00> : vector<192x128xf32>
    %40 = tpu.matmul %37, %39, %cst_38 {dimension_numbers = #tpu.dot_dimension_numbers<[1], [0], [0], [1], [0, 0, 1, 1], [], []>} : vector<192x64xbf16>, vector<64x128xbf16>, vector<192x128xf32> -> vector<192x128xf32>
    %41 = arith.addf %36, %40 : vector<192x128xf32>
    %c4 = arith.constant 4 : index
    %c0_39 = arith.constant 0 : index
    %42 = vector.load %arg14[%c4, %c0_39] : memref<272x64xbf16, #tpu.memory_space<vmem>>, vector<192x64xbf16>
    %c4_40 = arith.constant 4 : index
    %c0_41 = arith.constant 0 : index
    %c0_42 = arith.constant 0 : index
    %43 = vector.load %arg4[%c4_40, %c0_41, %c0_42] : memref<25x64x128xbf16, #tpu.memory_space<vmem>>, vector<1x64x128xbf16>
    %44 = vector.shape_cast %43 : vector<1x64x128xbf16> to vector<64x128xbf16>
    %cst_43 = arith.constant dense<0.000000e+00> : vector<192x128xf32>
    %45 = tpu.matmul %42, %44, %cst_43 {dimension_numbers = #tpu.dot_dimension_numbers<[1], [0], [0], [1], [0, 0, 1, 1], [], []>} : vector<192x64xbf16>, vector<64x128xbf16>, vector<192x128xf32> -> vector<192x128xf32>
    %46 = arith.addf %41, %45 : vector<192x128xf32>
    %c16 = arith.constant 16 : index
    %c0_44 = arith.constant 0 : index
    %47 = vector.load %arg14[%c16, %c0_44] : memref<272x64xbf16, #tpu.memory_space<vmem>>, vector<192x64xbf16>
    %c5 = arith.constant 5 : index
    %c0_45 = arith.constant 0 : index
    %c0_46 = arith.constant 0 : index
    %48 = vector.load %arg4[%c5, %c0_45, %c0_46] : memref<25x64x128xbf16, #tpu.memory_space<vmem>>, vector<1x64x128xbf16>
    %49 = vector.shape_cast %48 : vector<1x64x128xbf16> to vector<64x128xbf16>
    %cst_47 = arith.constant dense<0.000000e+00> : vector<192x128xf32>
    %50 = tpu.matmul %47, %49, %cst_47 {dimension_numbers = #tpu.dot_dimension_numbers<[1], [0], [0], [1], [0, 0, 1, 1], [], []>} : vector<192x64xbf16>, vector<64x128xbf16>, vector<192x128xf32> -> vector<192x128xf32>
    %51 = arith.addf %46, %50 : vector<192x128xf32>
    %c17 = arith.constant 17 : index
    %c0_48 = arith.constant 0 : index
    %52 = vector.load %arg14[%c17, %c0_48] : memref<272x64xbf16, #tpu.memory_space<vmem>>, vector<192x64xbf16>
    %c6 = arith.constant 6 : index
    %c0_49 = arith.constant 0 : index
    %c0_50 = arith.constant 0 : index
    %53 = vector.load %arg4[%c6, %c0_49, %c0_50] : memref<25x64x128xbf16, #tpu.memory_space<vmem>>, vector<1x64x128xbf16>
    %54 = vector.shape_cast %53 : vector<1x64x128xbf16> to vector<64x128xbf16>
    %cst_51 = arith.constant dense<0.000000e+00> : vector<192x128xf32>
    %55 = tpu.matmul %52, %54, %cst_51 {dimension_numbers = #tpu.dot_dimension_numbers<[1], [0], [0], [1], [0, 0, 1, 1], [], []>} : vector<192x64xbf16>, vector<64x128xbf16>, vector<192x128xf32> -> vector<192x128xf32>
    %56 = arith.addf %51, %55 : vector<192x128xf32>
    %c18 = arith.constant 18 : index
    %c0_52 = arith.constant 0 : index
    %57 = vector.load %arg14[%c18, %c0_52] : memref<272x64xbf16, #tpu.memory_space<vmem>>, vector<192x64xbf16>
    %c7 = arith.constant 7 : index
    %c0_53 = arith.constant 0 : index
    %c0_54 = arith.constant 0 : index
    %58 = vector.load %arg4[%c7, %c0_53, %c0_54] : memref<25x64x128xbf16, #tpu.memory_space<vmem>>, vector<1x64x128xbf16>
    %59 = vector.shape_cast %58 : vector<1x64x128xbf16> to vector<64x128xbf16>
    %cst_55 = arith.constant dense<0.000000e+00> : vector<192x128xf32>
    %60 = tpu.matmul %57, %59, %cst_55 {dimension_numbers = #tpu.dot_dimension_numbers<[1], [0], [0], [1], [0, 0, 1, 1], [], []>} : vector<192x64xbf16>, vector<64x128xbf16>, vector<192x128xf32> -> vector<192x128xf32>
    %61 = arith.addf %56, %60 : vector<192x128xf32>
    %c19 = arith.constant 19 : index
    %c0_56 = arith.constant 0 : index
    %62 = vector.load %arg14[%c19, %c0_56] : memref<272x64xbf16, #tpu.memory_space<vmem>>, vector<192x64xbf16>
    %c8 = arith.constant 8 : index
    %c0_57 = arith.constant 0 : index
    %c0_58 = arith.constant 0 : index
    %63 = vector.load %arg4[%c8, %c0_57, %c0_58] : memref<25x64x128xbf16, #tpu.memory_space<vmem>>, vector<1x64x128xbf16>
    %64 = vector.shape_cast %63 : vector<1x64x128xbf16> to vector<64x128xbf16>
    %cst_59 = arith.constant dense<0.000000e+00> : vector<192x128xf32>
    %65 = tpu.matmul %62, %64, %cst_59 {dimension_numbers = #tpu.dot_dimension_numbers<[1], [0], [0], [1], [0, 0, 1, 1], [], []>} : vector<192x64xbf16>, vector<64x128xbf16>, vector<192x128xf32> -> vector<192x128xf32>
    %66 = arith.addf %61, %65 : vector<192x128xf32>
    %c20 = arith.constant 20 : index
    %c0_60 = arith.constant 0 : index
    %67 = vector.load %arg14[%c20, %c0_60] : memref<272x64xbf16, #tpu.memory_space<vmem>>, vector<192x64xbf16>
    %c9 = arith.constant 9 : index
    %c0_61 = arith.constant 0 : index
    %c0_62 = arith.constant 0 : index
    %68 = vector.load %arg4[%c9, %c0_61, %c0_62] : memref<25x64x128xbf16, #tpu.memory_space<vmem>>, vector<1x64x128xbf16>
    %69 = vector.shape_cast %68 : vector<1x64x128xbf16> to vector<64x128xbf16>
    %cst_63 = arith.constant dense<0.000000e+00> : vector<192x128xf32>
    %70 = tpu.matmul %67, %69, %cst_63 {dimension_numbers = #tpu.dot_dimension_numbers<[1], [0], [0], [1], [0, 0, 1, 1], [], []>} : vector<192x64xbf16>, vector<64x128xbf16>, vector<192x128xf32> -> vector<192x128xf32>
    %71 = arith.addf %66, %70 : vector<192x128xf32>
    %c32 = arith.constant 32 : index
    %c0_64 = arith.constant 0 : index
    %72 = vector.load %arg14[%c32, %c0_64] : memref<272x64xbf16, #tpu.memory_space<vmem>>, vector<192x64xbf16>
    %c10 = arith.constant 10 : index
    %c0_65 = arith.constant 0 : index
    %c0_66 = arith.constant 0 : index
    %73 = vector.load %arg4[%c10, %c0_65, %c0_66] : memref<25x64x128xbf16, #tpu.memory_space<vmem>>, vector<1x64x128xbf16>
    %74 = vector.shape_cast %73 : vector<1x64x128xbf16> to vector<64x128xbf16>
    %cst_67 = arith.constant dense<0.000000e+00> : vector<192x128xf32>
    %75 = tpu.matmul %72, %74, %cst_67 {dimension_numbers = #tpu.dot_dimension_numbers<[1], [0], [0], [1], [0, 0, 1, 1], [], []>} : vector<192x64xbf16>, vector<64x128xbf16>, vector<192x128xf32> -> vector<192x128xf32>
    %76 = arith.addf %71, %75 : vector<192x128xf32>
    %c33 = arith.constant 33 : index
    %c0_68 = arith.constant 0 : index
    %77 = vector.load %arg14[%c33, %c0_68] : memref<272x64xbf16, #tpu.memory_space<vmem>>, vector<192x64xbf16>
    %c11 = arith.constant 11 : index
    %c0_69 = arith.constant 0 : index
    %c0_70 = arith.constant 0 : index
    %78 = vector.load %arg4[%c11, %c0_69, %c0_70] : memref<25x64x128xbf16, #tpu.memory_space<vmem>>, vector<1x64x128xbf16>
    %79 = vector.shape_cast %78 : vector<1x64x128xbf16> to vector<64x128xbf16>
    %cst_71 = arith.constant dense<0.000000e+00> : vector<192x128xf32>
    %80 = tpu.matmul %77, %79, %cst_71 {dimension_numbers = #tpu.dot_dimension_numbers<[1], [0], [0], [1], [0, 0, 1, 1], [], []>} : vector<192x64xbf16>, vector<64x128xbf16>, vector<192x128xf32> -> vector<192x128xf32>
    %81 = arith.addf %76, %80 : vector<192x128xf32>
    %c34 = arith.constant 34 : index
    %c0_72 = arith.constant 0 : index
    %82 = vector.load %arg14[%c34, %c0_72] : memref<272x64xbf16, #tpu.memory_space<vmem>>, vector<192x64xbf16>
    %c12 = arith.constant 12 : index
    %c0_73 = arith.constant 0 : index
    %c0_74 = arith.constant 0 : index
    %83 = vector.load %arg4[%c12, %c0_73, %c0_74] : memref<25x64x128xbf16, #tpu.memory_space<vmem>>, vector<1x64x128xbf16>
    %84 = vector.shape_cast %83 : vector<1x64x128xbf16> to vector<64x128xbf16>
    %cst_75 = arith.constant dense<0.000000e+00> : vector<192x128xf32>
    %85 = tpu.matmul %82, %84, %cst_75 {dimension_numbers = #tpu.dot_dimension_numbers<[1], [0], [0], [1], [0, 0, 1, 1], [], []>} : vector<192x64xbf16>, vector<64x128xbf16>, vector<192x128xf32> -> vector<192x128xf32>
    %86 = arith.addf %81, %85 : vector<192x128xf32>
    %c35 = arith.constant 35 : index
    %c0_76 = arith.constant 0 : index
    %87 = vector.load %arg14[%c35, %c0_76] : memref<272x64xbf16, #tpu.memory_space<vmem>>, vector<192x64xbf16>
    %c13 = arith.constant 13 : index
    %c0_77 = arith.constant 0 : index
    %c0_78 = arith.constant 0 : index
    %88 = vector.load %arg4[%c13, %c0_77, %c0_78] : memref<25x64x128xbf16, #tpu.memory_space<vmem>>, vector<1x64x128xbf16>
    %89 = vector.shape_cast %88 : vector<1x64x128xbf16> to vector<64x128xbf16>
    %cst_79 = arith.constant dense<0.000000e+00> : vector<192x128xf32>
    %90 = tpu.matmul %87, %89, %cst_79 {dimension_numbers = #tpu.dot_dimension_numbers<[1], [0], [0], [1], [0, 0, 1, 1], [], []>} : vector<192x64xbf16>, vector<64x128xbf16>, vector<192x128xf32> -> vector<192x128xf32>
    %91 = arith.addf %86, %90 : vector<192x128xf32>
    %c36 = arith.constant 36 : index
    %c0_80 = arith.constant 0 : index
    %92 = vector.load %arg14[%c36, %c0_80] : memref<272x64xbf16, #tpu.memory_space<vmem>>, vector<192x64xbf16>
    %c14 = arith.constant 14 : index
    %c0_81 = arith.constant 0 : index
    %c0_82 = arith.constant 0 : index
    %93 = vector.load %arg4[%c14, %c0_81, %c0_82] : memref<25x64x128xbf16, #tpu.memory_space<vmem>>, vector<1x64x128xbf16>
    %94 = vector.shape_cast %93 : vector<1x64x128xbf16> to vector<64x128xbf16>
    %cst_83 = arith.constant dense<0.000000e+00> : vector<192x128xf32>
    %95 = tpu.matmul %92, %94, %cst_83 {dimension_numbers = #tpu.dot_dimension_numbers<[1], [0], [0], [1], [0, 0, 1, 1], [], []>} : vector<192x64xbf16>, vector<64x128xbf16>, vector<192x128xf32> -> vector<192x128xf32>
    %96 = arith.addf %91, %95 : vector<192x128xf32>
    %c48 = arith.constant 48 : index
    %c0_84 = arith.constant 0 : index
    %97 = vector.load %arg14[%c48, %c0_84] : memref<272x64xbf16, #tpu.memory_space<vmem>>, vector<192x64xbf16>
    %c15 = arith.constant 15 : index
    %c0_85 = arith.constant 0 : index
    %c0_86 = arith.constant 0 : index
    %98 = vector.load %arg4[%c15, %c0_85, %c0_86] : memref<25x64x128xbf16, #tpu.memory_space<vmem>>, vector<1x64x128xbf16>
    %99 = vector.shape_cast %98 : vector<1x64x128xbf16> to vector<64x128xbf16>
    %cst_87 = arith.constant dense<0.000000e+00> : vector<192x128xf32>
    %100 = tpu.matmul %97, %99, %cst_87 {dimension_numbers = #tpu.dot_dimension_numbers<[1], [0], [0], [1], [0, 0, 1, 1], [], []>} : vector<192x64xbf16>, vector<64x128xbf16>, vector<192x128xf32> -> vector<192x128xf32>
    %101 = arith.addf %96, %100 : vector<192x128xf32>
    %c49 = arith.constant 49 : index
    %c0_88 = arith.constant 0 : index
    %102 = vector.load %arg14[%c49, %c0_88] : memref<272x64xbf16, #tpu.memory_space<vmem>>, vector<192x64xbf16>
    %c16_89 = arith.constant 16 : index
    %c0_90 = arith.constant 0 : index
    %c0_91 = arith.constant 0 : index
    %103 = vector.load %arg4[%c16_89, %c0_90, %c0_91] : memref<25x64x128xbf16, #tpu.memory_space<vmem>>, vector<1x64x128xbf16>
    %104 = vector.shape_cast %103 : vector<1x64x128xbf16> to vector<64x128xbf16>
    %cst_92 = arith.constant dense<0.000000e+00> : vector<192x128xf32>
    %105 = tpu.matmul %102, %104, %cst_92 {dimension_numbers = #tpu.dot_dimension_numbers<[1], [0], [0], [1], [0, 0, 1, 1], [], []>} : vector<192x64xbf16>, vector<64x128xbf16>, vector<192x128xf32> -> vector<192x128xf32>
    %106 = arith.addf %101, %105 : vector<192x128xf32>
    %c50 = arith.constant 50 : index
    %c0_93 = arith.constant 0 : index
    %107 = vector.load %arg14[%c50, %c0_93] : memref<272x64xbf16, #tpu.memory_space<vmem>>, vector<192x64xbf16>
    %c17_94 = arith.constant 17 : index
    %c0_95 = arith.constant 0 : index
    %c0_96 = arith.constant 0 : index
    %108 = vector.load %arg4[%c17_94, %c0_95, %c0_96] : memref<25x64x128xbf16, #tpu.memory_space<vmem>>, vector<1x64x128xbf16>
    %109 = vector.shape_cast %108 : vector<1x64x128xbf16> to vector<64x128xbf16>
    %cst_97 = arith.constant dense<0.000000e+00> : vector<192x128xf32>
    %110 = tpu.matmul %107, %109, %cst_97 {dimension_numbers = #tpu.dot_dimension_numbers<[1], [0], [0], [1], [0, 0, 1, 1], [], []>} : vector<192x64xbf16>, vector<64x128xbf16>, vector<192x128xf32> -> vector<192x128xf32>
    %111 = arith.addf %106, %110 : vector<192x128xf32>
    %c51 = arith.constant 51 : index
    %c0_98 = arith.constant 0 : index
    %112 = vector.load %arg14[%c51, %c0_98] : memref<272x64xbf16, #tpu.memory_space<vmem>>, vector<192x64xbf16>
    %c18_99 = arith.constant 18 : index
    %c0_100 = arith.constant 0 : index
    %c0_101 = arith.constant 0 : index
    %113 = vector.load %arg4[%c18_99, %c0_100, %c0_101] : memref<25x64x128xbf16, #tpu.memory_space<vmem>>, vector<1x64x128xbf16>
    %114 = vector.shape_cast %113 : vector<1x64x128xbf16> to vector<64x128xbf16>
    %cst_102 = arith.constant dense<0.000000e+00> : vector<192x128xf32>
    %115 = tpu.matmul %112, %114, %cst_102 {dimension_numbers = #tpu.dot_dimension_numbers<[1], [0], [0], [1], [0, 0, 1, 1], [], []>} : vector<192x64xbf16>, vector<64x128xbf16>, vector<192x128xf32> -> vector<192x128xf32>
    %116 = arith.addf %111, %115 : vector<192x128xf32>
    %c52 = arith.constant 52 : index
    %c0_103 = arith.constant 0 : index
    %117 = vector.load %arg14[%c52, %c0_103] : memref<272x64xbf16, #tpu.memory_space<vmem>>, vector<192x64xbf16>
    %c19_104 = arith.constant 19 : index
    %c0_105 = arith.constant 0 : index
    %c0_106 = arith.constant 0 : index
    %118 = vector.load %arg4[%c19_104, %c0_105, %c0_106] : memref<25x64x128xbf16, #tpu.memory_space<vmem>>, vector<1x64x128xbf16>
    %119 = vector.shape_cast %118 : vector<1x64x128xbf16> to vector<64x128xbf16>
    %cst_107 = arith.constant dense<0.000000e+00> : vector<192x128xf32>
    %120 = tpu.matmul %117, %119, %cst_107 {dimension_numbers = #tpu.dot_dimension_numbers<[1], [0], [0], [1], [0, 0, 1, 1], [], []>} : vector<192x64xbf16>, vector<64x128xbf16>, vector<192x128xf32> -> vector<192x128xf32>
    %121 = arith.addf %116, %120 : vector<192x128xf32>
    %c64 = arith.constant 64 : index
    %c0_108 = arith.constant 0 : index
    %122 = vector.load %arg14[%c64, %c0_108] : memref<272x64xbf16, #tpu.memory_space<vmem>>, vector<192x64xbf16>
    %c20_109 = arith.constant 20 : index
    %c0_110 = arith.constant 0 : index
    %c0_111 = arith.constant 0 : index
    %123 = vector.load %arg4[%c20_109, %c0_110, %c0_111] : memref<25x64x128xbf16, #tpu.memory_space<vmem>>, vector<1x64x128xbf16>
    %124 = vector.shape_cast %123 : vector<1x64x128xbf16> to vector<64x128xbf16>
    %cst_112 = arith.constant dense<0.000000e+00> : vector<192x128xf32>
    %125 = tpu.matmul %122, %124, %cst_112 {dimension_numbers = #tpu.dot_dimension_numbers<[1], [0], [0], [1], [0, 0, 1, 1], [], []>} : vector<192x64xbf16>, vector<64x128xbf16>, vector<192x128xf32> -> vector<192x128xf32>
    %126 = arith.addf %121, %125 : vector<192x128xf32>
    %c65 = arith.constant 65 : index
    %c0_113 = arith.constant 0 : index
    %127 = vector.load %arg14[%c65, %c0_113] : memref<272x64xbf16, #tpu.memory_space<vmem>>, vector<192x64xbf16>
    %c21 = arith.constant 21 : index
    %c0_114 = arith.constant 0 : index
    %c0_115 = arith.constant 0 : index
    %128 = vector.load %arg4[%c21, %c0_114, %c0_115] : memref<25x64x128xbf16, #tpu.memory_space<vmem>>, vector<1x64x128xbf16>
    %129 = vector.shape_cast %128 : vector<1x64x128xbf16> to vector<64x128xbf16>
    %cst_116 = arith.constant dense<0.000000e+00> : vector<192x128xf32>
    %130 = tpu.matmul %127, %129, %cst_116 {dimension_numbers = #tpu.dot_dimension_numbers<[1], [0], [0], [1], [0, 0, 1, 1], [], []>} : vector<192x64xbf16>, vector<64x128xbf16>, vector<192x128xf32> -> vector<192x128xf32>
    %131 = arith.addf %126, %130 : vector<192x128xf32>
    %c66 = arith.constant 66 : index
    %c0_117 = arith.constant 0 : index
    %132 = vector.load %arg14[%c66, %c0_117] : memref<272x64xbf16, #tpu.memory_space<vmem>>, vector<192x64xbf16>
    %c22 = arith.constant 22 : index
    %c0_118 = arith.constant 0 : index
    %c0_119 = arith.constant 0 : index
    %133 = vector.load %arg4[%c22, %c0_118, %c0_119] : memref<25x64x128xbf16, #tpu.memory_space<vmem>>, vector<1x64x128xbf16>
    %134 = vector.shape_cast %133 : vector<1x64x128xbf16> to vector<64x128xbf16>
    %cst_120 = arith.constant dense<0.000000e+00> : vector<192x128xf32>
    %135 = tpu.matmul %132, %134, %cst_120 {dimension_numbers = #tpu.dot_dimension_numbers<[1], [0], [0], [1], [0, 0, 1, 1], [], []>} : vector<192x64xbf16>, vector<64x128xbf16>, vector<192x128xf32> -> vector<192x128xf32>
    %136 = arith.addf %131, %135 : vector<192x128xf32>
    %c67 = arith.constant 67 : index
    %c0_121 = arith.constant 0 : index
    %137 = vector.load %arg14[%c67, %c0_121] : memref<272x64xbf16, #tpu.memory_space<vmem>>, vector<192x64xbf16>
    %c23 = arith.constant 23 : index
    %c0_122 = arith.constant 0 : index
    %c0_123 = arith.constant 0 : index
    %138 = vector.load %arg4[%c23, %c0_122, %c0_123] : memref<25x64x128xbf16, #tpu.memory_space<vmem>>, vector<1x64x128xbf16>
    %139 = vector.shape_cast %138 : vector<1x64x128xbf16> to vector<64x128xbf16>
    %cst_124 = arith.constant dense<0.000000e+00> : vector<192x128xf32>
    %140 = tpu.matmul %137, %139, %cst_124 {dimension_numbers = #tpu.dot_dimension_numbers<[1], [0], [0], [1], [0, 0, 1, 1], [], []>} : vector<192x64xbf16>, vector<64x128xbf16>, vector<192x128xf32> -> vector<192x128xf32>
    %141 = arith.addf %136, %140 : vector<192x128xf32>
    %c68 = arith.constant 68 : index
    %c0_125 = arith.constant 0 : index
    %142 = vector.load %arg14[%c68, %c0_125] : memref<272x64xbf16, #tpu.memory_space<vmem>>, vector<192x64xbf16>
    %c24 = arith.constant 24 : index
    %c0_126 = arith.constant 0 : index
    %c0_127 = arith.constant 0 : index
    %143 = vector.load %arg4[%c24, %c0_126, %c0_127] : memref<25x64x128xbf16, #tpu.memory_space<vmem>>, vector<1x64x128xbf16>
    %144 = vector.shape_cast %143 : vector<1x64x128xbf16> to vector<64x128xbf16>
    %cst_128 = arith.constant dense<0.000000e+00> : vector<192x128xf32>
    %145 = tpu.matmul %142, %144, %cst_128 {dimension_numbers = #tpu.dot_dimension_numbers<[1], [0], [0], [1], [0, 0, 1, 1], [], []>} : vector<192x64xbf16>, vector<64x128xbf16>, vector<192x128xf32> -> vector<192x128xf32>
    %146 = arith.addf %141, %145 : vector<192x128xf32>
    %c0_129 = arith.constant 0 : index
    %c0_130 = arith.constant 0 : index
    %147 = vector.load %arg5[%c0_129, %c0_130] : memref<1x128xf32, #tpu.memory_space<vmem>>, vector<1x128xf32>
    %148 = vector.broadcast %147 : vector<1x128xf32> to vector<192x128xf32>
    %149 = arith.addf %146, %148 : vector<192x128xf32>
    %cst_131 = arith.constant 0.000000e+00 : f32
    %150 = vector.broadcast %cst_131 : f32 to vector<192x128xf32>
    %151 = arith.maximumf %149, %150 : vector<192x128xf32>
    %152 = arith.truncf %151 : vector<192x128xf32> to vector<192x128xbf16>
    %c0_132 = arith.constant 0 : index
    %c0_133 = arith.constant 0 : index
    %c0_134 = arith.constant 0 : index
    %153 = vector.load %arg6[%c0_132, %c0_133, %c0_134] : memref<4x48x192xbf16, #tpu.memory_space<vmem>>, vector<1x48x192xbf16>
    %154 = vector.shape_cast %153 : vector<1x48x192xbf16> to vector<48x192xbf16>
    %cst_135 = arith.constant dense<0.000000e+00> : vector<48x128xf32>
    %155 = tpu.matmul %154, %152, %cst_135 {dimension_numbers = #tpu.dot_dimension_numbers<[1], [0], [0], [1], [0, 0, 1, 1], [], []>} : vector<48x192xbf16>, vector<192x128xbf16>, vector<48x128xf32> -> vector<48x128xf32>
    %c1_136 = arith.constant 1 : index
    %c0_137 = arith.constant 0 : index
    %c0_138 = arith.constant 0 : index
    %156 = vector.load %arg6[%c1_136, %c0_137, %c0_138] : memref<4x48x192xbf16, #tpu.memory_space<vmem>>, vector<1x48x192xbf16>
    %157 = vector.shape_cast %156 : vector<1x48x192xbf16> to vector<48x192xbf16>
    %cst_139 = arith.constant dense<0.000000e+00> : vector<48x128xf32>
    %158 = tpu.matmul %157, %152, %cst_139 {dimension_numbers = #tpu.dot_dimension_numbers<[1], [0], [0], [1], [0, 0, 1, 1], [], []>} : vector<48x192xbf16>, vector<192x128xbf16>, vector<48x128xf32> -> vector<48x128xf32>
    %159 = arith.maximumf %155, %158 : vector<48x128xf32>
    %c2_140 = arith.constant 2 : index
    %c0_141 = arith.constant 0 : index
    %c0_142 = arith.constant 0 : index
    %160 = vector.load %arg6[%c2_140, %c0_141, %c0_142] : memref<4x48x192xbf16, #tpu.memory_space<vmem>>, vector<1x48x192xbf16>
    %161 = vector.shape_cast %160 : vector<1x48x192xbf16> to vector<48x192xbf16>
    %cst_143 = arith.constant dense<0.000000e+00> : vector<48x128xf32>
    %162 = tpu.matmul %161, %152, %cst_143 {dimension_numbers = #tpu.dot_dimension_numbers<[1], [0], [0], [1], [0, 0, 1, 1], [], []>} : vector<48x192xbf16>, vector<192x128xbf16>, vector<48x128xf32> -> vector<48x128xf32>
    %163 = arith.maximumf %159, %162 : vector<48x128xf32>
    %c3_144 = arith.constant 3 : index
    %c0_145 = arith.constant 0 : index
    %c0_146 = arith.constant 0 : index
    %164 = vector.load %arg6[%c3_144, %c0_145, %c0_146] : memref<4x48x192xbf16, #tpu.memory_space<vmem>>, vector<1x48x192xbf16>
    %165 = vector.shape_cast %164 : vector<1x48x192xbf16> to vector<48x192xbf16>
    %cst_147 = arith.constant dense<0.000000e+00> : vector<48x128xf32>
    %166 = tpu.matmul %165, %152, %cst_147 {dimension_numbers = #tpu.dot_dimension_numbers<[1], [0], [0], [1], [0, 0, 1, 1], [], []>} : vector<48x192xbf16>, vector<192x128xbf16>, vector<48x128xf32> -> vector<48x128xf32>
    %167 = arith.maximumf %163, %166 : vector<48x128xf32>
    %c0_148 = arith.constant 0 : index
    %c0_149 = arith.constant 0 : index
    %c0_150 = arith.constant 0 : index
    %168 = vector.load %arg7[%c0_148, %c0_149, %c0_150] : memref<16x32x48xbf16, #tpu.memory_space<vmem>>, vector<1x32x48xbf16>
    %169 = vector.shape_cast %168 : vector<1x32x48xbf16> to vector<32x48xbf16>
    %170 = vector.extract_strided_slice %167 {offsets = [0, 0], sizes = [48, 8], strides = [1, 1]} : vector<48x128xf32> to vector<48x8xf32>
    %171 = arith.truncf %170 : vector<48x8xf32> to vector<48x8xbf16>
    %cst_151 = arith.constant dense<0.000000e+00> : vector<32x8xf32>
    %172 = tpu.matmul %169, %171, %cst_151 {dimension_numbers = #tpu.dot_dimension_numbers<[1], [0], [0], [1], [0, 0, 1, 1], [], []>} : vector<32x48xbf16>, vector<48x8xbf16>, vector<32x8xf32> -> vector<32x8xf32>
    %c1_152 = arith.constant 1 : index
    %c0_153 = arith.constant 0 : index
    %c0_154 = arith.constant 0 : index
    %173 = vector.load %arg7[%c1_152, %c0_153, %c0_154] : memref<16x32x48xbf16, #tpu.memory_space<vmem>>, vector<1x32x48xbf16>
    %174 = vector.shape_cast %173 : vector<1x32x48xbf16> to vector<32x48xbf16>
    %175 = vector.extract_strided_slice %167 {offsets = [0, 8], sizes = [48, 8], strides = [1, 1]} : vector<48x128xf32> to vector<48x8xf32>
    %176 = arith.truncf %175 : vector<48x8xf32> to vector<48x8xbf16>
    %cst_155 = arith.constant dense<0.000000e+00> : vector<32x8xf32>
    %177 = tpu.matmul %174, %176, %cst_155 {dimension_numbers = #tpu.dot_dimension_numbers<[1], [0], [0], [1], [0, 0, 1, 1], [], []>} : vector<32x48xbf16>, vector<48x8xbf16>, vector<32x8xf32> -> vector<32x8xf32>
    %178 = arith.addf %172, %177 : vector<32x8xf32>
    %c2_156 = arith.constant 2 : index
    %c0_157 = arith.constant 0 : index
    %c0_158 = arith.constant 0 : index
    %179 = vector.load %arg7[%c2_156, %c0_157, %c0_158] : memref<16x32x48xbf16, #tpu.memory_space<vmem>>, vector<1x32x48xbf16>
    %180 = vector.shape_cast %179 : vector<1x32x48xbf16> to vector<32x48xbf16>
    %181 = vector.extract_strided_slice %167 {offsets = [0, 16], sizes = [48, 8], strides = [1, 1]} : vector<48x128xf32> to vector<48x8xf32>
    %182 = arith.truncf %181 : vector<48x8xf32> to vector<48x8xbf16>
    %cst_159 = arith.constant dense<0.000000e+00> : vector<32x8xf32>
    %183 = tpu.matmul %180, %182, %cst_159 {dimension_numbers = #tpu.dot_dimension_numbers<[1], [0], [0], [1], [0, 0, 1, 1], [], []>} : vector<32x48xbf16>, vector<48x8xbf16>, vector<32x8xf32> -> vector<32x8xf32>
    %184 = arith.addf %178, %183 : vector<32x8xf32>
    %c3_160 = arith.constant 3 : index
    %c0_161 = arith.constant 0 : index
    %c0_162 = arith.constant 0 : index
    %185 = vector.load %arg7[%c3_160, %c0_161, %c0_162] : memref<16x32x48xbf16, #tpu.memory_space<vmem>>, vector<1x32x48xbf16>
    %186 = vector.shape_cast %185 : vector<1x32x48xbf16> to vector<32x48xbf16>
    %187 = vector.extract_strided_slice %167 {offsets = [0, 24], sizes = [48, 8], strides = [1, 1]} : vector<48x128xf32> to vector<48x8xf32>
    %188 = arith.truncf %187 : vector<48x8xf32> to vector<48x8xbf16>
    %cst_163 = arith.constant dense<0.000000e+00> : vector<32x8xf32>
    %189 = tpu.matmul %186, %188, %cst_163 {dimension_numbers = #tpu.dot_dimension_numbers<[1], [0], [0], [1], [0, 0, 1, 1], [], []>} : vector<32x48xbf16>, vector<48x8xbf16>, vector<32x8xf32> -> vector<32x8xf32>
    %190 = arith.addf %184, %189 : vector<32x8xf32>
    %c4_164 = arith.constant 4 : index
    %c0_165 = arith.constant 0 : index
    %c0_166 = arith.constant 0 : index
    %191 = vector.load %arg7[%c4_164, %c0_165, %c0_166] : memref<16x32x48xbf16, #tpu.memory_space<vmem>>, vector<1x32x48xbf16>
    %192 = vector.shape_cast %191 : vector<1x32x48xbf16> to vector<32x48xbf16>
    %193 = vector.extract_strided_slice %167 {offsets = [0, 32], sizes = [48, 8], strides = [1, 1]} : vector<48x128xf32> to vector<48x8xf32>
    %194 = arith.truncf %193 : vector<48x8xf32> to vector<48x8xbf16>
    %cst_167 = arith.constant dense<0.000000e+00> : vector<32x8xf32>
    %195 = tpu.matmul %192, %194, %cst_167 {dimension_numbers = #tpu.dot_dimension_numbers<[1], [0], [0], [1], [0, 0, 1, 1], [], []>} : vector<32x48xbf16>, vector<48x8xbf16>, vector<32x8xf32> -> vector<32x8xf32>
    %196 = arith.addf %190, %195 : vector<32x8xf32>
    %c5_168 = arith.constant 5 : index
    %c0_169 = arith.constant 0 : index
    %c0_170 = arith.constant 0 : index
    %197 = vector.load %arg7[%c5_168, %c0_169, %c0_170] : memref<16x32x48xbf16, #tpu.memory_space<vmem>>, vector<1x32x48xbf16>
    %198 = vector.shape_cast %197 : vector<1x32x48xbf16> to vector<32x48xbf16>
    %199 = vector.extract_strided_slice %167 {offsets = [0, 40], sizes = [48, 8], strides = [1, 1]} : vector<48x128xf32> to vector<48x8xf32>
    %200 = arith.truncf %199 : vector<48x8xf32> to vector<48x8xbf16>
    %cst_171 = arith.constant dense<0.000000e+00> : vector<32x8xf32>
    %201 = tpu.matmul %198, %200, %cst_171 {dimension_numbers = #tpu.dot_dimension_numbers<[1], [0], [0], [1], [0, 0, 1, 1], [], []>} : vector<32x48xbf16>, vector<48x8xbf16>, vector<32x8xf32> -> vector<32x8xf32>
    %202 = arith.addf %196, %201 : vector<32x8xf32>
    %c6_172 = arith.constant 6 : index
    %c0_173 = arith.constant 0 : index
    %c0_174 = arith.constant 0 : index
    %203 = vector.load %arg7[%c6_172, %c0_173, %c0_174] : memref<16x32x48xbf16, #tpu.memory_space<vmem>>, vector<1x32x48xbf16>
    %204 = vector.shape_cast %203 : vector<1x32x48xbf16> to vector<32x48xbf16>
    %205 = vector.extract_strided_slice %167 {offsets = [0, 48], sizes = [48, 8], strides = [1, 1]} : vector<48x128xf32> to vector<48x8xf32>
    %206 = arith.truncf %205 : vector<48x8xf32> to vector<48x8xbf16>
    %cst_175 = arith.constant dense<0.000000e+00> : vector<32x8xf32>
    %207 = tpu.matmul %204, %206, %cst_175 {dimension_numbers = #tpu.dot_dimension_numbers<[1], [0], [0], [1], [0, 0, 1, 1], [], []>} : vector<32x48xbf16>, vector<48x8xbf16>, vector<32x8xf32> -> vector<32x8xf32>
    %208 = arith.addf %202, %207 : vector<32x8xf32>
    %c7_176 = arith.constant 7 : index
    %c0_177 = arith.constant 0 : index
    %c0_178 = arith.constant 0 : index
    %209 = vector.load %arg7[%c7_176, %c0_177, %c0_178] : memref<16x32x48xbf16, #tpu.memory_space<vmem>>, vector<1x32x48xbf16>
    %210 = vector.shape_cast %209 : vector<1x32x48xbf16> to vector<32x48xbf16>
    %211 = vector.extract_strided_slice %167 {offsets = [0, 56], sizes = [48, 8], strides = [1, 1]} : vector<48x128xf32> to vector<48x8xf32>
    %212 = arith.truncf %211 : vector<48x8xf32> to vector<48x8xbf16>
    %cst_179 = arith.constant dense<0.000000e+00> : vector<32x8xf32>
    %213 = tpu.matmul %210, %212, %cst_179 {dimension_numbers = #tpu.dot_dimension_numbers<[1], [0], [0], [1], [0, 0, 1, 1], [], []>} : vector<32x48xbf16>, vector<48x8xbf16>, vector<32x8xf32> -> vector<32x8xf32>
    %214 = arith.addf %208, %213 : vector<32x8xf32>
    %c8_180 = arith.constant 8 : index
    %c0_181 = arith.constant 0 : index
    %c0_182 = arith.constant 0 : index
    %215 = vector.load %arg7[%c8_180, %c0_181, %c0_182] : memref<16x32x48xbf16, #tpu.memory_space<vmem>>, vector<1x32x48xbf16>
    %216 = vector.shape_cast %215 : vector<1x32x48xbf16> to vector<32x48xbf16>
    %217 = vector.extract_strided_slice %167 {offsets = [0, 64], sizes = [48, 8], strides = [1, 1]} : vector<48x128xf32> to vector<48x8xf32>
    %218 = arith.truncf %217 : vector<48x8xf32> to vector<48x8xbf16>
    %cst_183 = arith.constant dense<0.000000e+00> : vector<32x8xf32>
    %219 = tpu.matmul %216, %218, %cst_183 {dimension_numbers = #tpu.dot_dimension_numbers<[1], [0], [0], [1], [0, 0, 1, 1], [], []>} : vector<32x48xbf16>, vector<48x8xbf16>, vector<32x8xf32> -> vector<32x8xf32>
    %220 = arith.addf %214, %219 : vector<32x8xf32>
    %c9_184 = arith.constant 9 : index
    %c0_185 = arith.constant 0 : index
    %c0_186 = arith.constant 0 : index
    %221 = vector.load %arg7[%c9_184, %c0_185, %c0_186] : memref<16x32x48xbf16, #tpu.memory_space<vmem>>, vector<1x32x48xbf16>
    %222 = vector.shape_cast %221 : vector<1x32x48xbf16> to vector<32x48xbf16>
    %223 = vector.extract_strided_slice %167 {offsets = [0, 72], sizes = [48, 8], strides = [1, 1]} : vector<48x128xf32> to vector<48x8xf32>
    %224 = arith.truncf %223 : vector<48x8xf32> to vector<48x8xbf16>
    %cst_187 = arith.constant dense<0.000000e+00> : vector<32x8xf32>
    %225 = tpu.matmul %222, %224, %cst_187 {dimension_numbers = #tpu.dot_dimension_numbers<[1], [0], [0], [1], [0, 0, 1, 1], [], []>} : vector<32x48xbf16>, vector<48x8xbf16>, vector<32x8xf32> -> vector<32x8xf32>
    %226 = arith.addf %220, %225 : vector<32x8xf32>
    %c10_188 = arith.constant 10 : index
    %c0_189 = arith.constant 0 : index
    %c0_190 = arith.constant 0 : index
    %227 = vector.load %arg7[%c10_188, %c0_189, %c0_190] : memref<16x32x48xbf16, #tpu.memory_space<vmem>>, vector<1x32x48xbf16>
    %228 = vector.shape_cast %227 : vector<1x32x48xbf16> to vector<32x48xbf16>
    %229 = vector.extract_strided_slice %167 {offsets = [0, 80], sizes = [48, 8], strides = [1, 1]} : vector<48x128xf32> to vector<48x8xf32>
    %230 = arith.truncf %229 : vector<48x8xf32> to vector<48x8xbf16>
    %cst_191 = arith.constant dense<0.000000e+00> : vector<32x8xf32>
    %231 = tpu.matmul %228, %230, %cst_191 {dimension_numbers = #tpu.dot_dimension_numbers<[1], [0], [0], [1], [0, 0, 1, 1], [], []>} : vector<32x48xbf16>, vector<48x8xbf16>, vector<32x8xf32> -> vector<32x8xf32>
    %232 = arith.addf %226, %231 : vector<32x8xf32>
    %c11_192 = arith.constant 11 : index
    %c0_193 = arith.constant 0 : index
    %c0_194 = arith.constant 0 : index
    %233 = vector.load %arg7[%c11_192, %c0_193, %c0_194] : memref<16x32x48xbf16, #tpu.memory_space<vmem>>, vector<1x32x48xbf16>
    %234 = vector.shape_cast %233 : vector<1x32x48xbf16> to vector<32x48xbf16>
    %235 = vector.extract_strided_slice %167 {offsets = [0, 88], sizes = [48, 8], strides = [1, 1]} : vector<48x128xf32> to vector<48x8xf32>
    %236 = arith.truncf %235 : vector<48x8xf32> to vector<48x8xbf16>
    %cst_195 = arith.constant dense<0.000000e+00> : vector<32x8xf32>
    %237 = tpu.matmul %234, %236, %cst_195 {dimension_numbers = #tpu.dot_dimension_numbers<[1], [0], [0], [1], [0, 0, 1, 1], [], []>} : vector<32x48xbf16>, vector<48x8xbf16>, vector<32x8xf32> -> vector<32x8xf32>
    %238 = arith.addf %232, %237 : vector<32x8xf32>
    %c12_196 = arith.constant 12 : index
    %c0_197 = arith.constant 0 : index
    %c0_198 = arith.constant 0 : index
    %239 = vector.load %arg7[%c12_196, %c0_197, %c0_198] : memref<16x32x48xbf16, #tpu.memory_space<vmem>>, vector<1x32x48xbf16>
    %240 = vector.shape_cast %239 : vector<1x32x48xbf16> to vector<32x48xbf16>
    %241 = vector.extract_strided_slice %167 {offsets = [0, 96], sizes = [48, 8], strides = [1, 1]} : vector<48x128xf32> to vector<48x8xf32>
    %242 = arith.truncf %241 : vector<48x8xf32> to vector<48x8xbf16>
    %cst_199 = arith.constant dense<0.000000e+00> : vector<32x8xf32>
    %243 = tpu.matmul %240, %242, %cst_199 {dimension_numbers = #tpu.dot_dimension_numbers<[1], [0], [0], [1], [0, 0, 1, 1], [], []>} : vector<32x48xbf16>, vector<48x8xbf16>, vector<32x8xf32> -> vector<32x8xf32>
    %244 = arith.addf %238, %243 : vector<32x8xf32>
    %c13_200 = arith.constant 13 : index
    %c0_201 = arith.constant 0 : index
    %c0_202 = arith.constant 0 : index
    %245 = vector.load %arg7[%c13_200, %c0_201, %c0_202] : memref<16x32x48xbf16, #tpu.memory_space<vmem>>, vector<1x32x48xbf16>
    %246 = vector.shape_cast %245 : vector<1x32x48xbf16> to vector<32x48xbf16>
    %247 = vector.extract_strided_slice %167 {offsets = [0, 104], sizes = [48, 8], strides = [1, 1]} : vector<48x128xf32> to vector<48x8xf32>
    %248 = arith.truncf %247 : vector<48x8xf32> to vector<48x8xbf16>
    %cst_203 = arith.constant dense<0.000000e+00> : vector<32x8xf32>
    %249 = tpu.matmul %246, %248, %cst_203 {dimension_numbers = #tpu.dot_dimension_numbers<[1], [0], [0], [1], [0, 0, 1, 1], [], []>} : vector<32x48xbf16>, vector<48x8xbf16>, vector<32x8xf32> -> vector<32x8xf32>
    %250 = arith.addf %244, %249 : vector<32x8xf32>
    %c14_204 = arith.constant 14 : index
    %c0_205 = arith.constant 0 : index
    %c0_206 = arith.constant 0 : index
    %251 = vector.load %arg7[%c14_204, %c0_205, %c0_206] : memref<16x32x48xbf16, #tpu.memory_space<vmem>>, vector<1x32x48xbf16>
    %252 = vector.shape_cast %251 : vector<1x32x48xbf16> to vector<32x48xbf16>
    %253 = vector.extract_strided_slice %167 {offsets = [0, 112], sizes = [48, 8], strides = [1, 1]} : vector<48x128xf32> to vector<48x8xf32>
    %254 = arith.truncf %253 : vector<48x8xf32> to vector<48x8xbf16>
    %cst_207 = arith.constant dense<0.000000e+00> : vector<32x8xf32>
    %255 = tpu.matmul %252, %254, %cst_207 {dimension_numbers = #tpu.dot_dimension_numbers<[1], [0], [0], [1], [0, 0, 1, 1], [], []>} : vector<32x48xbf16>, vector<48x8xbf16>, vector<32x8xf32> -> vector<32x8xf32>
    %256 = arith.addf %250, %255 : vector<32x8xf32>
    %c15_208 = arith.constant 15 : index
    %c0_209 = arith.constant 0 : index
    %c0_210 = arith.constant 0 : index
    %257 = vector.load %arg7[%c15_208, %c0_209, %c0_210] : memref<16x32x48xbf16, #tpu.memory_space<vmem>>, vector<1x32x48xbf16>
    %258 = vector.shape_cast %257 : vector<1x32x48xbf16> to vector<32x48xbf16>
    %259 = vector.extract_strided_slice %167 {offsets = [0, 120], sizes = [48, 8], strides = [1, 1]} : vector<48x128xf32> to vector<48x8xf32>
    %260 = arith.truncf %259 : vector<48x8xf32> to vector<48x8xbf16>
    %cst_211 = arith.constant dense<0.000000e+00> : vector<32x8xf32>
    %261 = tpu.matmul %258, %260, %cst_211 {dimension_numbers = #tpu.dot_dimension_numbers<[1], [0], [0], [1], [0, 0, 1, 1], [], []>} : vector<32x48xbf16>, vector<48x8xbf16>, vector<32x8xf32> -> vector<32x8xf32>
    %262 = arith.addf %256, %261 : vector<32x8xf32>
    %c0_212 = arith.constant 0 : index
    %c0_213 = arith.constant 0 : index
    %263 = vector.load %arg8[%c0_212, %c0_213] : memref<32x1xf32, #tpu.memory_space<vmem>>, vector<32x1xf32>
    %264 = vector.broadcast %263 : vector<32x1xf32> to vector<32x8xf32>
    %265 = arith.addf %262, %264 : vector<32x8xf32>
    %cst_214 = arith.constant 0.000000e+00 : f32
    %266 = vector.broadcast %cst_214 : f32 to vector<32x8xf32>
    %267 = arith.maximumf %265, %266 : vector<32x8xf32>
    %c0_215 = arith.constant 0 : index
    %c0_216 = arith.constant 0 : index
    %268 = vector.load %arg9[%c0_215, %c0_216] : memref<16x32xf32, #tpu.memory_space<vmem>>, vector<16x32xf32>
    %cst_217 = arith.constant dense<0.000000e+00> : vector<16x8xf32>
    %269 = tpu.matmul %268, %267, %cst_217 {dimension_numbers = #tpu.dot_dimension_numbers<[1], [0], [0], [1], [0, 0, 1, 1], [], []>} : vector<16x32xf32>, vector<32x8xf32>, vector<16x8xf32> -> vector<16x8xf32>
    %c0_218 = arith.constant 0 : index
    %c0_219 = arith.constant 0 : index
    %270 = vector.load %arg10[%c0_218, %c0_219] : memref<16x1xf32, #tpu.memory_space<vmem>>, vector<16x1xf32>
    %271 = vector.broadcast %270 : vector<16x1xf32> to vector<16x8xf32>
    %272 = arith.addf %269, %271 : vector<16x8xf32>
    %cst_220 = arith.constant 0.000000e+00 : f32
    %273 = vector.broadcast %cst_220 : f32 to vector<16x8xf32>
    %274 = arith.maximumf %272, %273 : vector<16x8xf32>
    %c0_221 = arith.constant 0 : index
    %c0_222 = arith.constant 0 : index
    %275 = vector.load %arg11[%c0_221, %c0_222] : memref<2x16xf32, #tpu.memory_space<vmem>>, vector<2x16xf32>
    %cst_223 = arith.constant dense<0.000000e+00> : vector<2x8xf32>
    %276 = tpu.matmul %275, %274, %cst_223 {dimension_numbers = #tpu.dot_dimension_numbers<[1], [0], [0], [1], [0, 0, 1, 1], [], []>} : vector<2x16xf32>, vector<16x8xf32>, vector<2x8xf32> -> vector<2x8xf32>
    %c0_224 = arith.constant 0 : index
    %c0_225 = arith.constant 0 : index
    %277 = vector.load %arg12[%c0_224, %c0_225] : memref<2x1xf32, #tpu.memory_space<vmem>>, vector<2x1xf32>
    %278 = vector.broadcast %277 : vector<2x1xf32> to vector<2x8xf32>
    %279 = arith.addf %276, %278 : vector<2x8xf32>
    %c0_226 = arith.constant 0 : index
    %c0_227 = arith.constant 0 : index
    %c0_228 = arith.constant 0 : index
    %280 = vector.load %arg13[%c0_226, %c0_227, %c0_228] : memref<1x2x8xf32, #tpu.memory_space<vmem>>, vector<1x2x8xf32>
    %281 = vector.shape_cast %280 : vector<1x2x8xf32> to vector<2x8xf32>
    %282 = vector.shape_cast %279 : vector<2x8xf32> to vector<1x2x8xf32>
    tpu.vector_store %arg13[%c0_226, %c0_227, %c0_228], %282 {strides = array<i32>} : memref<1x2x8xf32, #tpu.memory_space<vmem>>, vector<1x2x8xf32>,
    return
  }
  func.func @transform_0(%arg0: i32) -> (i32, i32) {
    %c0_i32 = arith.constant 0 : i32
    %c0_i32_0 = arith.constant 0 : i32
    return %arg0, %c0_i32 : i32, i32
  }
  func.func @transform_1(%arg0: i32) -> (i32, i32) {
    %c0_i32 = arith.constant 0 : i32
    %c0_i32_0 = arith.constant 0 : i32
    %c0_i32_1 = arith.constant 0 : i32
    return %c0_i32, %c0_i32_0 : i32, i32
  }
  func.func @transform_2(%arg0: i32) -> (i32, i32) {
    %c0_i32 = arith.constant 0 : i32
    %c0_i32_0 = arith.constant 0 : i32
    %c0_i32_1 = arith.constant 0 : i32
    return %c0_i32, %c0_i32_0 : i32, i32
  }
  func.func @transform_3(%arg0: i32) -> (i32, i32, i32) {
    %c0_i32 = arith.constant 0 : i32
    %c0_i32_0 = arith.constant 0 : i32
    %c0_i32_1 = arith.constant 0 : i32
    %c0_i32_2 = arith.constant 0 : i32
    return %c0_i32, %c0_i32_0, %c0_i32_1 : i32, i32, i32
  }
  func.func @transform_4(%arg0: i32) -> (i32, i32) {
    %c0_i32 = arith.constant 0 : i32
    %c0_i32_0 = arith.constant 0 : i32
    %c0_i32_1 = arith.constant 0 : i32
    return %c0_i32, %c0_i32_0 : i32, i32
  }
  func.func @transform_5(%arg0: i32) -> (i32, i32, i32) {
    %c0_i32 = arith.constant 0 : i32
    %c0_i32_0 = arith.constant 0 : i32
    %c0_i32_1 = arith.constant 0 : i32
    %c0_i32_2 = arith.constant 0 : i32
    return %c0_i32, %c0_i32_0, %c0_i32_1 : i32, i32, i32
  }
  func.func @transform_6(%arg0: i32) -> (i32, i32, i32) {
    %c0_i32 = arith.constant 0 : i32
    %c0_i32_0 = arith.constant 0 : i32
    %c0_i32_1 = arith.constant 0 : i32
    %c0_i32_2 = arith.constant 0 : i32
    return %c0_i32, %c0_i32_0, %c0_i32_1 : i32, i32, i32
  }
  func.func @transform_7(%arg0: i32) -> (i32, i32) {
    %c0_i32 = arith.constant 0 : i32
    %c0_i32_0 = arith.constant 0 : i32
    %c0_i32_1 = arith.constant 0 : i32
    return %c0_i32, %c0_i32_0 : i32, i32
  }
  func.func @transform_8(%arg0: i32) -> (i32, i32) {
    %c0_i32 = arith.constant 0 : i32
    %c0_i32_0 = arith.constant 0 : i32
    %c0_i32_1 = arith.constant 0 : i32
    return %c0_i32, %c0_i32_0 : i32, i32
  }
  func.func @transform_9(%arg0: i32) -> (i32, i32) {
    %c0_i32 = arith.constant 0 : i32
    %c0_i32_0 = arith.constant 0 : i32
    %c0_i32_1 = arith.constant 0 : i32
    return %c0_i32, %c0_i32_0 : i32, i32
  }
  func.func @transform_10(%arg0: i32) -> (i32, i32) {
    %c0_i32 = arith.constant 0 : i32
    %c0_i32_0 = arith.constant 0 : i32
    %c0_i32_1 = arith.constant 0 : i32
    return %c0_i32, %c0_i32_0 : i32, i32
  }
  func.func @transform_11(%arg0: i32) -> (i32, i32) {
    %c0_i32 = arith.constant 0 : i32
    %c0_i32_0 = arith.constant 0 : i32
    %c0_i32_1 = arith.constant 0 : i32
    return %c0_i32, %c0_i32_0 : i32, i32
  }
  func.func @transform_12(%arg0: i32) -> (i32, i32, i32) {
    %c0_i32 = arith.constant 0 : i32
    %c0_i32_0 = arith.constant 0 : i32
    %c0_i32_1 = arith.constant 0 : i32
    return %arg0, %c0_i32, %c0_i32_0 : i32, i32, i32
  }
}

</mosaic_0001>

<bundles_post_ra>
// kernel: cnn_forward_pallas.1
= control target key start
LH: loop header
LB: loop body
LE: loop exit
PB: predicated region body
PF: predicated region fallthrough
CT: control target
= control target key end

     0   :  { %s14618_s21 = smov 0   ;;  %s17792_s0 = inlined_call_operand.vmem [shape: bf16[2048,200], index: 0, kind: input, shape index: {}]   ;;  %s17793_s1 = inlined_call_operand.vmem [shape: bf16[200,64], index: 1, kind: input, shape index: {}]   ;;  %s17794_s2 = inlined_call_operand.vmem [shape: f32[1,64], index: 2, kind: input, shape index: {}]   ;;  %s17795_s3 = inlined_call_operand.vmem [shape: bf16[25,64,128], index: 3, kind: input, shape index: {}]   ;;  %s17796_s4 = inlined_call_operand.vmem [shape: f32[1,128], index: 4, kind: input, shape index: {}]   ;;  %s17797_s5 = inlined_call_operand.vmem [shape: bf16[4,48,192], index: 5, kind: input, shape index: {}]   ;;  %s17798_s6 = inlined_call_operand.vmem [shape: bf16[16,32,48], index: 6, kind: input, shape index: {}]   ;;  %s17799_s7 = inlined_call_operand.vmem [shape: f32[32,1], index: 7, kind: input, shape index: {}]   ;;  %s17800_s8 = inlined_call_operand.vmem [shape: f32[16,32], index: 8, kind: input, shape index: {}]   ;;  %s17801_s9 = inlined_call_operand.vmem [shape: f32[16,1], index: 9, kind: input, shape index: {}]   ;;  %s17802_s10 = inlined_call_operand.vmem [shape: f32[2,16], index: 10, kind: input, shape index: {}]   ;;  %s17803_s11 = inlined_call_operand.vmem [shape: f32[2,1], index: 11, kind: input, shape index: {}]   ;;  %s17804_s12 = inlined_call_operand.vmem [shape: f32[2,2,8], index: 12, kind: output, shape index: {}]  }
   0x1 LB: > { %s14624_s22 = sadd.s32 4294967295, %s14532_s21   ;;  %p10976_p0 = scmp.ge.s32.totalorder %s14532_s21, 1  ;;  %s14532_s21 = sphi %s14618_s21, %s22_s21  }
   0x2   : > { %p364_p1 = scmp.lt.s32.totalorder %s14532_s21, 3 }
   0x4   : > { %p365_p2 = pnand %p10976_p0, %p364_p1 }
   0x6   : > { %368 = sbr.rel (%p365_p2) target bundleno = 3365 (0xd25), region = 68 }
   0xd   : > { %v14107_v0 = vld [vmem:[%s17793_s1] sm:$0xff]   ;;  %v17805_v1 = vmov 0   ;;  %v14108_v2 = vld [vmem:[%s17793_s1 + $0x8] sm:$0xff]   ;;  %s10977_s27 = sshll.u32 %s14624_s22, 7  ;;  %v14109_v3 = vld [vmem:[%s17793_s1 + $0x10] sm:$0xff]   ;;  %vm694_vm0 = vcmask 588800  }
   0xe   : > { %747 = vmatprep.subr.bf16.mxu1 %v17805_v1  ;;  %14105 = vset.pattern.permute.xlu1 %v17805_v1  ;;  %p407_p3 = scmp.lt.s32.totalorder %s10977_s27, 255  ;;  %v14110_v4 = vld [vmem:[%s17793_s1 + $0x18] sm:$0xff]   ;;  %v14111_v6 = vld [vmem:[%s17793_s1 + $0x20] sm:$0xff]   ;;  %v14112_v7 = vld [vmem:[%s17793_s1 + $0x28] sm:$0xff]   ;;  %vm743_vm1 = vcmask 1043456   ;;  %vm2246_vm2 = vcmask 523264  }
   0xf   : > { %748 = vmatpush1.bf16.msra.mxu1 %v14107_v0  ;;  %14106 = vset.pattern.permute.xlu0 %v17805_v1  ;;  %v14113_v8 = vld [vmem:[%s17793_s1 + $0x30] sm:$0xff]   ;;  %v14114_v9 = vld [vmem:[%s17793_s1 + $0x38] sm:$0xff]   ;;  %v14115_v10 = vld [vmem:[%s17793_s1 + $0x40] sm:$0xff]   ;;  %vm2294_vm3 = vsmask.f32 7424  ;;  %vm3320_vm5 = vcmask 1045504  }
  0x10   : > { %749 = vmatprep.subr.bf16.mxu1 %v17805_v1  ;;  %s18225_s27 = smov (!%p407_p3, %s10977_s27), 255  ;;  %v14116_v11 = vld [vmem:[%s17793_s1 + $0x48] sm:$0xff]   ;;  %v14117_v12 = vld [vmem:[%s17793_s1 + $0x50] sm:$0xff]   ;;  %v14118_v13 = vld [vmem:[%s17793_s1 + $0x58] sm:$0xff]   ;;  %vm3033_vm4 = vsmask.f32 6400 }
  0x11   : > { %s11963_s30 = sshll.u32 %s18225_s27, 3  ;;  %v14119_v14 = vld [vmem:[%s17793_s1 + $0x60] ss:$0 sps:$4 sm:$0xff]   ;;  %v14771_v53 = vld [vmem:[%s17793_s1 + $0x8] sm:$0xff]   ;;  %v14779_v54 = vld [vmem:[%s17793_s1 + $0x10] sm:$0xff]   ;;  %vm2784_vm6 = vcmask 1046528  }
  0x12   : > { %s14649_s17 = scalar_lea.vmem %s17792_s0, %s11963_s30  ;;  %v14690_v15 = vsel %vm743_vm1, %v14119_v14, 0  ;;  %v14761_v50 = vld [vmem:[%s17793_s1] sm:$0xff]   ;;  %v14788_v57 = vld [vmem:[%s17793_s1 + $0x18] sm:$0xff]   ;;  %v14805_v61 = vld [vmem:[%s17793_s1 + $0x28] sm:$0xff]   ;;  %s14535_s29 = smov 120   ;;  %vm9423_vm7 = vcmask 392192  }
  0x13   : > { %750 = vmatpush1.bf16.msra.mxu1 %v14108_v2  ;;  %v14122_v5 = vld [vmem:[%s14649_s17 + $0x4] ss:$8 sps:$4 sm:$0xff]   ;;  %v14120_v16 = vld [vmem:[%s14649_s17] ss:$8 sps:$4 sm:$0xff]   ;;  %v14123_v17 = vld [vmem:[%s14649_s17 + $0x14] ss:$8 sps:$4 sm:$0xff]  }
  0x14   : > { %751 = vmatprep.subr.bf16.mxu1 %v17805_v1  ;;  %11026 = vmatprep.mubr.msk.bf16.mxu1 %vm694_vm0, %v14122_v5  ;;  %v14125_v18 = vld [vmem:[%s14649_s17 + $0x10] ss:$8 sps:$4 sm:$0xff]   ;;  %v14126_v19 = vld [vmem:[%s14649_s17 + $0x24] ss:$8 sps:$4 sm:$0xff]   ;;  %v14128_v20 = vld [vmem:[%s14649_s17 + $0x20] ss:$8 sps:$4 sm:$0xff]  }
  0x15   : > { %v14129_v21 = vld [vmem:[%s14649_s17 + $0x34] ss:$8 sps:$4 sm:$0xff]   ;;  %v14131_v22 = vld [vmem:[%s14649_s17 + $0x30] ss:$8 sps:$4 sm:$0xff]   ;;  %v14132_v23 = vld [vmem:[%s14649_s17 + $0x44] ss:$8 sps:$4 sm:$0xff]  }
  0x16   : > { %v14134_v24 = vld [vmem:[%s14649_s17 + $0x40] ss:$8 sps:$4 sm:$0xff]   ;;  %v14135_v25 = vld [vmem:[%s14649_s17 + $0x54] ss:$8 sps:$4 sm:$0xff]   ;;  %v14137_v26 = vld [vmem:[%s14649_s17 + $0x50] ss:$8 sps:$4 sm:$0xff]  }
  0x17   : > { %752 = vmatpush1.bf16.msra.mxu1 %v14109_v3  ;;  %v14138_v27 = vld [vmem:[%s14649_s17 + $0x64] ss:$8 sps:$4 sm:$0xff]   ;;  %v14140_v28 = vld [vmem:[%s14649_s17 + $0x60] ss:$8 sps:$4 sm:$0xff]   ;;  %v14141_v29 = vld [vmem:[%s14649_s17 + $0x74] ss:$8 sps:$4 sm:$0xff]  }
  0x18   : > { %753 = vmatprep.subr.bf16.mxu1 %v17805_v1  ;;  %v14143_v30 = vld [vmem:[%s14649_s17 + $0x70] ss:$8 sps:$4 sm:$0xff]   ;;  %v14144_v31 = vld [vmem:[%s14649_s17 + $0x84] ss:$8 sps:$4 sm:$0xff]   ;;  %v14146_v32 = vld [vmem:[%s14649_s17 + $0x80] ss:$8 sps:$4 sm:$0xff]  }
  0x19   : > { %v14147_v33 = vld [vmem:[%s14649_s17 + $0x94] ss:$8 sps:$4 sm:$0xff]   ;;  %v14149_v34 = vld [vmem:[%s14649_s17 + $0x90] ss:$8 sps:$4 sm:$0xff]   ;;  %v14150_v35 = vld [vmem:[%s14649_s17 + $0xa4] ss:$8 sps:$4 sm:$0xff]  }
  0x1a   : > { %v14152_v36 = vld [vmem:[%s14649_s17 + $0xa0] ss:$8 sps:$4 sm:$0xff]   ;;  %v14153_v37 = vld [vmem:[%s14649_s17 + $0xb4] ss:$8 sps:$4 sm:$0xff]   ;;  %v14155_v38 = vld [vmem:[%s14649_s17 + $0xb0] ss:$8 sps:$4 sm:$0xff]  }
  0x1b   : > { %754 = vmatpush1.bf16.msra.mxu1 %v14110_v4  ;;  %v14156_v39 = vld [vmem:[%s14649_s17 + $0xc4] ss:$8 sps:$4 sm:$0xff]   ;;  %v14158_v40 = vld [vmem:[%s14649_s17 + $0xc0] ss:$8 sps:$4 sm:$0xff]   ;;  %v14159_v41 = vld [vmem:[%s14649_s17 + $0xd4] ss:$8 sps:$4 sm:$0xff]  }
  0x1c   : > { %755 = vmatprep.subr.bf16.mxu1 %v17805_v1  ;;  %v14161_v42 = vld [vmem:[%s14649_s17 + $0xd0] ss:$8 sps:$4 sm:$0xff]   ;;  %v14162_v43 = vld [vmem:[%s14649_s17 + $0xe4] ss:$8 sps:$4 sm:$0xff]   ;;  %v14164_v44 = vld [vmem:[%s14649_s17 + $0xe0] ss:$8 sps:$4 sm:$0xff]  }
  0x1d   : > { %v14165_v45 = vld [vmem:[%s14649_s17 + $0xf4] ss:$8 sps:$4 sm:$0xff]   ;;  %v14167_v46 = vld [vmem:[%s14649_s17 + $0xf0] ss:$8 sps:$4 sm:$0xff]   ;;  %v14170_v47 = vld [vmem:[%s14649_s17 + $0x104] ss:$8 sps:$4 sm:$0xff]  }
  0x1e   : > { %v14168_v48 = vld [vmem:[%s14649_s17 + $0x100] ss:$8 sps:$4 sm:$0xff]   ;;  %v14171_v49 = vld [vmem:[%s14649_s17 + $0x114] ss:$8 sps:$4 sm:$0xff]   ;;  %v14173_v51 = vld [vmem:[%s14649_s17 + $0x110] ss:$8 sps:$4 sm:$0xff]  }
  0x1f   : > { %756 = vmatpush1.bf16.msra.mxu1 %v14111_v6  ;;  %v14174_v52 = vld [vmem:[%s14649_s17 + $0x124] ss:$8 sps:$4 sm:$0xff]   ;;  %v14176_v55 = vld [vmem:[%s14649_s17 + $0x120] ss:$8 sps:$4 sm:$0xff]   ;;  %v14177_v56 = vld [vmem:[%s14649_s17 + $0x134] ss:$8 sps:$4 sm:$0xff]  }
  0x20   : > { %757 = vmatprep.subr.bf16.mxu1 %v17805_v1  ;;  %v14796_v58 = vld [vmem:[%s17793_s1 + $0x20] sm:$0xff]   ;;  %v14179_v59 = vld [vmem:[%s14649_s17 + $0x130] ss:$8 sps:$4 sm:$0xff]   ;;  %v14195_v14 = vld [vmem:[%s14649_s17 + $0x194] ss:$8 sps:$4 sm:$0xff]   ;;  %s14536_s14 = smov 112  }
  0x21   : > { %v14180_v60 = vld [vmem:[%s14649_s17 + $0x144] ss:$8 sps:$4 sm:$0xff]   ;;  %v14813_v62 = vld [vmem:[%s17793_s1 + $0x30] sm:$0xff]   ;;  %v14182_v63 = vld [vmem:[%s14649_s17 + $0x140] ss:$8 sps:$4 sm:$0xff]   ;;  %s14538_s15 = smov 96  }
  0x22   : > { %v14186_v5 = vld [vmem:[%s14649_s17 + $0x164] ss:$8 sps:$4 sm:$0xff]   ;;  %s14539_s16 = smov 88   ;;  %s14540_s18 = smov 80   ;;  %vm10752_vm8 = vcmask 261120   ;;  %vm14551_vm9 = vmmov 0  }
  0x23   : > { %758 = vmatpush1.bf16.msra.mxu1 %v14112_v7  ;;  %s14541_s19 = smov 72   ;;  %s14542_s20 = smov 64   ;;  %vm10843_vm10 = vcmask 130048   ;;  %vm10917_vm11 = vcmask 58368  }
  0x24   : > { %759 = vmatprep.subr.bf16.mxu1 %v17805_v1  ;;  %s14543_s23 = smov 56   ;;  %s14544_s24 = smov 48  }
  0x25   : > { %s14545_s25 = smov 40   ;;  %s14546_s26 = smov 32  }
  0x26   : > { %s14547_s27 = smov 24   ;;  %s14548_s28 = smov 16  }
  0x27   : > { %760 = vmatpush1.bf16.msra.mxu1 %v14113_v8  ;;  %p413_p4 = scmp.lt.s32.totalorder %s14624_s22, 1 }
  0x28   : > { %761 = vmatprep.subr.bf16.mxu1 %v17805_v1 }
  0x29   : > { %s18227_s22 = smov (!%p413_p4, %s14624_s22), 1 }
  0x2b   : > { %762 = vmatpush1.bf16.msra.mxu1 %v14114_v9 }
  0x2c   : > { %763 = vmatprep.subr.bf16.mxu1 %v17805_v1 }
  0x2f   : > { %764 = vmatpush1.bf16.msra.mxu1 %v14115_v10 }
  0x30   : > { %765 = vmatprep.subr.bf16.mxu1 %v17805_v1 }
  0x33   : > { %766 = vmatpush1.bf16.msra.mxu1 %v14116_v11 }
  0x34   : > { %767 = vmatprep.subr.bf16.mxu1 %v17805_v1 }
  0x37   : > { %768 = vmatpush1.bf16.msra.mxu1 %v14117_v12 }
  0x38   : > { %769 = vmatprep.subr.bf16.mxu1 %v17805_v1 }
  0x3b   : > { %770 = vmatpush1.bf16.msra.mxu1 %v14118_v13 }
  0x3c   : > { %771 = vmatprep.subr.bf16.mxu1 %v17805_v1 }
  0x3f   : > { %772 = vmatpush1.bf16.msra.mxu1 %v14690_v15 }
  0x40   : > { %1132 = vmatprep.subr.bf16.mxu1 %v17805_v1 }
  0x42   : > { %780 = vmatmul.mubr.bf16.vlgmr.msra.gmra.mrb[0].mxu1 %v14120_v16  ;;  %v14197_v16 = vld [vmem:[%s14649_s17 + $0x190] ss:$8 sps:$4 sm:$0xff]  }
  0x43   : > { %1133 = vmatpush1.bf16.msra.mxu1 %v14107_v0  ;;  %11027 = vmatprep.mubr.msk.bf16.mxu1 %vm694_vm0, %v14123_v17  ;;  %v14183_v0 = vld [vmem:[%s14649_s17 + $0x154] ss:$8 sps:$4 sm:$0xff]   ;;  %v14198_v17 = vld [vmem:[%s14649_s17 + $0x1a4] ss:$8 sps:$4 sm:$0xff]  }
  0x44   : > { %1134 = vmatprep.subr.bf16.mxu1 %v17805_v1 }
  0x47   : > { %1135 = vmatpush1.bf16.msra.mxu1 %v14108_v2  ;;  %v14822_v2 = vld [vmem:[%s17793_s1 + $0x38] sm:$0xff]  }
  0x48   : > { %1136 = vmatprep.subr.bf16.mxu1 %v17805_v1 }
  0x4a   : > { %788 = vmatmul.mubr.bf16.gmra.mrb[4].mxu1 %v14125_v18  ;;  %v14200_v18 = vld [vmem:[%s14649_s17 + $0x1a0] ss:$8 sps:$4 sm:$0xff]  }
  0x4b   : > { %11028 = vmatprep.mubr.msk.bf16.mxu1 %vm694_vm0, %v14126_v19  ;;  %1137 = vmatpush1.bf16.msra.mxu1 %v14109_v3  ;;  %v14830_v3 = vld [vmem:[%s17793_s1 + $0x40] sm:$0xff]   ;;  %v14201_v19 = vld [vmem:[%s14649_s17 + $0x1b4] ss:$8 sps:$4 sm:$0xff]  }
  0x4c   : > { %1138 = vmatprep.subr.bf16.mxu1 %v17805_v1 }
  0x4f   : > { %1139 = vmatpush1.bf16.msra.mxu1 %v14110_v4  ;;  %v14185_v4 = vld [vmem:[%s14649_s17 + $0x150] ss:$8 sps:$4 sm:$0xff]  }
  0x50   : > { %1140 = vmatprep.subr.bf16.mxu1 %v17805_v1 }
  0x52   : > { %796 = vmatmul.mubr.bf16.gmra.mrb[8].mxu1 %v14128_v20 }
  0x53   : > { %11029 = vmatprep.mubr.msk.bf16.mxu1 %vm694_vm0, %v14129_v21  ;;  %1141 = vmatpush1.bf16.msra.mxu1 %v14111_v6  ;;  %v14839_v6 = vld [vmem:[%s17793_s1 + $0x48] sm:$0xff]  }
  0x54   : > { %1142 = vmatprep.subr.bf16.mxu1 %v17805_v1 }
  0x57   : > { %1143 = vmatpush1.bf16.msra.mxu1 %v14112_v7  ;;  %v14847_v7 = vld [vmem:[%s17793_s1 + $0x50] sm:$0xff]  }
  0x58   : > { %1144 = vmatprep.subr.bf16.mxu1 %v17805_v1 }
  0x5a   : > { %804 = vmatmul.mubr.bf16.gmra.mrb[12].mxu1 %v14131_v22  ;;  %v14203_v22 = vld [vmem:[%s14649_s17 + $0x1b0] ss:$8 sps:$4 sm:$0xff]  }
  0x5b   : > { %11030 = vmatprep.mubr.msk.bf16.mxu1 %vm694_vm0, %v14132_v23  ;;  %1145 = vmatpush1.bf16.msra.mxu1 %v14113_v8  ;;  %v14188_v8 = vld [vmem:[%s14649_s17 + $0x160] ss:$8 sps:$4 sm:$0xff]  }
  0x5c   : > { %1146 = vmatprep.subr.bf16.mxu1 %v17805_v1 }
  0x5f   : > { %1147 = vmatpush1.bf16.msra.mxu1 %v14114_v9  ;;  %v14189_v9 = vld [vmem:[%s14649_s17 + $0x174] ss:$8 sps:$4 sm:$0xff]  }
  0x60   : > { %1148 = vmatprep.subr.bf16.mxu1 %v17805_v1 }
  0x62   : > { %812 = vmatmul.mubr.bf16.gmra.mrb[16].mxu1 %v14134_v24  ;;  %v14204_v24 = vld [vmem:[%s14649_s17 + $0x1c4] ss:$8 sps:$4 sm:$0xff]  }
  0x63   : > { %11031 = vmatprep.mubr.msk.bf16.mxu1 %vm694_vm0, %v14135_v25  ;;  %1149 = vmatpush1.bf16.msra.mxu1 %v14115_v10  ;;  %v14856_v10 = vld [vmem:[%s17793_s1 + $0x58] sm:$0xff]  }
  0x64   : > { %1150 = vmatprep.subr.bf16.mxu1 %v17805_v1 }
  0x67   : > { %1151 = vmatpush1.bf16.msra.mxu1 %v14116_v11  ;;  %v14191_v11 = vld [vmem:[%s14649_s17 + $0x170] ss:$8 sps:$4 sm:$0xff]  }
  0x68   : > { %1152 = vmatprep.subr.bf16.mxu1 %v17805_v1 }
  0x6a   : > { %820 = vmatmul.mubr.bf16.gmra.mrb[20].mxu1 %v14137_v26 }
  0x6b   : > { %11032 = vmatprep.mubr.msk.bf16.mxu1 %vm694_vm0, %v14138_v27  ;;  %1153 = vmatpush1.bf16.msra.mxu1 %v14117_v12  ;;  %v14192_v12 = vld [vmem:[%s14649_s17 + $0x184] ss:$8 sps:$4 sm:$0xff]  }
  0x6c   : > { %1154 = vmatprep.subr.bf16.mxu1 %v17805_v1 }
  0x6f   : > { %1155 = vmatpush1.bf16.msra.mxu1 %v14118_v13  ;;  %v14194_v13 = vld [vmem:[%s14649_s17 + $0x180] ss:$8 sps:$4 sm:$0xff]  }
  0x70   : > { %1156 = vmatprep.subr.bf16.mxu1 %v17805_v1 }
  0x72   : > { %828 = vmatmul.mubr.bf16.gmra.mrb[24].mxu1 %v14140_v28  ;;  %v14206_v28 = vld [vmem:[%s14649_s17 + $0x1c0] ss:$8 sps:$4 sm:$0xff]  }
  0x73   : > { %11033 = vmatprep.mubr.msk.bf16.mxu1 %vm694_vm0, %v14141_v29  ;;  %1157 = vmatpush1.bf16.msra.mxu1 %v14690_v15 }
  0x74   : > { %1549 = vmatprep.subr.bf16.mxu1 %v17805_v1 }
  0x7a   : > { %836 = vmatmul.mubr.bf16.gmra.mrb[28].mxu1 %v14143_v30  ;;  %v14207_v30 = vld [vmem:[%s14649_s17 + $0x1d4] ss:$8 sps:$4 sm:$0xff]  }
  0x7b   : > { %11034 = vmatprep.mubr.msk.bf16.mxu1 %vm694_vm0, %v14144_v31 }
  0x82   : > { %844 = vmatmul.mubr.bf16.gmra.mrb[32].mxu1 %v14146_v32 }
  0x83   : > { %11035 = vmatprep.mubr.msk.bf16.mxu1 %vm694_vm0, %v14147_v33 }
  0x8a   : > { %852 = vmatmul.mubr.bf16.gmra.mrb[36].mxu1 %v14149_v34  ;;  %v14209_v34 = vld [vmem:[%s14649_s17 + $0x1d0] ss:$8 sps:$4 sm:$0xff]  }
  0x8b   : > { %11036 = vmatprep.mubr.msk.bf16.mxu1 %vm694_vm0, %v14150_v35 }
  0x92   : > { %860 = vmatmul.mubr.bf16.gmra.mrb[40].mxu1 %v14152_v36  ;;  %v14210_v36 = vld [vmem:[%s14649_s17 + $0x1e4] ss:$8 sps:$4 sm:$0xff]  }
  0x93   : > { %11037 = vmatprep.mubr.msk.bf16.mxu1 %vm694_vm0, %v14153_v37 }
  0x9a   : > { %868 = vmatmul.mubr.bf16.gmra.mrb[44].mxu1 %v14155_v38 }
  0x9b   : > { %11038 = vmatprep.mubr.msk.bf16.mxu1 %vm694_vm0, %v14156_v39 }
  0xa2   : > { %876 = vmatmul.mubr.bf16.gmra.mrb[48].mxu1 %v14158_v40  ;;  %v14212_v40 = vld [vmem:[%s14649_s17 + $0x1e0] ss:$8 sps:$4 sm:$0xff]  }
  0xa3   : > { %11039 = vmatprep.mubr.msk.bf16.mxu1 %vm694_vm0, %v14159_v41 }
  0xaa   : > { %884 = vmatmul.mubr.bf16.gmra.mrb[52].mxu1 %v14161_v42  ;;  %v14213_v42 = vld [vmem:[%s14649_s17 + $0x1f4] ss:$8 sps:$4 sm:$0xff]  }
  0xab   : > { %11040 = vmatprep.mubr.msk.bf16.mxu1 %vm694_vm0, %v14162_v43 }
  0xb2   : > { %892 = vmatmul.mubr.bf16.gmra.mrb[56].mxu1 %v14164_v44 }
  0xb3   : > { %11041 = vmatprep.mubr.msk.bf16.mxu1 %vm694_vm0, %v14165_v45 }
  0xba   : > { %900 = vmatmul.mubr.bf16.gmra.mrb[60].mxu1 %v14167_v46  ;;  %v14215_v46 = vld [vmem:[%s14649_s17 + $0x1f0] ss:$8 sps:$4 sm:$0xff]  }
  0xbb   : > { %11074 = vmatprep.mubr.msk.bf16.mxu1 %vm694_vm0, %v14170_v47 }
  0xc2   : > { %1165 = vmatmul.mubr.bf16.vlgmr.msra.gmra.mrb[64].mxu1 %v14168_v48  ;;  %v14218_v48 = vld [vmem:[%s14649_s17 + $0x204] ss:$8 sps:$4 sm:$0xff]  }
  0xc3   : > { %1550 = vmatpush1.bf16.msra.mxu1 %v14761_v50  ;;  %11075 = vmatprep.mubr.msk.bf16.mxu1 %vm694_vm0, %v14171_v49 }
  0xc4   : > { %1551 = vmatprep.subr.bf16.mxu1 %v17805_v1 }
  0xc7   : > { %1552 = vmatpush1.bf16.msra.mxu1 %v14771_v53 }
  0xc8   : > { %1553 = vmatprep.subr.bf16.mxu1 %v17805_v1 }
  0xca   : > { %1173 = vmatmul.mubr.bf16.gmra.mrb[68].mxu1 %v14173_v51 }
  0xcb   : > { %11076 = vmatprep.mubr.msk.bf16.mxu1 %vm694_vm0, %v14174_v52  ;;  %1554 = vmatpush1.bf16.msra.mxu1 %v14779_v54 }
  0xcc   : > { %1555 = vmatprep.subr.bf16.mxu1 %v17805_v1 }
  0xcf   : > { %1556 = vmatpush1.bf16.msra.mxu1 %v14788_v57 }
  0xd0   : > { %1557 = vmatprep.subr.bf16.mxu1 %v17805_v1 }
  0xd2   : > { %1181 = vmatmul.mubr.bf16.gmra.mrb[72].mxu1 %v14176_v55  ;;  %v14216_v55 = vld [vmem:[%s14649_s17 + $0x200] ss:$8 sps:$4 sm:$0xff]  }
  0xd3   : > { %11077 = vmatprep.mubr.msk.bf16.mxu1 %vm694_vm0, %v14177_v56  ;;  %1558 = vmatpush1.bf16.msra.mxu1 %v14796_v58 }
  0xd4   : > { %1559 = vmatprep.subr.bf16.mxu1 %v17805_v1 }
  0xd7   : > { %1560 = vmatpush1.bf16.msra.mxu1 %v14805_v61 }
  0xd8   : > { %1561 = vmatprep.subr.bf16.mxu1 %v17805_v1 }
  0xda   : > { %1189 = vmatmul.mubr.bf16.gmra.mrb[76].mxu1 %v14179_v59  ;;  %v14219_v59 = vld [vmem:[%s14649_s17 + $0x214] ss:$8 sps:$4 sm:$0xff]  }
  0xdb   : > { %11078 = vmatprep.mubr.msk.bf16.mxu1 %vm694_vm0, %v14180_v60  ;;  %1562 = vmatpush1.bf16.msra.mxu1 %v14813_v62 }
  0xdc   : > { %1563 = vmatprep.subr.bf16.mxu1 %v17805_v1 }
  0xdf   : > { %1564 = vmatpush1.bf16.msra.mxu1 %v14822_v2 }
  0xe0   : > { %1565 = vmatprep.subr.bf16.mxu1 %v17805_v1 }
  0xe2   : > { %1197 = vmatmul.mubr.bf16.gmra.mrb[80].mxu1 %v14182_v63 }
  0xe3   : > { %11079 = vmatprep.mubr.msk.bf16.mxu1 %vm694_vm0, %v14183_v0  ;;  %1566 = vmatpush1.bf16.msra.mxu1 %v14830_v3 }
  0xe4   : > { %1567 = vmatprep.subr.bf16.mxu1 %v17805_v1 }
  0xe7   : > { %1568 = vmatpush1.bf16.msra.mxu1 %v14839_v6 }
  0xe8   : > { %1569 = vmatprep.subr.bf16.mxu1 %v17805_v1 }
  0xea   : > { %1205 = vmatmul.mubr.bf16.gmra.mrb[84].mxu1 %v14185_v4  ;;  %v14221_v4 = vld [vmem:[%s14649_s17 + $0x210] ss:$8 sps:$4 sm:$0xff]  }
  0xeb   : > { %11080 = vmatprep.mubr.msk.bf16.mxu1 %vm694_vm0, %v14186_v5  ;;  %1570 = vmatpush1.bf16.msra.mxu1 %v14847_v7 }
  0xec   : > { %1571 = vmatprep.subr.bf16.mxu1 %v17805_v1 }
  0xef   : > { %1572 = vmatpush1.bf16.msra.mxu1 %v14856_v10 }
  0xf0   : > { %1573 = vmatprep.subr.bf16.mxu1 %v17805_v1 }
  0xf2   : > { %1213 = vmatmul.mubr.bf16.gmra.mrb[88].mxu1 %v14188_v8  ;;  %v14222_v8 = vld [vmem:[%s14649_s17 + $0x224] ss:$8 sps:$4 sm:$0xff]  }
  0xf3   : > { %11081 = vmatprep.mubr.msk.bf16.mxu1 %vm694_vm0, %v14189_v9  ;;  %1574 = vmatpush1.bf16.msra.mxu1 %v14690_v15 }
  0xf4   : > { %1966 = vmatprep.subr.bf16.mxu1 %v17805_v1 }
  0xfa   : > { %1221 = vmatmul.mubr.bf16.gmra.mrb[92].mxu1 %v14191_v11 }
  0xfb   : > { %11082 = vmatprep.mubr.msk.bf16.mxu1 %vm694_vm0, %v14192_v12  ;;  %v14224_v12 = vld [vmem:[%s14649_s17 + $0x220] ss:$8 sps:$4 sm:$0xff]  }
 0x102   : > { %1229 = vmatmul.mubr.bf16.gmra.mrb[96].mxu1 %v14194_v13 }
 0x103   : > { %11083 = vmatprep.mubr.msk.bf16.mxu1 %vm694_vm0, %v14195_v14  ;;  %v14225_v14 = vld [vmem:[%s14649_s17 + $0x234] ss:$8 sps:$4 sm:$0xff]  }
 0x10a   : > { %1237 = vmatmul.mubr.bf16.gmra.mrb[100].mxu1 %v14197_v16 }
 0x10b   : > { %11084 = vmatprep.mubr.msk.bf16.mxu1 %vm694_vm0, %v14198_v17  ;;  %v14227_v17 = vld [vmem:[%s14649_s17 + $0x230] ss:$8 sps:$4 sm:$0xff]  }
 0x112   : > { %1245 = vmatmul.mubr.bf16.gmra.mrb[104].mxu1 %v14200_v18 }
 0x113   : > { %11085 = vmatprep.mubr.msk.bf16.mxu1 %vm694_vm0, %v14201_v19  ;;  %v14228_v19 = vld [vmem:[%s14649_s17 + $0x244] ss:$8 sps:$4 sm:$0xff]  }
 0x115   : > { %v14875_v20 = vpop.f32.mrb[0].mxu1 }
 0x116   : > { %v783_v21 = vpop.f32.mrb[1].mxu1 }
 0x117   : > { %v14878_v23 = vpop.f32.mrb[2].mxu1 }
 0x118   : > { %v786_v25 = vpop.f32.mrb[3].mxu1 }
 0x119   : > { %v14231_v25 = vld [vmem:[%s14649_s17 + $0x254] ss:$8 sps:$4 sm:$0xff]  }
 0x11a   : > { %1253 = vmatmul.mubr.bf16.gmra.mrb[108].mxu1 %v14203_v22  ;;  %v14230_v22 = vld [vmem:[%s14649_s17 + $0x240] ss:$8 sps:$4 sm:$0xff]  }
 0x11b   : > { %11086 = vmatprep.mubr.msk.bf16.mxu1 %vm694_vm0, %v14204_v24 }
 0x11d   : > { %v14882_v26 = vpop.f32.mrb[4].mxu1 }
 0x11e   : > { %v791_v27 = vpop.f32.mrb[5].mxu1 }
 0x11f   : > { %v14885_v29 = vpop.f32.mrb[6].mxu1 }
 0x120   : > { %v794_v31 = vpop.f32.mrb[7].mxu1 }
 0x121   : > { %v14234_v31 = vld [vmem:[%s14649_s17 + $0x264] ss:$8 sps:$4 sm:$0xff]  }
 0x122   : > { %1261 = vmatmul.mubr.bf16.gmra.mrb[112].mxu1 %v14206_v28  ;;  %v14233_v28 = vld [vmem:[%s14649_s17 + $0x250] ss:$8 sps:$4 sm:$0xff]  }
 0x123   : > { %11087 = vmatprep.mubr.msk.bf16.mxu1 %vm694_vm0, %v14207_v30 }
 0x125   : > { %v14889_v32 = vpop.f32.mrb[8].mxu1 }
 0x126   : > { %v799_v33 = vpop.f32.mrb[9].mxu1 }
 0x127   : > { %v14892_v35 = vpop.f32.mrb[10].mxu1 }
 0x128   : > { %v802_v37 = vpop.f32.mrb[11].mxu1 }
 0x129   : > { %v14237_v37 = vld [vmem:[%s14649_s17 + $0x274] ss:$8 sps:$4 sm:$0xff]  }
 0x12a   : > { %1269 = vmatmul.mubr.bf16.gmra.mrb[116].mxu1 %v14209_v34  ;;  %v14236_v34 = vld [vmem:[%s14649_s17 + $0x260] ss:$8 sps:$4 sm:$0xff]  }
 0x12b   : > { %11088 = vmatprep.mubr.msk.bf16.mxu1 %vm694_vm0, %v14210_v36 }
 0x12d   : > { %v14896_v38 = vpop.f32.mrb[12].mxu1 }
 0x12e   : > { %v807_v39 = vpop.f32.mrb[13].mxu1 }
 0x12f   : > { %v14899_v41 = vpop.f32.mrb[14].mxu1 }
 0x130   : > { %v810_v43 = vpop.f32.mrb[15].mxu1 }
 0x131   : > { %v14240_v43 = vld [vmem:[%s14649_s17 + $0x284] ss:$8 sps:$4 sm:$0xff]  }
 0x132   : > { %1277 = vmatmul.mubr.bf16.gmra.mrb[120].mxu1 %v14212_v40  ;;  %v14239_v40 = vld [vmem:[%s14649_s17 + $0x270] ss:$8 sps:$4 sm:$0xff]  }
 0x133   : > { %11089 = vmatprep.mubr.msk.bf16.mxu1 %vm694_vm0, %v14213_v42 }
 0x135   : > { %v14903_v44 = vpop.f32.mrb[16].mxu1 }
 0x136   : > { %v815_v45 = vpop.f32.mrb[17].mxu1 }
 0x137   : > { %v14906_v47 = vpop.f32.mrb[18].mxu1 }
 0x138   : > { %v818_v49 = vpop.f32.mrb[19].mxu1 }
 0x13a   : > { %1285 = vmatmul.mubr.bf16.gmra.mrb[124].mxu1 %v14215_v46 }
 0x13b   : > { %11122 = vmatprep.mubr.msk.bf16.mxu1 %vm694_vm0, %v14218_v48  ;;  %v14242_v48 = vld [vmem:[%s14649_s17 + $0x280] ss:$8 sps:$4 sm:$0xff]  }
 0x13d   : > { %v14910_v51 = vpop.f32.mrb[20].mxu1 }
 0x13e   : > { %v823_v52 = vpop.f32.mrb[21].mxu1 }
 0x13f   : > { %v14913_v56 = vpop.f32.mrb[22].mxu1 }
 0x140   : > { %v826_v60 = vpop.f32.mrb[23].mxu1 }
 0x141   : > { %v14245_v60 = vld [vmem:[%s14649_s17 + $0x290] ss:$8 sps:$4 sm:$0xff]  }
 0x142   : > { %1582 = vmatmul.mubr.bf16.vlgmr.msra.gmra.mrb[128].mxu1 %v14216_v55 }
 0x143   : > { %1967 = vmatpush1.bf16.msra.mxu1 %v14761_v50  ;;  %11123 = vmatprep.mubr.msk.bf16.mxu1 %vm694_vm0, %v14219_v59 }
 0x144   : > { %1968 = vmatprep.subr.bf16.mxu1 %v17805_v1 }
 0x145   : > { %v14919_v63 = vpop.f32.mrb[24].mxu1 }
 0x146   : > { %v831_v0 = vpop.f32.mrb[25].mxu1 }
 0x147   : > { %v14922_v5 = vpop.f32.mrb[26].mxu1  ;;  %1969 = vmatpush1.bf16.msra.mxu1 %v14771_v53 }
 0x148   : > { %v834_v9 = vpop.f32.mrb[27].mxu1  ;;  %1970 = vmatprep.subr.bf16.mxu1 %v17805_v1 }
 0x14a   : > { %1590 = vmatmul.mubr.bf16.gmra.mrb[132].mxu1 %v14221_v4  ;;  %v14246_v4 = vld [vmem:[%s14649_s17 + $0x2a4] ss:$8 sps:$4 sm:$0xff]  }
 0x14b   : > { %11124 = vmatprep.mubr.msk.bf16.mxu1 %vm694_vm0, %v14222_v8  ;;  %1971 = vmatpush1.bf16.msra.mxu1 %v14779_v54 }
 0x14c   : > { %1972 = vmatprep.subr.bf16.mxu1 %v17805_v1 }
 0x14d   : > { %v14930_v50 = vpop.f32.mrb[28].mxu1 }
 0x14e   : > { %v839_v11 = vpop.f32.mrb[29].mxu1 }
 0x14f   : > { %v14933_v13 = vpop.f32.mrb[30].mxu1  ;;  %1973 = vmatpush1.bf16.msra.mxu1 %v14788_v57 }
 0x150   : > { %v842_v53 = vpop.f32.mrb[31].mxu1  ;;  %1974 = vmatprep.subr.bf16.mxu1 %v17805_v1 }
 0x151   : > { %v14249_v53 = vld [vmem:[%s14649_s17 + $0x2b4] ss:$8 sps:$4 sm:$0xff]  }
 0x152   : > { %1598 = vmatmul.mubr.bf16.gmra.mrb[136].mxu1 %v14224_v12  ;;  %v14248_v12 = vld [vmem:[%s14649_s17 + $0x2a0] ss:$8 sps:$4 sm:$0xff]  }
 0x153   : > { %11125 = vmatprep.mubr.msk.bf16.mxu1 %vm694_vm0, %v14225_v14  ;;  %1975 = vmatpush1.bf16.msra.mxu1 %v14796_v58 }
 0x154   : > { %1976 = vmatprep.subr.bf16.mxu1 %v17805_v1 }
 0x155   : > { %v14941_v54 = vpop.f32.mrb[32].mxu1 }
 0x156   : > { %v847_v16 = vpop.f32.mrb[33].mxu1 }
 0x157   : > { %v14944_v18 = vpop.f32.mrb[34].mxu1  ;;  %1977 = vmatpush1.bf16.msra.mxu1 %v14805_v61 }
 0x158   : > { %v850_v57 = vpop.f32.mrb[35].mxu1  ;;  %1978 = vmatprep.subr.bf16.mxu1 %v17805_v1 }
 0x159   : > { %v14251_v57 = vld [vmem:[%s14649_s17 + $0x2b0] ss:$8 sps:$4 sm:$0xff]  }
 0x15a   : > { %1606 = vmatmul.mubr.bf16.gmra.mrb[140].mxu1 %v14227_v17 }
 0x15b   : > { %11126 = vmatprep.mubr.msk.bf16.mxu1 %vm694_vm0, %v14228_v19  ;;  %1979 = vmatpush1.bf16.msra.mxu1 %v14813_v62 }
 0x15c   : > { %1980 = vmatprep.subr.bf16.mxu1 %v17805_v1 }
 0x15d   : > { %v14952_v58 = vpop.f32.mrb[36].mxu1 }
 0x15e   : > { %v855_v21 = vpop.f32.mrb[37].mxu1 }
 0x15f   : > { %v14955_v24 = vpop.f32.mrb[38].mxu1  ;;  %1981 = vmatpush1.bf16.msra.mxu1 %v14822_v2  ;;  %v14285_v21 = vld [vmem:[%s14649_s17 + $0x374] ss:$8 sps:$4 sm:$0xff]  }
 0x160   : > { %v858_v61 = vpop.f32.mrb[39].mxu1  ;;  %1982 = vmatprep.subr.bf16.mxu1 %v17805_v1 }
 0x162   : > { %1614 = vmatmul.mubr.bf16.gmra.mrb[144].mxu1 %v14230_v22 }
 0x163   : > { %11127 = vmatprep.mubr.msk.bf16.mxu1 %vm694_vm0, %v14231_v25  ;;  %1983 = vmatpush1.bf16.msra.mxu1 %v14830_v3  ;;  %v14252_v25 = vld [vmem:[%s14649_s17 + $0x2c4] ss:$8 sps:$4 sm:$0xff]  }
 0x164   : > { %1984 = vmatprep.subr.bf16.mxu1 %v17805_v1 }
 0x165   : > { %v14963_v62 = vpop.f32.mrb[40].mxu1 }
 0x166   : > { %v863_v27 = vpop.f32.mrb[41].mxu1 }
 0x167   : > { %v14966_v30 = vpop.f32.mrb[42].mxu1  ;;  %1985 = vmatpush1.bf16.msra.mxu1 %v14839_v6 }
 0x168   : > { %v866_v2 = vpop.f32.mrb[43].mxu1  ;;  %1986 = vmatprep.subr.bf16.mxu1 %v17805_v1 }
 0x169   : > { %v14254_v2 = vld [vmem:[%s14649_s17 + $0x2c0] ss:$8 sps:$4 sm:$0xff]  }
 0x16a   : > { %1622 = vmatmul.mubr.bf16.gmra.mrb[148].mxu1 %v14233_v28 }
 0x16b   : > { %11128 = vmatprep.mubr.msk.bf16.mxu1 %vm694_vm0, %v14234_v31  ;;  %1987 = vmatpush1.bf16.msra.mxu1 %v14847_v7 }
 0x16c   : > { %1988 = vmatprep.subr.bf16.mxu1 %v17805_v1 }
 0x16d   : > { %v14974_v3 = vpop.f32.mrb[44].mxu1 }
 0x16e   : > { %17898 = vst [vmem:[#allocation3_spill] sm:$0xff] %v14974_v3  ;;  %v871_v33 = vpop.f32.mrb[45].mxu1 }
 0x16f   : > { %v14977_v36 = vpop.f32.mrb[46].mxu1  ;;  %1989 = vmatpush1.bf16.msra.mxu1 %v14856_v10  ;;  %v14282_v33 = vld [vmem:[%s14649_s17 + $0x364] ss:$8 sps:$4 sm:$0xff]  }
 0x170   : > { %v874_v6 = vpop.f32.mrb[47].mxu1  ;;  %1990 = vmatprep.subr.bf16.mxu1 %v17805_v1 }
 0x172   : > { %1630 = vmatmul.mubr.bf16.gmra.mrb[152].mxu1 %v14236_v34 }
 0x173   : > { %11129 = vmatprep.mubr.msk.bf16.mxu1 %vm694_vm0, %v14237_v37  ;;  %1991 = vmatpush1.bf16.msra.mxu1 %v14690_v15  ;;  %v14243_v15 = vld [vmem:[%s14649_s17 + $0x294] ss:$8 sps:$4 sm:$0xff]  }
 0x174   : > { %v14255_v37 = vld [vmem:[%s14649_s17 + $0x2d4] ss:$8 sps:$4 sm:$0xff]  }
 0x175   : > { %v14984_v7 = vpop.f32.mrb[48].mxu1 }
 0x176   : > { %17899 = vst [vmem:[#allocation4_spill] sm:$0xff] %v14984_v7  ;;  %v879_v39 = vpop.f32.mrb[49].mxu1 }
 0x177   : > { %v14987_v42 = vpop.f32.mrb[50].mxu1  ;;  %v14279_v39 = vld [vmem:[%s14649_s17 + $0x354] ss:$8 sps:$4 sm:$0xff]  }
 0x178   : > { %v882_v10 = vpop.f32.mrb[51].mxu1 }
 0x179   : > { %v14257_v10 = vld [vmem:[%s14649_s17 + $0x2d0] ss:$8 sps:$4 sm:$0xff]  }
 0x17a   : > { %1638 = vmatmul.mubr.bf16.gmra.mrb[156].mxu1 %v14239_v40 }
 0x17b   : > { %11130 = vmatprep.mubr.msk.bf16.mxu1 %vm694_vm0, %v14240_v43 }
 0x17d   : > { %v14991_v45 = vpop.f32.mrb[52].mxu1 }
 0x17e   : > { %17900 = vst [vmem:[#allocation5_spill] sm:$0xff] %v14991_v45  ;;  %v887_v46 = vpop.f32.mrb[53].mxu1 }
 0x17f   : > { %v14994_v49 = vpop.f32.mrb[54].mxu1 }
 0x180   : > { %v890_v52 = vpop.f32.mrb[55].mxu1 }
 0x182   : > { %1646 = vmatmul.mubr.bf16.gmra.mrb[160].mxu1 %v14242_v48 }
 0x183   : > { %11131 = vmatprep.mubr.msk.bf16.mxu1 %vm694_vm0, %v14243_v15  ;;  %v14258_v15 = vld [vmem:[%s14649_s17 + $0x2e4] ss:$8 sps:$4 sm:$0xff]  }
 0x185   : > { %v14998_v55 = vpop.f32.mrb[56].mxu1 }
 0x186   : > { %17901 = vst [vmem:[#allocation6_spill] sm:$0xff] %v14998_v55  ;;  %v895_v59 = vpop.f32.mrb[57].mxu1 }
 0x187   : > { %v15001_v0 = vpop.f32.mrb[58].mxu1  ;;  %v14276_v59 = vld [vmem:[%s14649_s17 + $0x344] ss:$8 sps:$4 sm:$0xff]  }
 0x188   : > { %v898_v8 = vpop.f32.mrb[59].mxu1 }
 0x189   : > { %v14260_v8 = vld [vmem:[%s14649_s17 + $0x2e0] ss:$8 sps:$4 sm:$0xff]  }
 0x18a   : > { %1654 = vmatmul.mubr.bf16.gmra.mrb[164].mxu1 %v14245_v60 }
 0x18b   : > { %11132 = vmatprep.mubr.msk.bf16.mxu1 %vm694_vm0, %v14246_v4 }
 0x18d   : > { %v15005_v9 = vpop.f32.mrb[60].mxu1 }
 0x18e   : > { %17902 = vst [vmem:[#allocation7_spill] sm:$0xff] %v15005_v9  ;;  %v903_v11 = vpop.f32.mrb[61].mxu1  ;;  %v14300_v9 = vld [vmem:[%s14649_s17 + $0x3c4] ss:$8 sps:$4 sm:$0xff]  }
 0x18f   : > { %v15008_v14 = vpop.f32.mrb[62].mxu1 }
 0x190   : > { %v906_v16 = vpop.f32.mrb[63].mxu1 }
 0x192   : > { %1662 = vmatmul.mubr.bf16.gmra.mrb[168].mxu1 %v14248_v12 }
 0x193   : > { %11133 = vmatprep.mubr.msk.bf16.mxu1 %vm694_vm0, %v14249_v53  ;;  %v14261_v53 = vld [vmem:[%s14649_s17 + $0x2f4] ss:$8 sps:$4 sm:$0xff]  }
 0x195   : > { %v15012_v17 = vpop.f32.mrb[64].mxu1 }
 0x196   : > { %v1168_v19 = vpop.f32.mrb[65].mxu1 }
 0x197   : > { %v15017_v22 = vpop.f32.mrb[66].mxu1  ;;  %v14273_v19 = vld [vmem:[%s14649_s17 + $0x334] ss:$8 sps:$4 sm:$0xff]  }
 0x198   : > { %v1171_v61 = vpop.f32.mrb[67].mxu1 }
 0x19a   : > { %1670 = vmatmul.mubr.bf16.gmra.mrb[172].mxu1 %v14251_v57 }
 0x19b   : > { %11134 = vmatprep.mubr.msk.bf16.mxu1 %vm694_vm0, %v14252_v25 }
 0x19d   : > { %v15023_v28 = vpop.f32.mrb[68].mxu1 }
 0x19e   : > { %v1176_v31 = vpop.f32.mrb[69].mxu1 }
 0x19f   : > { %v15028_v34 = vpop.f32.mrb[70].mxu1  ;;  %v14263_v31 = vld [vmem:[%s14649_s17 + $0x2f0] ss:$8 sps:$4 sm:$0xff]  }
 0x1a0   : > { %v1179_v6 = vpop.f32.mrb[71].mxu1 }
 0x1a1   : > { %v14270_v6 = vld [vmem:[%s14649_s17 + $0x324] ss:$8 sps:$4 sm:$0xff]  }
 0x1a2   : > { %1678 = vmatmul.mubr.bf16.gmra.mrb[176].mxu1 %v14254_v2 }
 0x1a3   : > { %11135 = vmatprep.mubr.msk.bf16.mxu1 %vm694_vm0, %v14255_v37  ;;  %v14266_v37 = vld [vmem:[%s14649_s17 + $0x304] ss:$8 sps:$4 sm:$0xff]  }
 0x1a5   : > { %v15034_v40 = vpop.f32.mrb[72].mxu1 }
 0x1a6   : > { %v1184_v43 = vpop.f32.mrb[73].mxu1 }
 0x1a7   : > { %v15039_v48 = vpop.f32.mrb[74].mxu1 }
 0x1a8   : > { %v1187_v52 = vpop.f32.mrb[75].mxu1 }
 0x1aa   : > { %1686 = vmatmul.mubr.bf16.gmra.mrb[180].mxu1 %v14257_v10 }
 0x1ab   : > { %11136 = vmatprep.mubr.msk.bf16.mxu1 %vm694_vm0, %v14258_v15 }
 0x1ad   : > { %v15045_v60 = vpop.f32.mrb[76].mxu1 }
 0x1ae   : > { %v1192_v4 = vpop.f32.mrb[77].mxu1 }
 0x1af   : > { %v15050_v12 = vpop.f32.mrb[78].mxu1  ;;  %v14264_v4 = vld [vmem:[%s14649_s17 + $0x300] ss:$8 sps:$4 sm:$0xff]  }
 0x1b0   : > { %v1195_v16 = vpop.f32.mrb[79].mxu1 }
 0x1b2   : > { %1694 = vmatmul.mubr.bf16.gmra.mrb[184].mxu1 %v14260_v8 }
 0x1b3   : > { %11137 = vmatprep.mubr.msk.bf16.mxu1 %vm694_vm0, %v14261_v53  ;;  %v14267_v53 = vld [vmem:[%s14649_s17 + $0x314] ss:$8 sps:$4 sm:$0xff]  }
 0x1b5   : > { %v15056_v57 = vpop.f32.mrb[80].mxu1 }
 0x1b6   : > { %v1200_v61 = vpop.f32.mrb[81].mxu1 }
 0x1b7   : > { %v15061_v2 = vpop.f32.mrb[82].mxu1 }
 0x1b8   : > { %v1203_v43 = vpop.f32.mrb[83].mxu1 }
 0x1ba   : > { %1702 = vmatmul.mubr.bf16.gmra.mrb[188].mxu1 %v14263_v31 }
 0x1bb   : > { %11170 = vmatprep.mubr.msk.bf16.mxu1 %vm694_vm0, %v14266_v37 }
 0x1bd   : > { %v15067_v10 = vpop.f32.mrb[84].mxu1 }
 0x1be   : > { %v1208_v52 = vpop.f32.mrb[85].mxu1 }
 0x1bf   : > { %v15072_v8 = vpop.f32.mrb[86].mxu1  ;;  %v14269_v52 = vld [vmem:[%s14649_s17 + $0x310] ss:$8 sps:$4 sm:$0xff]  }
 0x1c0   : > { %v1211_v61 = vpop.f32.mrb[87].mxu1 }
 0x1c2   : > { %1999 = vmatmul.mubr.bf16.vlgmr.msra.gmra.mrb[192].mxu1 %v14264_v4 }
 0x1c3   : > { %11171 = vmatprep.mubr.msk.bf16.mxu1 %vm694_vm0, %v14267_v53 }
 0x1c5   : > { %v15078_v31 = vpop.f32.mrb[88].mxu1 }
 0x1c6   : > { %v1216_v43 = vpop.f32.mrb[89].mxu1 }
 0x1c7   : > { %v15083_v15 = vpop.f32.mrb[90].mxu1  ;;  %v14272_v43 = vld [vmem:[%s14649_s17 + $0x320] ss:$8 sps:$4 sm:$0xff]  }
 0x1c8   : > { %v1219_v16 = vpop.f32.mrb[91].mxu1 }
 0x1ca   : > { %2007 = vmatmul.mubr.bf16.gmra.mrb[196].mxu1 %v14269_v52 }
 0x1cb   : > { %11172 = vmatprep.mubr.msk.bf16.mxu1 %vm694_vm0, %v14270_v6 }
 0x1cd   : > { %v15089_v4 = vpop.f32.mrb[92].mxu1 }
 0x1ce   : > { %v1224_v61 = vpop.f32.mrb[93].mxu1 }
 0x1cf   : > { %v15094_v37 = vpop.f32.mrb[94].mxu1  ;;  %v14275_v61 = vld [vmem:[%s14649_s17 + $0x330] ss:$8 sps:$4 sm:$0xff]  }
 0x1d0   : > { %v1227_v25 = vpop.f32.mrb[95].mxu1 }
 0x1d2   : > { %2015 = vmatmul.mubr.bf16.gmra.mrb[200].mxu1 %v14272_v43 }
 0x1d3   : > { %11173 = vmatprep.mubr.msk.bf16.mxu1 %vm694_vm0, %v14273_v19 }
 0x1d5   : > { %v15100_v6 = vpop.f32.mrb[96].mxu1 }
 0x1d6   : > { %v1232_v52 = vpop.f32.mrb[97].mxu1 }
 0x1d7   : > { %v15105_v53 = vpop.f32.mrb[98].mxu1  ;;  %v14278_v52 = vld [vmem:[%s14649_s17 + $0x340] ss:$8 sps:$4 sm:$0xff]  }
 0x1d8   : > { %v1235_v11 = vpop.f32.mrb[99].mxu1 }
 0x1da   : > { %2023 = vmatmul.mubr.bf16.gmra.mrb[204].mxu1 %v14275_v61 }
 0x1db   : > { %11174 = vmatprep.mubr.msk.bf16.mxu1 %vm694_vm0, %v14276_v59 }
 0x1dd   : > { %v15111_v19 = vpop.f32.mrb[100].mxu1 }
 0x1de   : > { %v1240_v43 = vpop.f32.mrb[101].mxu1 }
 0x1df   : > { %v15116_v16 = vpop.f32.mrb[102].mxu1  ;;  %v14281_v43 = vld [vmem:[%s14649_s17 + $0x350] ss:$8 sps:$4 sm:$0xff]  }
 0x1e0   : > { %v1243_v46 = vpop.f32.mrb[103].mxu1 }
 0x1e2   : > { %2031 = vmatmul.mubr.bf16.gmra.mrb[208].mxu1 %v14278_v52 }
 0x1e3   : > { %11175 = vmatprep.mubr.msk.bf16.mxu1 %vm694_vm0, %v14279_v39 }
 0x1e5   : > { %v15122_v59 = vpop.f32.mrb[104].mxu1 }
 0x1e6   : > { %17903 = vst [vmem:[#allocation8_spill] sm:$0xff] %v15122_v59  ;;  %v1248_v61 = vpop.f32.mrb[105].mxu1 }
 0x1e7   : > { %v15127_v25 = vpop.f32.mrb[106].mxu1  ;;  %v14284_v61 = vld [vmem:[%s14649_s17 + $0x360] ss:$8 sps:$4 sm:$0xff]  }
 0x1e8   : > { %v1251_v1 = vpop.f32.mrb[107].mxu1 }
 0x1ea   : > { %2039 = vmatmul.mubr.bf16.gmra.mrb[212].mxu1 %v14281_v43 }
 0x1eb   : > { %11176 = vmatprep.mubr.msk.bf16.mxu1 %vm694_vm0, %v14282_v33 }
 0x1ed   : > { %v15133_v39 = vpop.f32.mrb[108].mxu1 }
 0x1ee   : > { %17904 = vst [vmem:[#allocation9_spill] sm:$0xff] %v15133_v39  ;;  %v1256_v52 = vpop.f32.mrb[109].mxu1  ;;  %v14288_v39 = vld [vmem:[%s14649_s17 + $0x384] ss:$8 sps:$4 sm:$0xff]  }
 0x1ef   : > { %v15138_v11 = vpop.f32.mrb[110].mxu1  ;;  %v14287_v52 = vld [vmem:[%s14649_s17 + $0x370] ss:$8 sps:$4 sm:$0xff]  }
 0x1f0   : > { %v1259_v27 = vpop.f32.mrb[111].mxu1 }
 0x1f2   : > { %2047 = vmatmul.mubr.bf16.gmra.mrb[216].mxu1 %v14284_v61 }
 0x1f3   : > { %11177 = vmatprep.mubr.msk.bf16.mxu1 %vm694_vm0, %v14285_v21 }
 0x1f5   : > { %v15144_v1 = vpop.f32.mrb[112].mxu1 }
 0x1f6   : > { %17905 = vst [vmem:[#allocation10_spill] sm:$0xff] %v15144_v1  ;;  %v1264_v43 = vpop.f32.mrb[113].mxu1  ;;  %v14291_v1 = vld [vmem:[%s14649_s17 + $0x394] ss:$8 sps:$4 sm:$0xff]  }
 0x1f7   : > { %v15149_v46 = vpop.f32.mrb[114].mxu1  ;;  %v14290_v43 = vld [vmem:[%s14649_s17 + $0x380] ss:$8 sps:$4 sm:$0xff]  }
 0x1f8   : > { %v1267_v59 = vpop.f32.mrb[115].mxu1 }
 0x1fa   : > { %2055 = vmatmul.mubr.bf16.gmra.mrb[220].mxu1 %v14287_v52 }
 0x1fb   : > { %11178 = vmatprep.mubr.msk.bf16.mxu1 %vm694_vm0, %v14288_v39 }
 0x1fd   : > { %v15155_v21 = vpop.f32.mrb[116].mxu1 }
 0x1fe   : > { %17906 = vst [vmem:[#allocation11_spill] sm:$0xff] %v15155_v21  ;;  %v1272_v61 = vpop.f32.mrb[117].mxu1  ;;  %v14294_v21 = vld [vmem:[%s14649_s17 + $0x3a4] ss:$8 sps:$4 sm:$0xff]  }
 0x1ff   : > { %v15160_v33 = vpop.f32.mrb[118].mxu1  ;;  %v14293_v61 = vld [vmem:[%s14649_s17 + $0x390] ss:$8 sps:$4 sm:$0xff]  }
 0x200   : > { %v1275_v3 = vpop.f32.mrb[119].mxu1 }
 0x202   : > { %2063 = vmatmul.mubr.bf16.gmra.mrb[224].mxu1 %v14290_v43 }
 0x203   : > { %11179 = vmatprep.mubr.msk.bf16.mxu1 %vm694_vm0, %v14291_v1  ;;  %v14299_v1 = vld [vmem:[%s14649_s17 + $0x3b0] ss:$8 sps:$4 sm:$0xff]  }
 0x205   : > { %v15166_v59 = vpop.f32.mrb[120].mxu1 }
 0x206   : > { %17907 = vst [vmem:[#allocation12_spill] sm:$0xff] %v15166_v59  ;;  %v1280_v52 = vpop.f32.mrb[121].mxu1  ;;  %v14297_v59 = vld [vmem:[%s14649_s17 + $0x3b4] ss:$8 sps:$4 sm:$0xff]  }
 0x207   : > { %v15171_v27 = vpop.f32.mrb[122].mxu1  ;;  %v14296_v52 = vld [vmem:[%s14649_s17 + $0x3a0] ss:$8 sps:$4 sm:$0xff]  }
 0x208   : > { %17908 = vst [vmem:[#allocation13_spill] sm:$0xff] %v15171_v27  ;;  %v1283_v7 = vpop.f32.mrb[123].mxu1  ;;  %v17911_v27 = vmax.f32 %v14878_v23, %v15017_v22  ;;  %v17913_v23 = vmov 0   ;;  %v17914_v22 = vmax.f32 %v14885_v29, %v15028_v34  ;;  %v17916_v29 = vmax.f32 %v14892_v35, %v15039_v48 }
 0x209   : > { %2263 = vst.msk [vmem:[#allocation2 + $0x80] sm:$0xff] %vm2246_vm2, %v17913_v23 }
 0x20a   : > { %2071 = vmatmul.mubr.bf16.gmra.mrb[228].mxu1 %v14293_v61 }
 0x20b   : > { %11180 = vmatprep.mubr.msk.bf16.mxu1 %vm694_vm0, %v14294_v21  ;;  %v17910_v21 = vmax.f32 %v14875_v20, %v15012_v17  ;;  %v17912_v20 = vmax.f32 %v14882_v26, %v15023_v28  ;;  %v17915_v28 = vmax.f32 %v14889_v32, %v15034_v40  ;;  %v14312_v32 = vld [vmem:[%s17795_s3 + $0x20] sm:$0xff]  }
 0x20c   : > { %12453 = vmatprep.subr.bf16.mxu1 %v14312_v32 }
 0x20d   : > { %v15177_v3 = vpop.f32.mrb[124].mxu1  ;;  %12454 = vmatpush3.bf16.msra.mxu1 %v14312_v32 }
 0x20e   : > { %17909 = vst [vmem:[#allocation14_spill] sm:$0xff] %v15177_v3  ;;  %v1288_v43 = vpop.f32.mrb[125].mxu1 }
 0x20f   : > { %v15182_v39 = vpop.f32.mrb[126].mxu1 }
 0x210   : > { %v1291_v45 = vpop.f32.mrb[127].mxu1 }
 0x212   : > { %2079 = vmatmul.mubr.bf16.gmra.mrb[232].mxu1 %v14296_v52 }
 0x213   : > { %11181 = vmatprep.mubr.msk.bf16.mxu1 %vm694_vm0, %v14297_v59 }
 0x215   : > { %v1583_v7 = vpop.f32.mrb[128].mxu1 }
 0x216   : > { %v15191_v61 = vmax.f32 %v17910_v21, %v1583_v7  ;;  %v1585_v43 = vpop.f32.mrb[129].mxu1  ;;  %v14302_v7 = vld [vmem:[%s14649_s17 + $0x3c0] ss:$8 sps:$4 sm:$0xff]  }
 0x217   : > { %v1586_v3 = vpop.f32.mrb[130].mxu1  ;;  %v14303_v43 = vld [vmem:[%s14649_s17 + $0x3d4] ss:$8 sps:$4 sm:$0xff]  }
 0x218   : > { %v15198_v55 = vmax.f32 %v17911_v27, %v1586_v3  ;;  %v1588_v45 = vpop.f32.mrb[131].mxu1 }
 0x219   : > { %v14305_v45 = vld [vmem:[%s14649_s17 + $0x3d0] ss:$8 sps:$4 sm:$0xff]  }
 0x21a   : > { %2087 = vmatmul.mubr.bf16.gmra.mrb[236].mxu1 %v14299_v1 }
 0x21b   : > { %11182 = vmatprep.mubr.msk.bf16.mxu1 %vm694_vm0, %v14300_v9 }
 0x21d   : > { %v1591_v59 = vpop.f32.mrb[132].mxu1 }
 0x21e   : > { %v15204_v17 = vmax.f32 %v17912_v20, %v1591_v59  ;;  %v1593_v52 = vpop.f32.mrb[133].mxu1  ;;  %v14306_v20 = vld [vmem:[%s14649_s17 + $0x3e4] ss:$8 sps:$4 sm:$0xff]  }
 0x21f   : > { %v1594_v21 = vpop.f32.mrb[134].mxu1 }
 0x220   : > { %v15213_v9 = vmax.f32 %v17914_v22, %v1594_v21  ;;  %v1596_v27 = vpop.f32.mrb[135].mxu1  ;;  %v17917_v21 = vmax.f32 %v14896_v38, %v15045_v60  ;;  %v14315_v38 = vld [vmem:[%s17795_s3 + $0x68] sm:$0xff]   ;;  %v14316_v60 = vld [vmem:[%s17795_s3 + $0x30] sm:$0xff]  }
 0x221   : > { %v14309_v27 = vld [vmem:[%s14649_s17 + $0x3f4] ss:$8 sps:$4 sm:$0xff]  }
 0x222   : > { %2095 = vmatmul.mubr.bf16.gmra.mrb[240].mxu1 %v14302_v7  ;;  %v14313_v7 = vld [vmem:[%s17795_s3 + $0x60] sm:$0xff]  }
 0x223   : > { %11183 = vmatprep.mubr.msk.bf16.mxu1 %vm694_vm0, %v14303_v43  ;;  %v14308_v43 = vld [vmem:[%s14649_s17 + $0x3e0] ss:$8 sps:$4 sm:$0xff]   ;;  %12549 = vmatprep.subr.bf16.mxu0 %v14313_v7 }
 0x224   : > { %12550 = vmatpush3.bf16.msra.mxu0 %v14313_v7 }
 0x225   : > { %v1599_v26 = vpop.f32.mrb[136].mxu1  ;;  %12551 = vmatprep.subr.bf16.mxu0 %v14315_v38 }
 0x226   : > { %v15219_v3 = vmax.f32 %v17915_v28, %v1599_v26  ;;  %v1601_v1 = vpop.f32.mrb[137].mxu1  ;;  %v14314_v26 = vld [vmem:[%s17795_s3 + $0x28] sm:$0xff]   ;;  %v17918_v28 = vmax.f32 %v14899_v41, %v15050_v12  ;;  %v14317_v12 = vld [vmem:[%s17795_s3 + $0x70] sm:$0xff]  }
 0x227   : > { %v1602_v59 = vpop.f32.mrb[138].mxu1  ;;  %12455 = vmatprep.subr.bf16.mxu1 %v14314_v26 }
 0x228   : > { %v15226_v34 = vmax.f32 %v17916_v29, %v1602_v59  ;;  %v1604_v52 = vpop.f32.mrb[139].mxu1  ;;  %12456 = vmatpush3.bf16.msra.mxu1 %v14314_v26  ;;  %12552 = vmatpush3.bf16.msra.mxu0 %v14315_v38  ;;  %v17919_v59 = vmax.f32 %v14903_v44, %v15056_v57  ;;  %v14319_v44 = vld [vmem:[%s17795_s3 + $0x78] sm:$0xff]   ;;  %v17923_v38 = vmax.f32 %v14919_v63, %v15078_v31 }
 0x229   : > { %12457 = vmatprep.subr.bf16.mxu1 %v14316_v60  ;;  %v14311_v52 = vld [vmem:[%s14649_s17 + $0x3f0] ss:$8 sps:$4 sm:$0xff]   ;;  %12553 = vmatprep.subr.bf16.mxu0 %v14317_v12  ;;  %v17926_v63 = vmax.f32 %v14933_v13, %v15094_v37  ;;  %v17929_v13 = vmax.f32 %v14952_v58, %v15111_v19  ;;  %v17933_v58 = vmax.f32 %v14966_v30, %v15127_v25  ;;  %v15350_v30 = vld [vmem:[%s17795_s3 + $0x80] sm:$0xff]   ;;  %s14537_s17 = smov 104  }
 0x22a   : > { %2103 = vmatmul.mubr.bf16.gmra.mrb[244].mxu1 %v14305_v45 }
 0x22b   : > { %11184 = vmatprep.mubr.msk.bf16.mxu1 %vm694_vm0, %v14306_v20 }
 0x22c   : > { %12458 = vmatpush3.bf16.msra.mxu1 %v14316_v60  ;;  %12554 = vmatpush3.bf16.msra.mxu0 %v14317_v12 }
 0x22d   : > { %v1607_v40 = vpop.f32.mrb[140].mxu1  ;;  %12555 = vmatprep.subr.bf16.mxu0 %v14319_v44 }
 0x22e   : > { %v15238_v35 = vmax.f32 %v17917_v21, %v1607_v40  ;;  %v1609_v48 = vpop.f32.mrb[141].mxu1  ;;  %v17920_v40 = vmax.f32 %v14906_v47, %v15061_v2  ;;  %v17921_v47 = vmax.f32 %v14910_v51, %v15067_v10  ;;  %v17924_v51 = vmax.f32 %v14922_v5, %v15083_v15 }
 0x22f   : > { %v1610_v22 = vpop.f32.mrb[142].mxu1  ;;  %v14318_v48 = vld [vmem:[%s17795_s3 + $0x38] sm:$0xff]   ;;  %v17927_v5 = vmax.f32 %v14941_v54, %v15100_v6  ;;  %v17930_v54 = vmax.f32 %v14955_v24, %v15116_v16 }
 0x230   : > { %v15248_v1 = vmax.f32 %v17918_v28, %v1610_v22  ;;  %v1612_v45 = vpop.f32.mrb[143].mxu1  ;;  %12459 = vmatprep.subr.bf16.mxu1 %v14318_v48  ;;  %12556 = vmatpush3.bf16.msra.mxu0 %v14319_v44  ;;  %v17935_v24 = vld [vmem:[#allocation9_spill] sm:$0xff] }
 0x231   : > { %12460 = vmatpush3.bf16.msra.mxu1 %v14318_v48  ;;  %12581 = vmatprep.subr.bf16.mxu0 %v15350_v30 }
 0x232   : > { %2111 = vmatmul.mubr.bf16.gmra.mrb[248].mxu1 %v14308_v43 }
 0x233   : > { %11185 = vmatprep.mubr.msk.bf16.mxu1 %vm694_vm0, %v14309_v27  ;;  %v17922_v27 = vmax.f32 %v14913_v56, %v15072_v8  ;;  %v17925_v56 = vmax.f32 %v14930_v50, %v15089_v4  ;;  %v17928_v50 = vmax.f32 %v14944_v18, %v15105_v53  ;;  %v17931_v18 = vld [vmem:[#allocation8_spill] sm:$0xff] }
 0x234   : > { %v17932_v53 = vmax.f32 %v14963_v62, %v17931_v18  ;;  %v17937_v62 = vmax.f32 %v14977_v36, %v15138_v11  ;;  %v17941_v36 = vmax.f32 %v14987_v42, %v15149_v46  ;;  %v17945_v18 = vmax.f32 %v14994_v49, %v15160_v33  ;;  %v15376_v42 = vld [vmem:[%s17795_s3] sm:$0xff]   ;;  %v17949_v49 = vld [vmem:[#allocation13_spill] sm:$0xff] }
 0x235   : > { %v1615_v41 = vpop.f32.mrb[144].mxu1  ;;  %12485 = vmatprep.subr.bf16.mxu1 %v15376_v42  ;;  %v17950_v33 = vmax.f32 %v15001_v0, %v17949_v49  ;;  %v15402_v0 = vld [vmem:[%s17794_s2] ss:$0 sm:$0xff] }
 0x236   : > { %v15263_v20 = vmax.f32 %v17919_v59, %v1615_v41  ;;  %v1617_v29 = vpop.f32.mrb[145].mxu1 }
 0x237   : > { %v1618_v32 = vpop.f32.mrb[146].mxu1 }
 0x238   : > { %v15269_v7 = vmax.f32 %v17920_v40, %v1618_v32  ;;  %v1620_v21 = vpop.f32.mrb[147].mxu1 }
 0x23a   : > { %2119 = vmatmul.mubr.bf16.gmra.mrb[252].mxu1 %v14311_v52 }
 0x23d   : > { %v1623_v57 = vpop.f32.mrb[148].mxu1 }
 0x23e   : > { %v15280_v2 = vmax.f32 %v17921_v47, %v1623_v57  ;;  %v1625_v43 = vpop.f32.mrb[149].mxu1 }
 0x23f   : > { %v1626_v22 = vpop.f32.mrb[150].mxu1 }
 0x240   : > { %v15285_v26 = vmax.f32 %v17922_v27, %v1626_v22  ;;  %v1628_v28 = vpop.f32.mrb[151].mxu1 }
 0x245   : > { %v1631_v45 = vpop.f32.mrb[152].mxu1 }
 0x246   : > { %v15290_v60 = vmax.f32 %v17923_v38, %v1631_v45  ;;  %v1633_v41 = vpop.f32.mrb[153].mxu1 }
 0x247   : > { %v1634_v12 = vpop.f32.mrb[154].mxu1 }
 0x248   : > { %v15295_v10 = vmax.f32 %v17924_v51, %v1634_v12  ;;  %v1636_v59 = vpop.f32.mrb[155].mxu1 }
 0x249   : > { %v17934_v59 = vld [vmem:[#allocation3_spill] sm:$0xff] }
 0x24a   : > { %v17936_v16 = vmax.f32 %v17934_v59, %v17935_v24 }
 0x24d   : > { %v1639_v29 = vpop.f32.mrb[156].mxu1 }
 0x24e   : > { %v15300_v8 = vmax.f32 %v17925_v56, %v1639_v29  ;;  %v1641_v52 = vpop.f32.mrb[157].mxu1 }
 0x24f   : > { %v1642_v32 = vpop.f32.mrb[158].mxu1 }
 0x250   : > { %v15305_v31 = vmax.f32 %v17926_v63, %v1642_v32  ;;  %v1644_v40 = vpop.f32.mrb[159].mxu1 }
 0x251   : > { %v17938_v40 = vld [vmem:[#allocation4_spill] sm:$0xff] }
 0x255   : > { %v1647_v21 = vpop.f32.mrb[160].mxu1 }
 0x256   : > { %v15310_v15 = vmax.f32 %v17927_v5, %v1647_v21  ;;  %v1649_v48 = vpop.f32.mrb[161].mxu1  ;;  %v17939_v21 = vld [vmem:[#allocation10_spill] sm:$0xff] }
 0x257   : > { %v1650_v44 = vpop.f32.mrb[162].mxu1  ;;  %v17940_v5 = vmax.f32 %v17938_v40, %v17939_v21 }
 0x258   : > { %v15315_v4 = vmax.f32 %v17928_v50, %v1650_v44  ;;  %v1652_v57 = vpop.f32.mrb[163].mxu1 }
 0x25d   : > { %v1655_v47 = vpop.f32.mrb[164].mxu1 }
 0x25e   : > { %v15320_v37 = vmax.f32 %v17929_v13, %v1655_v47  ;;  %v1657_v43 = vpop.f32.mrb[165].mxu1  ;;  %v17942_v13 = vld [vmem:[#allocation5_spill] sm:$0xff] }
 0x25f   : > { %v1658_v22 = vpop.f32.mrb[166].mxu1  ;;  %v17943_v43 = vld [vmem:[#allocation11_spill] sm:$0xff] }
 0x260   : > { %v15325_v6 = vmax.f32 %v17930_v54, %v1658_v22  ;;  %v1660_v27 = vpop.f32.mrb[167].mxu1  ;;  %v17944_v22 = vmax.f32 %v17942_v13, %v17943_v43 }
 0x265   : > { %v1663_v28 = vpop.f32.mrb[168].mxu1 }
 0x266   : > { %v15330_v45 = vmax.f32 %v17932_v53, %v1663_v28  ;;  %v1665_v38 = vpop.f32.mrb[169].mxu1 }
 0x267   : > { %v1666_v41 = vpop.f32.mrb[170].mxu1 }
 0x268   : > { %v15335_v19 = vmax.f32 %v17933_v58, %v1666_v41  ;;  %v1668_v12 = vpop.f32.mrb[171].mxu1  ;;  %v17946_v41 = vld [vmem:[#allocation6_spill] sm:$0xff]  ;;  %v17947_v58 = vld [vmem:[#allocation12_spill] sm:$0xff] }
 0x269   : > { %v17948_v12 = vmax.f32 %v17946_v41, %v17947_v58 }
 0x26d   : > { %v1671_v51 = vpop.f32.mrb[172].mxu1 }
 0x26e   : > { %v15340_v29 = vmax.f32 %v17936_v16, %v1671_v51  ;;  %v1673_v56 = vpop.f32.mrb[173].mxu1 }
 0x26f   : > { %v1674_v52 = vpop.f32.mrb[174].mxu1 }
 0x270   : > { %v15345_v32 = vmax.f32 %v17937_v62, %v1674_v52  ;;  %v1676_v63 = vpop.f32.mrb[175].mxu1  ;;  %v17951_v62 = vld [vmem:[#allocation7_spill] sm:$0xff] }
 0x271   : > { %v17952_v63 = vld [vmem:[#allocation14_spill] sm:$0xff] }
 0x275   : > { %v1679_v25 = vpop.f32.mrb[176].mxu1 }
 0x276   : > { %v15356_v48 = vmax.f32 %v17940_v5, %v1679_v25  ;;  %v1681_v44 = vpop.f32.mrb[177].mxu1  ;;  %v17953_v25 = vmax.f32 %v17951_v62, %v17952_v63 }
 0x277   : > { %v1682_v50 = vpop.f32.mrb[178].mxu1  ;;  %v17954_v44 = vmax.f32 %v15008_v14, %v15182_v39 }
 0x278   : > { %v15361_v11 = vmax.f32 %v17941_v36, %v1682_v50  ;;  %v1684_v57 = vpop.f32.mrb[179].mxu1 }
 0x27d   : > { %v1687_v47 = vpop.f32.mrb[180].mxu1 }
 0x27e   : > { %v15366_v54 = vmax.f32 %v17944_v22, %v1687_v47  ;;  %v1689_v27 = vpop.f32.mrb[181].mxu1 }
 0x27f   : > { %v1690_v28 = vpop.f32.mrb[182].mxu1 }
 0x280   : > { %v15371_v53 = vmax.f32 %v17945_v18, %v1690_v28  ;;  %v1692_v38 = vpop.f32.mrb[183].mxu1 }
 0x285   : > { %v1695_v46 = vpop.f32.mrb[184].mxu1 }
 0x286   : > { %v15381_v51 = vmax.f32 %v17948_v12, %v1695_v46  ;;  %v1697_v59 = vpop.f32.mrb[185].mxu1 }
 0x287   : > { %v1698_v24 = vpop.f32.mrb[186].mxu1 }
 0x288   : > { %v15387_v16 = vmax.f32 %v17950_v33, %v1698_v24  ;;  %v1700_v56 = vpop.f32.mrb[187].mxu1 }
 0x28d   : > { %v1703_v52 = vpop.f32.mrb[188].mxu1 }
 0x28e   : > { %v15392_v40 = vmax.f32 %v17953_v25, %v1703_v52  ;;  %v1705_v21 = vpop.f32.mrb[189].mxu1 }
 0x28f   : > { %v1706_v5 = vpop.f32.mrb[190].mxu1 }
 0x290   : > { %v15397_v50 = vmax.f32 %v17954_v44, %v1706_v5  ;;  %v1708_v36 = vpop.f32.mrb[191].mxu1 }
 0x295   : > { %v2000_v57 = vpop.f32.mrb[192].mxu1 }
 0x296   : > { %v2127_v47 = vmax.f32 %v15191_v61, %v2000_v57  ;;  %v2002_v13 = vpop.f32.mrb[193].mxu1 }
 0x297   : > { %v2003_v43 = vpop.f32.mrb[194].mxu1 }
 0x298   : > { %v2166_v22 = vadd.f32 %v15402_v0, %v2127_v47  ;;  %v2128_v27 = vmax.f32 %v15198_v55, %v2003_v43  ;;  %v2005_v28 = vpop.f32.mrb[195].mxu1 }
 0x29a   : > { %v2167_v14 = vadd.f32 %v15402_v0, %v2128_v27  ;;  %v2198_v39 = vmax.f32 %v2166_v22, 0.0 }
 0x29c   : > { %v2199_v18 = vmax.f32 %v2167_v14, 0.0 }
 0x29d   : > { %v2008_v38 = vpop.f32.mrb[196].mxu1 }
 0x29e   : > { %v2230_v46 = vpack.c.bf16 %v2199_v18, %v2198_v39  ;;  %v2129_v41 = vmax.f32 %v15204_v17, %v2008_v38  ;;  %v2010_v58 = vpop.f32.mrb[197].mxu1 }
 0x29f   : > { %v2011_v12 = vpop.f32.mrb[198].mxu1 }
 0x2a0   : > { %2247 = vst.msk [vmem:[#allocation2] sm:$0xff] %vm2246_vm2, %v2230_v46  ;;  %v2168_v61 = vadd.f32 %v15402_v0, %v2129_v41  ;;  %v2130_v59 = vmax.f32 %v15213_v9, %v2011_v12  ;;  %v2013_v24 = vpop.f32.mrb[199].mxu1 }
 0x2a2   : > { %v2169_v55 = vadd.f32 %v15402_v0, %v2130_v59  ;;  %v2200_v49 = vmax.f32 %v2168_v61, 0.0 }
 0x2a4   : > { %v2201_v33 = vmax.f32 %v2169_v55, 0.0 }
 0x2a5   : > { %v2016_v56 = vpop.f32.mrb[200].mxu1 }
 0x2a6   : > { %v2231_v52 = vpack.c.bf16 %v2201_v33, %v2200_v49  ;;  %v2131_v62 = vmax.f32 %v15219_v3, %v2016_v56  ;;  %v2018_v63 = vpop.f32.mrb[201].mxu1 }
 0x2a7   : > { %v2019_v25 = vpop.f32.mrb[202].mxu1  ;;  %v15414_v17 = vld [vmem:[#allocation2] sm:$0xff] }
 0x2a8   : > { %2248 = vst.msk [vmem:[#allocation2 + $0x8] sm:$0xff] %vm2246_vm2, %v2231_v52  ;;  %v2170_v21 = vadd.f32 %v15402_v0, %v2131_v62  ;;  %v2132_v5 = vmax.f32 %v15226_v34, %v2019_v25  ;;  %v2021_v9 = vpop.f32.mrb[203].mxu1  ;;  %v2298_v36 = vshll.u32 %v15414_v17, 16  ;;  %v2761_v57 = vld [vmem:[#allocation2] sm:$0xfe]  ;;  %v2296_v34 = vshrl.u32 %v15414_v17, 16 }
 0x2a9   : > { %v3035_v3 = vshrl.u32 %v2761_v57, 16  ;;  %v3038_v22 = vshll.u32 %v2761_v57, 16 }
 0x2aa   : > { %v2171_v44 = vadd.f32 %v15402_v0, %v2132_v5  ;;  %v2202_v47 = vmax.f32 %v2170_v21, 0.0  ;;  %v2300_v39 = vrot.slane %v2298_v36, 1 }
 0x2ab   : > { %v3040_v59 = vrot.slane %v3038_v22, 2 }
 0x2ac   : > { %v2203_v13 = vmax.f32 %v2171_v44, 0.0  ;;  %v2301_v55 = vor.u32 %v2300_v39, %v2296_v34  ;;  %v14324_v34 = vld [vmem:[%s17795_s3 + $0x8] sm:$0xff]  }
 0x2ad   : > { %v2024_v43 = vpop.f32.mrb[204].mxu1 }
 0x2ae   : > { %v2232_v27 = vpack.c.bf16 %v2203_v13, %v2202_v47  ;;  %v2133_v28 = vmax.f32 %v15238_v35, %v2024_v43  ;;  %v2026_v14 = vpop.f32.mrb[205].mxu1  ;;  %v3037_v35 = vrot.slane %v3035_v3, 1 }
 0x2af   : > { %v2027_v18 = vpop.f32.mrb[206].mxu1  ;;  %v15422_v38 = vld [vmem:[#allocation2 + $0x8] sm:$0xff] }
 0x2b0   : > { %2249 = vst.msk [vmem:[#allocation2 + $0x10] sm:$0xff] %vm2246_vm2, %v2232_v27  ;;  %v2172_v46 = vadd.f32 %v15402_v0, %v2133_v28  ;;  %v2134_v41 = vmax.f32 %v15248_v1, %v2027_v18  ;;  %v2029_v58 = vpop.f32.mrb[207].mxu1  ;;  %v2303_v12 = vshll.u32 %v15422_v38, 16  ;;  %v2307_v61 = vshrl.u32 %v15422_v38, 16 }
 0x2b1   : > { %v3041_v25 = vor.u32 %v3040_v59, %v3037_v35 }
 0x2b2   : > { %v2173_v24 = vadd.f32 %v15402_v0, %v2134_v41  ;;  %v2305_v49 = vrot.slane %v2303_v12, 1  ;;  %v3042_v33 = vrot.slane %v2307_v61, 1  ;;  %v3043_v56 = vrot.slane %v2303_v12, 2 }
 0x2b3   : > { %v2204_v52 = vmax.f32 %v2172_v46, 0.0 }
 0x2b4   : > { %v2205_v62 = vmax.f32 %v2173_v24, 0.0  ;;  %v2306_v63 = vsel %vm2294_vm3, %v2301_v55, %v2305_v49  ;;  %v3044_v21 = vor.u32 %v3043_v56, %v3042_v33  ;;  %v2309_v28 = vor.u32 %v2307_v61, %v2305_v49  ;;  %v14321_v24 = vld [vmem:[%s17795_s3 + $0x88] sm:$0xff]   ;;  %v14325_v56 = vld [vmem:[%s17795_s3 + $0x10] sm:$0xff]  }
 0x2b5   : > { %v2032_v1 = vpop.f32.mrb[208].mxu1  ;;  %12461 = vmatprep.mubr.msk.bf16.mxu1 %vm2246_vm2, %v2306_v63 }
 0x2b6   : > { %v2233_v5 = vpack.c.bf16 %v2205_v62, %v2204_v52  ;;  %v2135_v9 = vmax.f32 %v15263_v20, %v2032_v1  ;;  %v2034_v44 = vpop.f32.mrb[209].mxu1  ;;  %v3045_v47 = vsel %vm3033_vm4, %v3041_v25, %v3044_v21 }
 0x2b7   : > { %v2035_v36 = vpop.f32.mrb[210].mxu1  ;;  %v15434_v57 = vld [vmem:[#allocation2 + $0x10] sm:$0xff]  ;;  %12557 = vmatprep.mubr.msk.bf16.mxu0 %vm2246_vm2, %v3045_v47  ;;  %v14327_v44 = vld [vmem:[%s17795_s3 + $0x18] sm:$0xff]  }
 0x2b8   : > { %2250 = vst.msk [vmem:[#allocation2 + $0x18] sm:$0xff] %vm2246_vm2, %v2233_v5  ;;  %v2174_v13 = vadd.f32 %v15402_v0, %v2135_v9  ;;  %v2136_v43 = vmax.f32 %v15269_v7, %v2035_v36  ;;  %v2311_v3 = vshll.u32 %v15434_v57, 16  ;;  %v2037_v22 = vpop.f32.mrb[211].mxu1  ;;  %v2315_v27 = vshrl.u32 %v15434_v57, 16 }
 0x2ba   : > { %v2175_v20 = vadd.f32 %v15402_v0, %v2136_v43  ;;  %v15444_v14 = vrot.slane %v2311_v3, 1  ;;  %v3046_v39 = vrot.slane %v2315_v27, 1  ;;  %v3047_v18 = vrot.slane %v2311_v3, 2 }
 0x2bb   : > { %v2206_v46 = vmax.f32 %v2174_v13, 0.0 }
 0x2bc   : > { %v2207_v7 = vmax.f32 %v2175_v20, 0.0  ;;  %v2314_v41 = vsel %vm2294_vm3, %v2309_v28, %v15444_v14  ;;  %v15452_v12 = vor.u32 %v3047_v18, %v3046_v39  ;;  %v2317_v25 = vor.u32 %v2315_v27, %v15444_v14  ;;  %v14326_v20 = vld [vmem:[%s17795_s3 + $0x98] sm:$0xff]  }
 0x2bd   : > { %v2040_v58 = vpop.f32.mrb[212].mxu1  ;;  %12462 = vmatmul.mubr.msk.bf16.vlgmr.msra.gmra.mrb[0].mxu1 %vm2246_vm2, %v2314_v41 }
 0x2be   : > { %v2234_v35 = vpack.c.bf16 %v2207_v7, %v2206_v46  ;;  %v2137_v61 = vmax.f32 %v15280_v2, %v2040_v58  ;;  %v2042_v59 = vpop.f32.mrb[213].mxu1  ;;  %12486 = vmatpush3.bf16.msra.mxu1 %v15376_v42  ;;  %v3049_v49 = vsel %vm3033_vm4, %v3044_v21, %v15452_v12 }
 0x2bf   : > { %v2043_v55 = vpop.f32.mrb[214].mxu1  ;;  %v15461_v33 = vld [vmem:[#allocation2 + $0x18] sm:$0xff]  ;;  %12487 = vmatprep.subr.bf16.mxu1 %v14324_v34  ;;  %12558 = vmatmul.mubr.msk.bf16.vlgmr.msra.gmra.mrb[0].mxu0 %vm2246_vm2, %v3049_v49 }
 0x2c0   : > { %2251 = vst.msk [vmem:[#allocation2 + $0x20] sm:$0xff] %vm2246_vm2, %v2234_v35  ;;  %v2176_v2 = vadd.f32 %v15402_v0, %v2137_v61  ;;  %v2138_v52 = vmax.f32 %v15285_v26, %v2043_v55  ;;  %v2045_v42 = vpop.f32.mrb[215].mxu1  ;;  %v2319_v62 = vshll.u32 %v15461_v33, 16  ;;  %v2323_v63 = vshrl.u32 %v15461_v33, 16  ;;  %12582 = vmatpush3.bf16.msra.mxu0 %v15350_v30  ;;  %v14322_v26 = vld [vmem:[%s17795_s3 + $0x90] sm:$0xff]   ;;  %v15512_v55 = vld [vmem:[%s17795_s3 + $0xa0] sm:$0xff]  }
 0x2c1   : > { %12583 = vmatprep.subr.bf16.mxu0 %v14321_v24 }
 0x2c2   : > { %v2177_v1 = vadd.f32 %v15402_v0, %v2138_v52  ;;  %v2321_v21 = vrot.slane %v2319_v62, 1  ;;  %v3050_v5 = vrot.slane %v2323_v63, 1  ;;  %12488 = vmatpush3.bf16.msra.mxu1 %v14324_v34  ;;  %v3051_v9 = vrot.slane %v2319_v62, 2  ;;  %v15499_v34 = vld [vmem:[%s17795_s3 + $0x40] sm:$0xff]  }
 0x2c3   : > { %12489 = vmatprep.subr.bf16.mxu1 %v14325_v56  ;;  %v2208_v36 = vmax.f32 %v2176_v2, 0.0 }
 0x2c4   : > { %v2209_v30 = vmax.f32 %v2177_v1, 0.0  ;;  %v15482_v47 = vsel %vm2294_vm3, %v2317_v25, %v2321_v21  ;;  %v3052_v43 = vor.u32 %v3051_v9, %v3050_v5  ;;  %12584 = vmatpush3.bf16.msra.mxu0 %v14321_v24  ;;  %v2325_v35 = vor.u32 %v2323_v63, %v2321_v21 }
 0x2c5   : > { %v2048_v13 = vpop.f32.mrb[216].mxu1  ;;  %12465 = vmatprep.mubr.msk.bf16.mxu1 %vm2246_vm2, %v15482_v47  ;;  %12585 = vmatprep.subr.bf16.mxu0 %v14322_v26 }
 0x2c6   : > { %v2235_v3 = vpack.c.bf16 %v2209_v30, %v2208_v36  ;;  %v2139_v22 = vmax.f32 %v15290_v60, %v2048_v13  ;;  %v2050_v27 = vpop.f32.mrb[217].mxu1  ;;  %12490 = vmatpush3.bf16.msra.mxu1 %v14325_v56  ;;  %v15494_v18 = vsel %vm3033_vm4, %v15452_v12, %v3052_v43 }
 0x2c7   : > { %v15490_v28 = vld [vmem:[#allocation2 + $0x20] sm:$0xff]  ;;  %v2051_v39 = vpop.f32.mrb[218].mxu1  ;;  %12491 = vmatprep.subr.bf16.mxu1 %v14327_v44  ;;  %12561 = vmatprep.mubr.msk.bf16.mxu0 %vm2246_vm2, %v15494_v18 }
 0x2c8   : > { %2252 = vst.msk [vmem:[#allocation2 + $0x28] sm:$0xff] %vm2246_vm2, %v2235_v3  ;;  %v2178_v60 = vadd.f32 %v15402_v0, %v2139_v22  ;;  %v2327_v46 = vshll.u32 %v15490_v28, 16  ;;  %v2140_v7 = vmax.f32 %v15295_v10, %v2051_v39  ;;  %v2053_v41 = vpop.f32.mrb[219].mxu1  ;;  %v2331_v58 = vshrl.u32 %v15490_v28, 16  ;;  %12586 = vmatpush3.bf16.msra.mxu0 %v14322_v26 }
 0x2c9   : > { %12587 = vmatprep.subr.bf16.mxu0 %v14326_v20 }
 0x2ca   : > { %v2329_v61 = vrot.slane %v2327_v46, 1  ;;  %v2179_v59 = vadd.f32 %v15402_v0, %v2140_v7  ;;  %v3054_v24 = vrot.slane %v2331_v58, 1  ;;  %12492 = vmatpush3.bf16.msra.mxu1 %v14327_v44  ;;  %v3055_v10 = vrot.slane %v2327_v46, 2 }
 0x2cb   : > { %12517 = vmatprep.subr.bf16.mxu1 %v15499_v34  ;;  %v2210_v49 = vmax.f32 %v2178_v60, 0.0 }
 0x2cc   : > { %v15516_v56 = vsel %vm2294_vm3, %v2325_v35, %v2329_v61  ;;  %v2211_v2 = vmax.f32 %v2179_v59, 0.0  ;;  %v3056_v42 = vor.u32 %v3055_v10, %v3054_v24  ;;  %12588 = vmatpush3.bf16.msra.mxu0 %v14326_v20  ;;  %v2333_v13 = vor.u32 %v2331_v58, %v2329_v61 }
 0x2cd   : > { %v2056_v52 = vpop.f32.mrb[220].mxu1  ;;  %12466 = vmatmul.mubr.msk.bf16.gmra.mrb[4].mxu1 %vm2246_vm2, %v15516_v56  ;;  %12613 = vmatprep.subr.bf16.mxu0 %v15512_v55 }
 0x2ce   : > { %v2236_v62 = vpack.c.bf16 %v2211_v2, %v2210_v49  ;;  %v2141_v63 = vmax.f32 %v15300_v8, %v2056_v52  ;;  %v2058_v1 = vpop.f32.mrb[221].mxu1  ;;  %v15523_v21 = vsel %vm3033_vm4, %v3052_v43, %v3056_v42 }
 0x2cf   : > { %v2059_v25 = vpop.f32.mrb[222].mxu1  ;;  %v15525_v5 = vld [vmem:[#allocation2 + $0x28] sm:$0xff]  ;;  %12562 = vmatmul.mubr.msk.bf16.gmra.mrb[4].mxu0 %vm2246_vm2, %v15523_v21 }
 0x2d0   : > { %2253 = vst.msk [vmem:[#allocation2 + $0x30] sm:$0xff] %vm2246_vm2, %v2236_v62  ;;  %v2180_v26 = vadd.f32 %v15402_v0, %v2141_v63  ;;  %v2142_v9 = vmax.f32 %v15305_v31, %v2059_v25  ;;  %v2061_v44 = vpop.f32.mrb[223].mxu1  ;;  %v2335_v8 = vshll.u32 %v15525_v5, 16  ;;  %v2339_v36 = vshrl.u32 %v15525_v5, 16 }
 0x2d2   : > { %v2181_v30 = vadd.f32 %v15402_v0, %v2142_v9  ;;  %v2337_v43 = vrot.slane %v2335_v8, 1  ;;  %v3058_v3 = vrot.slane %v2339_v36, 1  ;;  %v3059_v22 = vrot.slane %v2335_v8, 2  ;;  %v15557_v9 = vld [vmem:[#allocation2 + $0x18] sm:$0xff] }
 0x2d3   : > { %v2212_v27 = vmax.f32 %v2180_v26, 0.0 }
 0x2d4   : > { %v2213_v20 = vmax.f32 %v2181_v30, 0.0  ;;  %v15536_v39 = vsel %vm2294_vm3, %v2333_v13, %v2337_v43  ;;  %v3060_v60 = vor.u32 %v3059_v22, %v3058_v3  ;;  %v2341_v2 = vor.u32 %v2339_v36, %v2337_v43 }
 0x2d5   : > { %v2064_v31 = vpop.f32.mrb[224].mxu1  ;;  %12469 = vmatprep.mubr.msk.bf16.mxu1 %vm2246_vm2, %v15536_v39  ;;  %v17824_v22 = vshll.u32 %v15557_v9, 16 }
 0x2d6   : > { %v2237_v46 = vpack.c.bf16 %v2213_v20, %v2212_v27  ;;  %v2143_v7 = vmax.f32 %v15310_v15, %v2064_v31  ;;  %v2066_v41 = vpop.f32.mrb[225].mxu1  ;;  %v15544_v61 = vsel %vm3033_vm4, %v3056_v42, %v3060_v60  ;;  %v17821_v27 = vshrl.u32 %v15557_v9, 16 }
 0x2d7   : > { %v15541_v35 = vld [vmem:[#allocation2 + $0x30] sm:$0xff]  ;;  %v2067_v58 = vpop.f32.mrb[226].mxu1  ;;  %12565 = vmatprep.mubr.msk.bf16.mxu0 %vm2246_vm2, %v15544_v61 }
 0x2d8   : > { %2254 = vst.msk [vmem:[#allocation2 + $0x38] sm:$0xff] %vm2246_vm2, %v2237_v46  ;;  %v2182_v59 = vadd.f32 %v15402_v0, %v2143_v7  ;;  %v2343_v24 = vshll.u32 %v15541_v35, 16  ;;  %v2144_v10 = vmax.f32 %v15315_v4, %v2067_v58  ;;  %v2069_v49 = vpop.f32.mrb[227].mxu1  ;;  %v2347_v15 = vshrl.u32 %v15541_v35, 16 }
 0x2da   : > { %v2345_v52 = vrot.slane %v2343_v24, 1  ;;  %v2183_v62 = vadd.f32 %v15402_v0, %v2144_v10  ;;  %v3062_v42 = vrot.slane %v2347_v15, 1  ;;  %v3063_v63 = vrot.slane %v2343_v24, 2 }
 0x2db   : > { %v2214_v1 = vmax.f32 %v2182_v59, 0.0  ;;  %v5705_v10 = vrot.slane %v17821_v27, 1 }
 0x2dc   : > { %v15555_v25 = vsel %vm2294_vm3, %v2341_v2, %v2345_v52  ;;  %v2215_v26 = vmax.f32 %v2183_v62, 0.0  ;;  %v3064_v44 = vor.u32 %v3063_v63, %v3062_v42  ;;  %v2349_v41 = vor.u32 %v2347_v15, %v2345_v52 }
 0x2dd   : > { %v2072_v4 = vpop.f32.mrb[228].mxu1  ;;  %12470 = vmatmul.mubr.msk.bf16.gmra.mrb[8].mxu1 %vm2246_vm2, %v15555_v25 }
 0x2de   : > { %v2238_v8 = vpack.c.bf16 %v2215_v26, %v2214_v1  ;;  %v2145_v36 = vmax.f32 %v15320_v37, %v2072_v4  ;;  %v2074_v30 = vpop.f32.mrb[229].mxu1  ;;  %v15563_v43 = vsel %vm3033_vm4, %v3060_v60, %v3064_v44 }
 0x2df   : > { %v2075_v13 = vpop.f32.mrb[230].mxu1  ;;  %v15565_v3 = vld [vmem:[#allocation2 + $0x38] sm:$0xff]  ;;  %12566 = vmatmul.mubr.msk.bf16.gmra.mrb[8].mxu0 %vm2246_vm2, %v15563_v43 }
 0x2e0   : > { %2255 = vst.msk [vmem:[#allocation2 + $0x40] sm:$0xff] %vm2246_vm2, %v2238_v8  ;;  %v2184_v20 = vadd.f32 %v15402_v0, %v2145_v36  ;;  %v2146_v31 = vmax.f32 %v15325_v6, %v2075_v13  ;;  %v2077_v37 = vpop.f32.mrb[231].mxu1  ;;  %v2351_v46 = vshll.u32 %v15565_v3, 16  ;;  %v2355_v60 = vshrl.u32 %v15565_v3, 16 }
 0x2e1   : > { %v5706_v6 = vrot.slane %v17824_v22, 2 }
 0x2e2   : > { %v2185_v7 = vadd.f32 %v15402_v0, %v2146_v31  ;;  %v2353_v58 = vrot.slane %v2351_v46, 1  ;;  %v3066_v59 = vrot.slane %v2355_v60, 1  ;;  %v3067_v24 = vrot.slane %v2351_v46, 2 }
 0x2e3   : > { %v2216_v49 = vmax.f32 %v2184_v20, 0.0  ;;  %v15592_v36 = vor.u32 %v5706_v6, %v5705_v10 }
 0x2e4   : > { %v2217_v2 = vmax.f32 %v2185_v7, 0.0  ;;  %v15582_v62 = vsel %vm2294_vm3, %v2349_v41, %v2353_v58  ;;  %v3068_v63 = vor.u32 %v3067_v24, %v3066_v59  ;;  %v2357_v37 = vor.u32 %v2355_v60, %v2353_v58  ;;  %v15602_v41 = vld [vmem:[#allocation2 + $0x20] sm:$0xff] }
 0x2e5   : > { %v2080_v42 = vpop.f32.mrb[232].mxu1  ;;  %12473 = vmatprep.mubr.msk.bf16.mxu1 %vm2246_vm2, %v15582_v62  ;;  %17955 = vst [vmem:[#allocation8_spill] sm:$0xff] %v15592_v36  ;;  %17956 = vst [vmem:[#allocation3_spill] sm:$0xff] %v15602_v41  ;;  %v17819_v60 = vshrl.u32 %v15602_v41, 16 }
 0x2e6   : > { %v2239_v15 = vpack.c.bf16 %v2217_v2, %v2216_v49  ;;  %v2147_v52 = vmax.f32 %v15330_v45, %v2080_v42  ;;  %v2082_v1 = vpop.f32.mrb[233].mxu1  ;;  %v15590_v8 = vsel %vm3033_vm4, %v3064_v44, %v3068_v63  ;;  %v17820_v2 = vshll.u32 %v15602_v41, 16 }
 0x2e7   : > { %v15587_v26 = vld [vmem:[#allocation2 + $0x40] sm:$0xff]  ;;  %v2083_v4 = vpop.f32.mrb[234].mxu1  ;;  %12569 = vmatprep.mubr.msk.bf16.mxu0 %vm2246_vm2, %v15590_v8 }
 0x2e8   : > { %2256 = vst.msk [vmem:[#allocation2 + $0x48] sm:$0xff] %vm2246_vm2, %v2239_v15  ;;  %v2186_v30 = vadd.f32 %v15402_v0, %v2147_v52  ;;  %v2359_v13 = vshll.u32 %v15587_v26, 16  ;;  %v2148_v20 = vmax.f32 %v15335_v19, %v2083_v4  ;;  %v2085_v45 = vpop.f32.mrb[235].mxu1  ;;  %v2363_v31 = vshrl.u32 %v15587_v26, 16 }
 0x2ea   : > { %v2361_v46 = vrot.slane %v2359_v13, 1  ;;  %v2187_v44 = vadd.f32 %v15402_v0, %v2148_v20  ;;  %v3070_v7 = vrot.slane %v2363_v31, 1  ;;  %v3071_v59 = vrot.slane %v2359_v13, 2 }
 0x2eb   : > { %v2218_v24 = vmax.f32 %v2186_v30, 0.0 }
 0x2ec   : > { %v15605_v10 = vsel %vm2294_vm3, %v2357_v37, %v2361_v46  ;;  %v2219_v6 = vmax.f32 %v2187_v44, 0.0  ;;  %v3072_v49 = vor.u32 %v3071_v59, %v3070_v7  ;;  %v5710_v37 = vrot.slane %v17820_v2, 2 }
 0x2ed   : > { %v2088_v19 = vpop.f32.mrb[236].mxu1  ;;  %12474 = vmatmul.mubr.msk.bf16.gmra.mrb[12].mxu1 %vm2246_vm2, %v15605_v10  ;;  %v2365_v7 = vor.u32 %v2363_v31, %v2361_v46 }
 0x2ee   : > { %v2240_v58 = vpack.c.bf16 %v2219_v6, %v2218_v24  ;;  %v2149_v42 = vmax.f32 %v15340_v29, %v2088_v19  ;;  %v2090_v15 = vpop.f32.mrb[237].mxu1  ;;  %v15613_v1 = vsel %vm3033_vm4, %v3068_v63, %v3072_v49  ;;  %v5709_v63 = vrot.slane %v17819_v60, 1 }
 0x2ef   : > { %v2091_v52 = vpop.f32.mrb[238].mxu1  ;;  %17957 = vst [vmem:[#allocation9_spill] sm:$0xff] %v15613_v1  ;;  %v15615_v4 = vld [vmem:[#allocation2 + $0x48] sm:$0xff]  ;;  %12570 = vmatmul.mubr.msk.bf16.gmra.mrb[12].mxu0 %vm2246_vm2, %v15613_v1 }
 0x2f0   : > { %2257 = vst.msk [vmem:[#allocation2 + $0x50] sm:$0xff] %vm2246_vm2, %v2240_v58  ;;  %v2188_v30 = vadd.f32 %v15402_v0, %v2149_v42  ;;  %v2150_v13 = vmax.f32 %v15345_v32, %v2091_v52  ;;  %v2093_v20 = vpop.f32.mrb[239].mxu1  ;;  %v2367_v45 = vshll.u32 %v15615_v4, 16  ;;  %v2371_v29 = vshrl.u32 %v15615_v4, 16  ;;  %v15629_v32 = vld [vmem:[#allocation2 + $0x28] sm:$0xff] }
 0x2f1   : > { %17958 = vst [vmem:[#allocation4_spill] sm:$0xff] %v15629_v32  ;;  %v17822_v20 = vshrl.u32 %v15629_v32, 16  ;;  %v15637_v60 = vor.u32 %v5710_v37, %v5709_v63 }
 0x2f2   : > { %v2189_v44 = vadd.f32 %v15402_v0, %v2150_v13  ;;  %v2369_v59 = vrot.slane %v2367_v45, 1  ;;  %v3074_v24 = vrot.slane %v2371_v29, 1  ;;  %v3075_v6 = vrot.slane %v2367_v45, 2 }
 0x2f3   : > { %v2220_v19 = vmax.f32 %v2188_v30, 0.0  ;;  %17959 = vst [vmem:[#allocation10_spill] sm:$0xff] %v15637_v60  ;;  %v17823_v45 = vshll.u32 %v15629_v32, 16 }
 0x2f4   : > { %v2221_v58 = vmax.f32 %v2189_v44, 0.0  ;;  %v15632_v42 = vsel %vm2294_vm3, %v2365_v7, %v2369_v59  ;;  %v3076_v52 = vor.u32 %v3075_v6, %v3074_v24 }
 0x2f5   : > { %v2096_v15 = vpop.f32.mrb[240].mxu1  ;;  %12477 = vmatprep.mubr.msk.bf16.mxu1 %vm2246_vm2, %v15632_v42 }
 0x2f6   : > { %v2241_v31 = vpack.c.bf16 %v2221_v58, %v2220_v19  ;;  %v2151_v46 = vmax.f32 %v15356_v48, %v2096_v15  ;;  %v2098_v13 = vpop.f32.mrb[241].mxu1  ;;  %v15644_v7 = vsel %vm3033_vm4, %v3072_v49, %v3076_v52  ;;  %v2373_v19 = vor.u32 %v2371_v29, %v2369_v59 }
 0x2f7   : > { %v15641_v30 = vld [vmem:[#allocation2 + $0x50] sm:$0xff]  ;;  %v2099_v44 = vpop.f32.mrb[242].mxu1  ;;  %17960 = vst [vmem:[#allocation5_spill] sm:$0xff] %v15644_v7  ;;  %12573 = vmatprep.mubr.msk.bf16.mxu0 %vm2246_vm2, %v15644_v7  ;;  %v5713_v58 = vrot.slane %v17822_v20, 1 }
 0x2f8   : > { %2258 = vst.msk [vmem:[#allocation2 + $0x58] sm:$0xff] %vm2246_vm2, %v2241_v31  ;;  %v2190_v24 = vadd.f32 %v15402_v0, %v2151_v46  ;;  %v2375_v6 = vshll.u32 %v15641_v30, 16  ;;  %v2152_v63 = vmax.f32 %v15361_v11, %v2099_v44  ;;  %v2101_v48 = vpop.f32.mrb[243].mxu1  ;;  %v2379_v37 = vshrl.u32 %v15641_v30, 16  ;;  %v15656_v13 = vld [vmem:[#allocation2 + $0x30] sm:$0xff] }
 0x2f9   : > { %17961 = vst [vmem:[#allocation11_spill] sm:$0xff] %v15656_v13  ;;  %v5714_v46 = vrot.slane %v17823_v45, 2 }
 0x2fa   : > { %v2377_v49 = vrot.slane %v2375_v6, 1  ;;  %v2191_v15 = vadd.f32 %v15402_v0, %v2152_v63  ;;  %v3078_v31 = vrot.slane %v2379_v37, 1  ;;  %v3079_v11 = vrot.slane %v2375_v6, 2 }
 0x2fb   : > { %v2222_v44 = vmax.f32 %v2190_v24, 0.0  ;;  %v15669_v63 = vsel %vm3033_vm4, %v15592_v36, %v15637_v60  ;;  %v15673_v45 = vor.u32 %v5714_v46, %v5713_v58 }
 0x2fc   : > { %v15661_v2 = vsel %vm2294_vm3, %v2373_v19, %v2377_v49  ;;  %v2223_v48 = vmax.f32 %v2191_v15, 0.0  ;;  %v3080_v29 = vor.u32 %v3079_v11, %v3078_v31  ;;  %17962 = vst [vmem:[#allocation6_spill] sm:$0xff] %v15669_v63  ;;  %v17828_v19 = vshll.u32 %v15656_v13, 16 }
 0x2fd   : > { %v2104_v27 = vpop.f32.mrb[244].mxu1  ;;  %12478 = vmatmul.mubr.msk.bf16.gmra.mrb[16].mxu1 %vm2246_vm2, %v15661_v2  ;;  %v2381_v46 = vor.u32 %v2379_v37, %v2377_v49 }
 0x2fe   : > { %v2242_v20 = vpack.c.bf16 %v2223_v48, %v2222_v44  ;;  %v2153_v6 = vmax.f32 %v15366_v54, %v2104_v27  ;;  %v2106_v24 = vpop.f32.mrb[245].mxu1  ;;  %v15676_v22 = vsel %vm3033_vm4, %v3076_v52, %v3080_v29  ;;  %v17964_v52 = vshrl.u32 %v15656_v13, 16  ;;  %v3308_v13 = vld [vmem:[#allocation2] sm:$0xfc] }
 0x2ff   : > { %v2107_v15 = vpop.f32.mrb[246].mxu1  ;;  %17963 = vst [vmem:[#allocation12_spill] sm:$0xff] %v15676_v22  ;;  %v15678_v31 = vld [vmem:[#allocation2 + $0x58] sm:$0xff]  ;;  %12574 = vmatmul.mubr.msk.bf16.gmra.mrb[16].mxu0 %vm2246_vm2, %v15676_v22 }
 0x300   : > { %2259 = vst.msk [vmem:[#allocation2 + $0x60] sm:$0xff] %vm2246_vm2, %v2242_v20  ;;  %v2192_v11 = vadd.f32 %v15402_v0, %v2153_v6  ;;  %v2154_v59 = vmax.f32 %v15371_v53, %v2107_v15  ;;  %v2109_v54 = vpop.f32.mrb[247].mxu1  ;;  %v2383_v27 = vshll.u32 %v15678_v31, 16  ;;  %v2387_v58 = vshrl.u32 %v15678_v31, 16 }
 0x301   : > { %v5717_v44 = vrot.slane %v17964_v52, 1  ;;  %v5718_v6 = vrot.slane %v17828_v19, 2  ;;  %v17965_v15 = vshll.u32 %v15557_v9, 16 }
 0x302   : > { %v2193_v48 = vadd.f32 %v15402_v0, %v2154_v59  ;;  %v2385_v24 = vrot.slane %v2383_v27, 1  ;;  %v3082_v20 = vrot.slane %v2387_v58, 1  ;;  %v3083_v53 = vrot.slane %v2383_v27, 2 }
 0x303   : > { %v15694_v63 = vrot.slane %v17965_v15, 1  ;;  %v2224_v54 = vmax.f32 %v2192_v11, 0.0  ;;  %v15706_v59 = vsel %vm3033_vm4, %v15637_v60, %v15673_v45  ;;  %v15709_v11 = vor.u32 %v5718_v6, %v5717_v44 }
 0x304   : > { %v2225_v36 = vmax.f32 %v2193_v48, 0.0  ;;  %v15697_v32 = vsel %vm2294_vm3, %v2381_v46, %v2385_v24  ;;  %v15701_v49 = vor.u32 %v3083_v53, %v3082_v20  ;;  %17967 = vst [vmem:[#allocation7_spill] sm:$0xff] %v15706_v59  ;;  %v17969_v60 = vshrl.u32 %v15557_v9, 16 }
 0x305   : > { %17966 = vst [vmem:[#allocation13_spill] sm:$0xff] %v15694_v63  ;;  %v2112_v37 = vpop.f32.mrb[248].mxu1  ;;  %12481 = vmatprep.mubr.msk.bf16.mxu1 %vm2246_vm2, %v15697_v32 }
 0x306   : > { %v2243_v27 = vpack.c.bf16 %v2225_v36, %v2224_v54  ;;  %v2155_v52 = vmax.f32 %v15381_v51, %v2112_v37  ;;  %v2114_v15 = vpop.f32.mrb[249].mxu1  ;;  %v15715_v19 = vsel %vm3033_vm4, %v3080_v29, %v15701_v49  ;;  %v15724_v36 = vor.u32 %v17969_v60, %v15694_v63 }
 0x307   : > { %v15711_v48 = vld [vmem:[#allocation2 + $0x60] sm:$0x1]  ;;  %v2115_v46 = vpop.f32.mrb[250].mxu1  ;;  %17968 = vst [vmem:[#allocation14_spill] sm:$0xff] %v15715_v19  ;;  %12577 = vmatprep.mubr.msk.bf16.mxu0 %vm2246_vm2, %v15715_v19  ;;  %v15735_v60 = vor.u32 %v2387_v58, %v2385_v24 }
 0x308   : > { %v15717_v20 = vld [vmem:[#allocation2 + $0x60] sm:$0x3]  ;;  %17970 = vst [vmem:[#allocation15_spill] sm:$0xff] %v15724_v36  ;;  %2260 = vst.msk [vmem:[#allocation2 + $0x68] sm:$0xff] %vm2246_vm2, %v2243_v27  ;;  %v2194_v51 = vadd.f32 %v15402_v0, %v2155_v52  ;;  %v2391_v44 = vshll.u32 %v15711_v48, 16  ;;  %v2156_v6 = vmax.f32 %v15387_v16, %v2115_v46  ;;  %v2117_v29 = vpop.f32.mrb[251].mxu1 }
 0x309   : > { %v15719_v53 = vld [vmem:[#allocation2 + $0x60] sm:$0xff]  ;;  %v3087_v54 = vshrl.u32 %v15717_v20, 16  ;;  %v3090_v37 = vshll.u32 %v15717_v20, 16  ;;  %v3322_v16 = vrot.slane %v15422_v38, 2 }
 0x30a   : > { %v17837_v9 = vshll.u32 %v15719_v53, 16  ;;  %v2393_v15 = vrot.slane %v2391_v44, 1  ;;  %v2195_v27 = vadd.f32 %v15402_v0, %v2156_v6  ;;  %v2226_v46 = vmax.f32 %v2194_v51, 0.0 }
 0x30b   : > { %v3089_v52 = vrot.slane %v3087_v54, 1  ;;  %v3092_v59 = vrot.slane %v3090_v37, 2  ;;  %v17836_v41 = vshrl.u32 %v15719_v53, 16  ;;  %v3321_v51 = vrot.slane %v3308_v13, 2  ;;  %v15748_v37 = vld [vmem:[#allocation2 + $0x38] sm:$0xff] }
 0x30c   : > { %v2394_v29 = vsel %vm2294_vm3, %v15735_v60, %v2393_v15  ;;  %v2227_v36 = vmax.f32 %v2195_v27, 0.0  ;;  %v4404_v24 = vrot.slane %v17837_v9, 2  ;;  %17971 = vst [vmem:[#allocation16_spill] sm:$0xff] %v15748_v37 }
 0x30d   : > { %v2120_v63 = vpop.f32.mrb[252].mxu1  ;;  %12482 = vmatmul.mubr.msk.bf16.gmra.mrb[20].mxu1 %vm2246_vm2, %v2394_v29  ;;  %v3093_v58 = vor.u32 %v3092_v59, %v3089_v52  ;;  %v4403_v59 = vrot.slane %v17836_v41, 1  ;;  %v15754_v52 = vld [vmem:[#allocation2 + $0x40] sm:$0xff]  ;;  %v17838_v29 = vshrl.u32 %v15748_v37, 16 }
 0x30e   : > { %v2244_v44 = vpack.c.bf16 %v2227_v36, %v2226_v46  ;;  %v2157_v6 = vmax.f32 %v15392_v40, %v2120_v63  ;;  %v2122_v54 = vpop.f32.mrb[253].mxu1  ;;  %12493 = vmatprep.mubr.msk.bf16.mxu1 %vm2246_vm2, %v15414_v17  ;;  %17972 = vst [vmem:[#allocation17_spill] sm:$0xff] %v15754_v52  ;;  %v3323_v17 = vsel %vm3320_vm5, %v3321_v51, %v3322_v16  ;;  %v15761_v36 = vld [vmem:[#allocation2 + $0x48] sm:$0xff] }
 0x30f   : > { %v2123_v15 = vpop.f32.mrb[254].mxu1  ;;  %v3094_v27 = vsel %vm3033_vm4, %v15701_v49, %v3093_v58  ;;  %17973 = vst [vmem:[#allocation18_spill] sm:$0xff] %v15761_v36  ;;  %v15764_v46 = vor.u32 %v4404_v24, %v4403_v59  ;;  %v15773_v54 = vrot.slane %v15434_v57, 2  ;;  %v14332_v51 = vld [vmem:[%s17795_s3 + $0x48] sm:$0xff]  }
 0x310   : > { %2261 = vst.msk [vmem:[#allocation2 + $0x70] sm:$0xff] %vm2246_vm2, %v2244_v44  ;;  %v2196_v40 = vadd.f32 %v15402_v0, %v2157_v6  ;;  %v2158_v63 = vmax.f32 %v15397_v50, %v2123_v15  ;;  %12578 = vmatmul.mubr.msk.bf16.gmra.mrb[20].mxu0 %vm2246_vm2, %v3094_v27  ;;  %v2125_v13 = vpop.f32.mrb[255].mxu1  ;;  %v17840_v44 = vshll.u32 %v15748_v37, 16  ;;  %v17839_v6 = vshrl.u32 %v15754_v52, 16  ;;  %v15770_v50 = vld [vmem:[#allocation2 + $0x50] sm:$0xff]  ;;  %v15785_v27 = vld [vmem:[#allocation2 + $0x58] sm:$0xff] }
 0x311   : > { %12589 = vmatprep.mubr.msk.bf16.mxu0 %vm2246_vm2, %v3323_v17  ;;  %17974 = vst [vmem:[#allocation19_spill] sm:$0xff] %v15764_v46  ;;  %17975 = vst [vmem:[#allocation20_spill] sm:$0xff] %v15770_v50  ;;  %v15781_v24 = vsel %vm3033_vm4, %v15701_v49, %v15764_v46  ;;  %v3326_v17 = vrot.slane %v15461_v33, 2  ;;  %v15791_v41 = vld [vmem:[#allocation2 + $0x68] sm:$0xff]  ;;  %v15798_v15 = vsel %vm3033_vm4, %v15673_v45, %v15709_v11  ;;  %v17981_v49 = vshrl.u32 %v15761_v36, 16 }
 0x312   : > { %v2197_v58 = vadd.f32 %v15402_v0, %v2158_v63  ;;  %17976 = vst [vmem:[#allocation21_spill] sm:$0xff] %v15773_v54  ;;  %17977 = vst [vmem:[#allocation22_spill] sm:$0xff] %v15781_v24  ;;  %v17841_v0 = vshll.u32 %v15754_v52, 16  ;;  %v2228_v59 = vmax.f32 %v2196_v40, 0.0  ;;  %v5721_v40 = vrot.slane %v17838_v29, 1 }
 0x313   : > { %17978 = vst [vmem:[#allocation23_spill] sm:$0xff] %v15785_v27  ;;  %17979 = vst [vmem:[#allocation24_spill] sm:$0xff] %v15791_v41  ;;  %v5722_v9 = vrot.slane %v17840_v44, 2  ;;  %v5725_v45 = vrot.slane %v17839_v6, 1  ;;  %v5729_v13 = vrot.slane %v17981_v49, 1  ;;  %v17983_v49 = vshll.u32 %v15761_v36, 16 }
 0x314   : > { %v2229_v63 = vmax.f32 %v2197_v58, 0.0  ;;  %17980 = vst [vmem:[#allocation25_spill] sm:$0xff] %v15798_v15  ;;  %v3328_v52 = vrot.slane %v15490_v28, 2  ;;  %v14330_v6 = vld [vmem:[%s17795_s3 + $0xb0] sm:$0xff]   ;;  %v17985_v44 = vshll.u32 %v15770_v50, 16 }
 0x315   : > { %12494 = vmatmul.mubr.msk.bf16.vlgmr.msra.gmra.mrb[0].mxu1 %vm2246_vm2, %v15422_v38  ;;  %v14329_v38 = vld [vmem:[%s17795_s3 + $0xa8] sm:$0xff]  }
 0x316   : > { %v2245_v58 = vpack.c.bf16 %v2229_v63, %v2228_v59  ;;  %12497 = vmatprep.mubr.msk.bf16.mxu1 %vm2246_vm2, %v15434_v57  ;;  %12518 = vmatpush3.bf16.msra.mxu1 %v15499_v34  ;;  %v3325_v59 = vsel %vm3320_vm5, %v3322_v16, %v15773_v54  ;;  %v14333_v63 = vld [vmem:[%s17795_s3 + $0x50] sm:$0xff]   ;;  %v5726_v34 = vrot.slane %v17841_v0, 2  ;;  %v15827_v16 = vsel %vm3320_vm5, %v15773_v54, %v3326_v17 }
 0x317   : > { %12519 = vmatprep.subr.bf16.mxu1 %v14332_v51  ;;  %17982 = vst [vmem:[#allocation26_spill] sm:$0xff] %v15827_v16  ;;  %v5723_v0 = vor.u32 %v5722_v9, %v5721_v40  ;;  %v5734_v37 = vrot.slane %v17985_v44, 2  ;;  %v14335_v44 = vld [vmem:[%s17795_s3 + $0x58] sm:$0xff]   ;;  %v16066_v54 = vld [vmem:[#allocation2 + $0x10] sm:$0xff] }
 0x318   : > { %2262 = vst.msk [vmem:[#allocation2 + $0x78] sm:$0xff] %vm2246_vm2, %v2245_v58  ;;  %12590 = vmatmul.mubr.msk.bf16.vlgmr.msra.gmra.mrb[0].mxu0 %vm2246_vm2, %v3325_v59  ;;  %v5727_v29 = vor.u32 %v5726_v34, %v5725_v45  ;;  %v5730_v58 = vrot.slane %v17983_v49, 2  ;;  %v17984_v59 = vshrl.u32 %v15770_v50, 16  ;;  %v17989_v49 = vshll.u32 %v15785_v27, 16  ;;  %18020 = vst [vmem:[#allocation53_spill] sm:$0xff] %v16066_v54 }
 0x319   : > { %12593 = vmatprep.mubr.msk.bf16.mxu0 %vm2246_vm2, %v15827_v16  ;;  %12614 = vmatpush3.bf16.msra.mxu0 %v15512_v55  ;;  %v17986_v55 = vshrl.u32 %v15785_v27, 16  ;;  %v15848_v40 = vsel %vm3033_vm4, %v15709_v11, %v5723_v0  ;;  %v17991_v11 = vshll.u32 %v15791_v41, 16  ;;  %v16008_v27 = vld [vmem:[#allocation2 + $0x28] sm:$0xff] }
 0x31a   : > { %v5733_v15 = vrot.slane %v17984_v59, 1  ;;  %12615 = vmatprep.subr.bf16.mxu0 %v14329_v38  ;;  %12520 = vmatpush3.bf16.msra.mxu1 %v14332_v51  ;;  %17987 = vst [vmem:[#allocation27_spill] sm:$0xff] %v15848_v40  ;;  %v15851_v45 = vsel %vm3033_vm4, %v5723_v0, %v5727_v29  ;;  %v5731_v34 = vor.u32 %v5730_v58, %v5729_v13  ;;  %v5738_v59 = vrot.slane %v17989_v49, 2 }
 0x31b   : > { %v5737_v9 = vrot.slane %v17986_v55, 1  ;;  %12521 = vmatprep.subr.bf16.mxu1 %v14333_v63  ;;  %17988 = vst [vmem:[#allocation28_spill] sm:$0xff] %v15851_v45  ;;  %v3330_v51 = vrot.slane %v15525_v5, 2  ;;  %v17990_v55 = vshrl.u32 %v15791_v41, 16  ;;  %v5746_v40 = vrot.slane %v17991_v11, 2  ;;  %v16027_v41 = vld [vmem:[#allocation2 + $0x48] sm:$0xff] }
 0x31c   : > { %v5735_v50 = vor.u32 %v5734_v37, %v5733_v15  ;;  %v15866_v0 = vsel %vm3033_vm4, %v5727_v29, %v5731_v34  ;;  %v14334_v37 = vld [vmem:[%s17795_s3 + $0xb8] sm:$0xff]   ;;  %v15879_v49 = vsel %vm3320_vm5, %v3326_v17, %v3328_v52  ;;  %v3332_v17 = vrot.slane %v15541_v35, 2  ;;  %18011 = vst [vmem:[#allocation48_spill] sm:$0xff] %v16027_v41 }
 0x31d   : > { %v5745_v36 = vrot.slane %v17990_v55, 1  ;;  %12498 = vmatmul.mubr.msk.bf16.gmra.mrb[4].mxu1 %vm2246_vm2, %v15461_v33  ;;  %12616 = vmatpush3.bf16.msra.mxu0 %v14329_v38  ;;  %17992 = vst [vmem:[#allocation29_spill] sm:$0xff] %v15866_v0  ;;  %v5739_v13 = vor.u32 %v5738_v59, %v5737_v9  ;;  %17995 = vst [vmem:[#allocation32_spill] sm:$0xff] %v15879_v49  ;;  %v15891_v9 = vsel %vm3320_vm5, %v3328_v52, %v3330_v51 }
 0x31e   : > { %12501 = vmatprep.mubr.msk.bf16.mxu1 %vm2246_vm2, %v15490_v28  ;;  %12617 = vmatprep.subr.bf16.mxu0 %v14330_v6  ;;  %v15874_v15 = vsel %vm3033_vm4, %v5731_v34, %v5735_v50  ;;  %17998 = vst [vmem:[#allocation35_spill] sm:$0xff] %v15891_v9  ;;  %v3334_v52 = vrot.slane %v15565_v3, 2  ;;  %v2790_v45 = vrot.slane %v15461_v33, 1 }
 0x31f   : > { %17993 = vst [vmem:[#allocation30_spill] sm:$0xff] %v15874_v15  ;;  %v15876_v58 = vor.u32 %v5746_v40, %v5745_v36  ;;  %12522 = vmatpush3.bf16.msra.mxu1 %v14333_v63  ;;  %v15882_v29 = vsel %vm3033_vm4, %v5735_v50, %v5739_v13  ;;  %v15886_v38 = vsel %vm3033_vm4, %v5739_v13, %v15764_v46  ;;  %v15903_v50 = vld [vmem:[%s17795_s3 + $0xc0] sm:$0xff]  }
 0x320   : > { %17996 = vst [vmem:[#allocation33_spill] sm:$0xff] %v15882_v29  ;;  %17997 = vst [vmem:[#allocation34_spill] sm:$0xff] %v15886_v38  ;;  %12594 = vmatmul.mubr.msk.bf16.gmra.mrb[4].mxu0 %vm2246_vm2, %v15879_v49  ;;  %12523 = vmatprep.subr.bf16.mxu1 %v14335_v44  ;;  %v15910_v63 = vld [vmem:[#allocation2 + $0x60] sm:$0xff]  ;;  %v15918_v40 = vsel %vm3320_vm5, %v3330_v51, %v3332_v17  ;;  %v15923_v34 = vsel %vm3320_vm5, %v3332_v17, %v3334_v52  ;;  %v3336_v51 = vrot.slane %v15587_v26, 2 }
 0x321   : > { %17994 = vst [vmem:[#allocation31_spill] sm:$0xff] %v15876_v58  ;;  %v15896_v36 = vsel %vm3033_vm4, %v15764_v46, %v15876_v58  ;;  %12597 = vmatprep.mubr.msk.bf16.mxu0 %vm2246_vm2, %v15891_v9  ;;  %12618 = vmatpush3.bf16.msra.mxu0 %v14330_v6  ;;  %v15915_v6 = vld [vmem:[#allocation2 + $0x70] sm:$0xff]  ;;  %18000 = vst [vmem:[#allocation37_spill] sm:$0xff] %v15918_v40  ;;  %v17855_v59 = vshrl.u32 %v15910_v63, 16  ;;  %v18019_v49 = vshll.u32 %v16008_v27, 16 }
 0x322   : > { %17999 = vst [vmem:[#allocation36_spill] sm:$0xff] %v15896_v36  ;;  %12619 = vmatprep.subr.bf16.mxu0 %v14334_v37  ;;  %18001 = vst [vmem:[#allocation38_spill] sm:$0xff] %v15923_v34  ;;  %v17858_v55 = vshll.u32 %v15915_v6, 16  ;;  %v17857_v11 = vshrl.u32 %v15915_v6, 16  ;;  %v15946_v29 = vsel %vm3320_vm5, %v3334_v52, %v3336_v51  ;;  %v15975_v52 = vrot.slane %v15678_v31, 2 }
 0x323   : > { %12524 = vmatpush3.bf16.msra.mxu1 %v14335_v44  ;;  %v17856_v44 = vshll.u32 %v15910_v63, 16  ;;  %18002 = vst [vmem:[#allocation39_spill] sm:$0xff] %v15946_v29  ;;  %v8390_v16 = vrot.slane %v18019_v49, 2 }
 0x324   : > { %9014 = vmatprep.subr.bf16.mxu1 %v17913_v23  ;;  %v7079_v23 = vrot.slane %v17855_v59, 1  ;;  %v7087_v36 = vrot.slane %v17857_v11, 1  ;;  %v7088_v38 = vrot.slane %v17858_v55, 2  ;;  %18007 = vst [vmem:[#allocation44_spill] sm:$0xff] %v15975_v52 }
 0x325   : > { %12502 = vmatmul.mubr.msk.bf16.gmra.mrb[8].mxu1 %vm2246_vm2, %v15525_v5  ;;  %12620 = vmatpush3.bf16.msra.mxu0 %v14334_v37  ;;  %v3338_v37 = vrot.slane %v15615_v4, 2  ;;  %v7080_v17 = vrot.slane %v17856_v44, 2 }
 0x326   : > { %12505 = vmatprep.mubr.msk.bf16.mxu1 %vm2246_vm2, %v15541_v35  ;;  %12645 = vmatprep.subr.bf16.mxu0 %v15903_v50  ;;  %v15950_v59 = vor.u32 %v7088_v38, %v7087_v36  ;;  %v3340_v36 = vrot.slane %v15641_v30, 2 }
 0x327   : > { %v15948_v15 = vor.u32 %v7080_v17, %v7079_v23  ;;  %v15955_v44 = vsel %vm3320_vm5, %v3336_v51, %v3338_v37  ;;  %v14492_v17 = vld [vmem:[#allocation2 + $0x8] sm:$0xff] }
 0x328   : > { %12598 = vmatmul.mubr.msk.bf16.gmra.mrb[8].mxu0 %vm2246_vm2, %v15918_v40  ;;  %18003 = vst [vmem:[#allocation40_spill] sm:$0xff] %v15955_v44  ;;  %v15971_v38 = vsel %vm3033_vm4, %v15876_v58, %v15950_v59  ;;  %v15988_v51 = vsel %vm3320_vm5, %v3340_v36, %v15975_v52  ;;  %v2786_v55 = vrot.slane %v14492_v17, 1  ;;  %v18018_v40 = vshrl.u32 %v16008_v27, 16 }
 0x329   : > { %12601 = vmatprep.mubr.msk.bf16.mxu0 %vm2246_vm2, %v15923_v34  ;;  %v15961_v11 = vsel %vm3033_vm4, %v5739_v13, %v15948_v15  ;;  %v15966_v23 = vsel %vm3033_vm4, %v15948_v15, %v15876_v58  ;;  %18006 = vst [vmem:[#allocation43_spill] sm:$0xff] %v15971_v38  ;;  %v15982_v13 = vsel %vm3320_vm5, %v3338_v37, %v3340_v36  ;;  %18009 = vst [vmem:[#allocation46_spill] sm:$0xff] %v15988_v51  ;;  %v14493_v38 = vld [vmem:[#allocation2] sm:$0xfe]  ;;  %v16000_v36 = vld [vmem:[#allocation2 + $0x30] sm:$0xff] }
 0x32a   : > { %18004 = vst [vmem:[#allocation41_spill] sm:$0xff] %v15961_v11  ;;  %18005 = vst [vmem:[#allocation42_spill] sm:$0xff] %v15966_v23  ;;  %v2785_v23 = vrot.slane %v14493_v38, 1  ;;  %v3344_v11 = vrot.slane %v15717_v20, 2  ;;  %v15997_v58 = vrot.slane %v15434_v57, 1  ;;  %v2792_v38 = vrot.slane %v15490_v28, 1 }
 0x32b   : > { %18008 = vst [vmem:[#allocation45_spill] sm:$0xff] %v15982_v13  ;;  %v16011_v57 = vld [vmem:[#allocation2 + $0x38] sm:$0xff]  ;;  %v8389_v9 = vrot.slane %v18018_v40, 1 }
 0x32c   : > { %v2787_v37 = vsel %vm2784_vm6, %v2785_v23, %v2786_v55  ;;  %v3345_v0 = vsel %vm3320_vm5, %v15975_v52, %v3344_v11  ;;  %v16016_v11 = vld [vmem:[#allocation2 + $0x40] sm:$0xff]  ;;  %v16020_v28 = vsel %vm2784_vm6, %v15997_v58, %v2790_v45  ;;  %v16029_v52 = vld [vmem:[#allocation2 + $0x50] sm:$0xff]  ;;  %v18013_v23 = vrot.slane %v15525_v5, 1 }
 0x32d   : > { %12506 = vmatmul.mubr.msk.bf16.gmra.mrb[12].mxu1 %vm2246_vm2, %v15565_v3  ;;  %18010 = vst [vmem:[#allocation47_spill] sm:$0xff] %v16016_v11  ;;  %18012 = vst [vmem:[#allocation49_spill] sm:$0xff] %v16029_v52  ;;  %v18030_v7 = vshll.u32 %v16029_v52, 16 }
 0x32e   : > { %12509 = vmatprep.mubr.msk.bf16.mxu1 %vm2246_vm2, %v15587_v26 }
 0x32f   : > { %v8410_v1 = vrot.slane %v18030_v7, 2 }
 0x330   : > { %12602 = vmatmul.mubr.msk.bf16.gmra.mrb[12].mxu0 %vm2246_vm2, %v15946_v29 }
 0x331   : > { %12605 = vmatprep.mubr.msk.bf16.mxu0 %vm2246_vm2, %v15955_v44  ;;  %v16039_v44 = vld [vmem:[#allocation2 + $0x58] sm:$0xff] }
 0x332   : > { %18014 = vst [vmem:[#allocation50_spill] sm:$0xff] %v16039_v44  ;;  %v18034_v7 = vshll.u32 %v16039_v44, 16 }
 0x334   : > { %v8414_v40 = vrot.slane %v18034_v7, 2 }
 0x335   : > { %12510 = vmatmul.mubr.msk.bf16.gmra.mrb[16].mxu1 %vm2246_vm2, %v15615_v4 }
 0x336   : > { %12513 = vmatprep.mubr.msk.bf16.mxu1 %vm2246_vm2, %v15641_v30 }
 0x338   : > { %12606 = vmatmul.mubr.msk.bf16.gmra.mrb[16].mxu0 %vm2246_vm2, %v15982_v13  ;;  %v14337_v13 = vld [vmem:[%s17795_s3 + $0xc8] sm:$0xff]  }
 0x339   : > { %12609 = vmatprep.mubr.msk.bf16.mxu0 %vm2246_vm2, %v15988_v51  ;;  %v18023_v51 = vshll.u32 %v16011_v57, 16 }
 0x33b   : > { %v8398_v46 = vrot.slane %v18023_v51, 2 }
 0x33d   : > { %12514 = vmatmul.mubr.msk.bf16.gmra.mrb[20].mxu1 %vm2246_vm2, %v15678_v31 }
 0x33e   : > { %12525 = vmatprep.mubr.msk.bf16.mxu1 %vm2246_vm2, %v2787_v37  ;;  %v2789_v37 = vsel %vm2784_vm6, %v2786_v55, %v15997_v58  ;;  %v16034_v55 = vsel %vm2784_vm6, %v2792_v38, %v18013_v23  ;;  %v16047_v23 = vld [vmem:[#allocation2 + $0x68] sm:$0xff] }
 0x33f   : > { %18016 = vst [vmem:[#allocation51_spill] sm:$0xff] %v16047_v23 }
 0x340   : > { %12610 = vmatmul.mubr.msk.bf16.gmra.mrb[20].mxu0 %vm2246_vm2, %v3345_v0  ;;  %v16023_v0 = vsel %vm2784_vm6, %v2790_v45, %v2792_v38  ;;  %v16054_v45 = vld [vmem:[#allocation2 + $0x78] sm:$0xff]  ;;  %v18022_v38 = vshrl.u32 %v16011_v57, 16 }
 0x341   : > { %12621 = vmatprep.mubr.msk.bf16.mxu0 %vm2246_vm2, %v14492_v17  ;;  %v18015_v17 = vshrl.u32 %v16000_v36, 16  ;;  %18017 = vst [vmem:[#allocation52_spill] sm:$0xff] %v16054_v45 }
 0x342   : > { %v8397_v20 = vrot.slane %v18022_v38, 1  ;;  %v14338_v38 = vld [vmem:[%s17795_s3 + $0xd0] sm:$0xff]  }
 0x343   : > { %v8393_v29 = vrot.slane %v18015_v17, 1  ;;  %v18021_v17 = vshll.u32 %v16000_v36, 16 }
 0x344   : > { %v8399_v24 = vor.u32 %v8398_v46, %v8397_v20  ;;  %v18033_v20 = vshrl.u32 %v16039_v44, 16 }
 0x345   : > { %12526 = vmatmul.mubr.msk.bf16.vlgmr.msra.gmra.mrb[0].mxu1 %vm2246_vm2, %v2789_v37  ;;  %v8394_v34 = vrot.slane %v18021_v17, 2  ;;  %v18025_v37 = vshrl.u32 %v16016_v11, 16 }
 0x346   : > { %12529 = vmatprep.mubr.msk.bf16.mxu1 %vm2246_vm2, %v16020_v28 }
 0x347   : > { %v8401_v17 = vrot.slane %v18025_v37, 1  ;;  %v8395_v51 = vor.u32 %v8394_v34, %v8393_v29  ;;  %v18029_v37 = vshrl.u32 %v16029_v52, 16 }
 0x348   : > { %12622 = vmatmul.mubr.msk.bf16.vlgmr.msra.gmra.mrb[0].mxu0 %vm2246_vm2, %v16066_v54  ;;  %v16082_v54 = vor.u32 %v8390_v16, %v8389_v9  ;;  %v18028_v16 = vshll.u32 %v16027_v41, 16 }
 0x349   : > { %12625 = vmatprep.mubr.msk.bf16.mxu0 %vm2246_vm2, %v15461_v33  ;;  %12646 = vmatpush3.bf16.msra.mxu0 %v15903_v50  ;;  %v18026_v33 = vshll.u32 %v16016_v11, 16  ;;  %v18027_v50 = vshrl.u32 %v16027_v41, 16  ;;  %v8409_v22 = vrot.slane %v18029_v37, 1  ;;  %v16105_v29 = vsel %vm3033_vm4, %v8395_v51, %v8399_v24 }
 0x34a   : > { %18024 = vst [vmem:[#allocation54_spill] sm:$0xff] %v16082_v54  ;;  %12647 = vmatprep.subr.bf16.mxu0 %v14337_v13  ;;  %v8406_v9 = vrot.slane %v18028_v16, 2  ;;  %v16102_v46 = vsel %vm3033_vm4, %v16082_v54, %v8395_v51  ;;  %18032 = vst [vmem:[#allocation56_spill] sm:$0xff] %v16105_v29  ;;  %v18036_v51 = vshrl.u32 %v16047_v23, 16 }
 0x34b   : > { %v8402_v19 = vrot.slane %v18026_v33, 2  ;;  %v8405_v49 = vrot.slane %v18027_v50, 1  ;;  %18031 = vst [vmem:[#allocation55_spill] sm:$0xff] %v16102_v46  ;;  %v8413_v33 = vrot.slane %v18033_v20, 1  ;;  %v2798_v50 = vrot.slane %v15565_v3, 1 }
 0x34c   : > { %v8411_v37 = vor.u32 %v8410_v1, %v8409_v22  ;;  %v8421_v20 = vrot.slane %v18036_v51, 1  ;;  %v18038_v1 = vshrl.u32 %v16054_v45, 16  ;;  %v18041_v46 = vshll.u32 %v16054_v45, 16 }
 0x34d   : > { %v8403_v34 = vor.u32 %v8402_v19, %v8401_v17  ;;  %12530 = vmatmul.mubr.msk.bf16.gmra.mrb[4].mxu1 %vm2246_vm2, %v16023_v0  ;;  %12648 = vmatpush3.bf16.msra.mxu0 %v14337_v13  ;;  %v8407_v16 = vor.u32 %v8406_v9, %v8405_v49  ;;  %v14339_v19 = vld [vmem:[%s17795_s3 + $0xd8] sm:$0xff]   ;;  %v18037_v13 = vshll.u32 %v16047_v23, 16  ;;  %v8415_v29 = vor.u32 %v8414_v40, %v8413_v33 }
 0x34e   : > { %12533 = vmatprep.mubr.msk.bf16.mxu1 %vm2246_vm2, %v16034_v55  ;;  %12649 = vmatprep.subr.bf16.mxu0 %v14338_v38  ;;  %v8429_v49 = vrot.slane %v18038_v1, 1  ;;  %v18043_v51 = vrot.slane %v15525_v5, 1  ;;  %v8670_v1 = vrot.slane %v16000_v36, 2 }
 0x34f   : > { %v16120_v17 = vsel %vm3033_vm4, %v8399_v24, %v8403_v34  ;;  %v8422_v22 = vrot.slane %v18037_v13, 2  ;;  %v16129_v9 = vsel %vm3033_vm4, %v8403_v34, %v8407_v16  ;;  %v16132_v7 = vsel %vm3033_vm4, %v8407_v16, %v8411_v37  ;;  %v16143_v13 = vld [vmem:[#allocation2 + $0x20] sm:$0xff] }
 0x350   : > { %18035 = vst [vmem:[#allocation57_spill] sm:$0xff] %v16120_v17  ;;  %18039 = vst [vmem:[#allocation58_spill] sm:$0xff] %v16129_v9  ;;  %v8430_v24 = vrot.slane %v18041_v46, 2  ;;  %v18042_v17 = vrot.slane %v15541_v35, 1  ;;  %12626 = vmatmul.mubr.msk.bf16.gmra.mrb[4].mxu0 %vm2246_vm2, %v16143_v13  ;;  %v16150_v40 = vsel %vm3033_vm4, %v8411_v37, %v8415_v29  ;;  %v16154_v46 = vsel %vm3033_vm4, %v8415_v29, %v15948_v15 }
 0x351   : > { %18040 = vst [vmem:[#allocation59_spill] sm:$0xff] %v16132_v7  ;;  %v8423_v34 = vor.u32 %v8422_v22, %v8421_v20  ;;  %12629 = vmatprep.mubr.msk.bf16.mxu0 %vm2246_vm2, %v15525_v5  ;;  %12650 = vmatpush3.bf16.msra.mxu0 %v14338_v38  ;;  %18044 = vst [vmem:[#allocation60_spill] sm:$0xff] %v16150_v40  ;;  %v14340_v5 = vld [vmem:[%s17795_s3 + $0xe0] sm:$0xff]   ;;  %v16167_v38 = vrot.slane %v15910_v63, 2  ;;  %v17885_v22 = vrot.slane %v16008_v27, 2 }
 0x352   : > { %v16141_v54 = vsel %vm2784_vm6, %v18043_v51, %v18042_v17  ;;  %18045 = vst [vmem:[#allocation61_spill] sm:$0xff] %v16154_v46  ;;  %v16156_v33 = vor.u32 %v8430_v24, %v8429_v49  ;;  %v18047_v16 = vmov %v18042_v17  ;;  %12651 = vmatprep.subr.bf16.mxu0 %v14339_v19  ;;  %v8672_v49 = vrot.slane %v16011_v57, 2  ;;  %v18142_v46 = vld [vmem:[#allocation34_spill] sm:$0xff]  ;;  %v5971_v7 = vld [vmem:[#allocation2 + $0x10] sm:$0xfc] }
 0x353   : > { %v16161_v17 = vsel %vm2784_vm6, %v18047_v16, %v2798_v50  ;;  %v16171_v37 = vsel %vm3033_vm4, %v15948_v15, %v8423_v34  ;;  %v16175_v29 = vsel %vm3033_vm4, %v8423_v34, %v15950_v59  ;;  %v16186_v24 = vrot.slane %v15915_v6, 2 }
 0x354   : > { %18046 = vst [vmem:[#allocation62_spill] sm:$0xff] %v16156_v33  ;;  %18048 = vst [vmem:[#allocation63_spill] sm:$0xff] %v16171_v37  ;;  %v16180_v20 = vsel %vm3033_vm4, %v15950_v59, %v16156_v33  ;;  %v8674_v15 = vrot.slane %v16016_v11, 2  ;;  %v8676_v51 = vrot.slane %v16027_v41, 2  ;;  %v8678_v34 = vrot.slane %v16029_v52, 2  ;;  %v14377_v11 = vld [vmem:[%s17795_s3 + $0x208] sm:$0xff]  }
 0x355   : > { %18049 = vst [vmem:[#allocation64_spill] sm:$0xff] %v16175_v29  ;;  %18050 = vst [vmem:[#allocation65_spill] sm:$0xff] %v16180_v20  ;;  %12534 = vmatmul.mubr.msk.bf16.gmra.mrb[8].mxu1 %vm2246_vm2, %v16141_v54  ;;  %12652 = vmatpush3.bf16.msra.mxu0 %v14339_v19  ;;  %v16196_v16 = vsel %vm3320_vm5, %v17885_v22, %v8670_v1  ;;  %v16199_v33 = vsel %vm3320_vm5, %v8670_v1, %v8672_v49  ;;  %v8680_v20 = vrot.slane %v16039_v44, 2 }
 0x356   : > { %18051 = vst [vmem:[#allocation66_spill] sm:$0xff] %v16196_v16  ;;  %18052 = vst [vmem:[#allocation67_spill] sm:$0xff] %v16199_v33  ;;  %v8684_v29 = vrot.slane %v16047_v23, 2  ;;  %12537 = vmatprep.mubr.msk.bf16.mxu1 %vm2246_vm2, %v16161_v17  ;;  %12677 = vmatprep.subr.bf16.mxu0 %v14340_v5  ;;  %v16206_v37 = vsel %vm3320_vm5, %v8672_v49, %v8674_v15  ;;  %v16209_v19 = vsel %vm3320_vm5, %v8674_v15, %v8676_v51  ;;  %v18144_v23 = vld [vmem:[#allocation31_spill] sm:$0xff] }
 0x357   : > { %18053 = vst [vmem:[#allocation68_spill] sm:$0xff] %v16206_v37  ;;  %18054 = vst [vmem:[#allocation69_spill] sm:$0xff] %v16209_v19  ;;  %v16212_v22 = vsel %vm3320_vm5, %v8676_v51, %v8678_v34  ;;  %v16215_v1 = vsel %vm3320_vm5, %v8678_v34, %v8680_v20  ;;  %v16219_v33 = vsel %vm3320_vm5, %v8680_v20, %v16167_v38  ;;  %v2800_v49 = vrot.slane %v15587_v26, 1  ;;  %v18133_v19 = vld [vmem:[#allocation8_spill] sm:$0xff] }
 0x358   : > { %18055 = vst [vmem:[#allocation70_spill] sm:$0xff] %v16212_v22  ;;  %18056 = vst [vmem:[#allocation71_spill] sm:$0xff] %v16215_v1  ;;  %v16223_v16 = vsel %vm3320_vm5, %v16167_v38, %v8684_v29  ;;  %12630 = vmatmul.mubr.msk.bf16.gmra.mrb[8].mxu0 %vm2246_vm2, %v15541_v35  ;;  %v16230_v15 = vsel %vm3320_vm5, %v8684_v29, %v16186_v24  ;;  %v2802_v51 = vrot.slane %v15615_v4, 1  ;;  %v2804_v35 = vrot.slane %v15641_v30, 1 }
 0x359   : > { %18057 = vst [vmem:[#allocation72_spill] sm:$0xff] %v16219_v33  ;;  %18058 = vst [vmem:[#allocation73_spill] sm:$0xff] %v16223_v16  ;;  %12633 = vmatprep.mubr.msk.bf16.mxu0 %vm2246_vm2, %v15565_v3  ;;  %v16236_v20 = vsel %vm2784_vm6, %v2798_v50, %v2800_v49  ;;  %v16251_v3 = vrot.slane %v15678_v31, 1  ;;  %v3749_v50 = vld [vmem:[#allocation2 + $0x8] sm:$0xff]  ;;  %v5983_v45 = vrot.slane %v5971_v7, 2 }
 0x35a   : > { %18059 = vst [vmem:[#allocation74_spill] sm:$0xff] %v16230_v15  ;;  %v16241_v34 = vsel %vm2784_vm6, %v2800_v49, %v2802_v51  ;;  %v16254_v29 = vsel %vm2784_vm6, %v2802_v51, %v2804_v35  ;;  %v3772_v16 = vshrl.u32 %v3749_v50, 16 }
 0x35b   : > { %v16260_v49 = vsel %vm2784_vm6, %v2804_v35, %v16251_v3 }
 0x35d   : > { %12538 = vmatmul.mubr.msk.bf16.gmra.mrb[12].mxu1 %vm2246_vm2, %v16236_v20 }
 0x35e   : > { %12541 = vmatprep.mubr.msk.bf16.mxu1 %vm2246_vm2, %v16241_v34 }
 0x360   : > { %12634 = vmatmul.mubr.msk.bf16.gmra.mrb[12].mxu0 %vm2246_vm2, %v15587_v26  ;;  %v3774_v26 = vshll.u32 %v3749_v50, 16 }
 0x361   : > { %12637 = vmatprep.mubr.msk.bf16.mxu0 %vm2246_vm2, %v15615_v4  ;;  %v2808_v4 = vrot.slane %v15711_v48, 1 }
 0x362   : > { %v3776_v51 = vrot.slane %v3774_v26, 1  ;;  %v14346_v26 = vld [vmem:[%s17795_s3 + $0x110] sm:$0xff]  }
 0x363   : > { %v2809_v15 = vsel %vm2784_vm6, %v16251_v3, %v2808_v4 }
 0x364   : > { %v3777_v35 = vor.u32 %v3776_v51, %v3772_v16 }
 0x365   : > { %12542 = vmatmul.mubr.msk.bf16.gmra.mrb[16].mxu1 %vm2246_vm2, %v16254_v29 }
 0x366   : > { %12545 = vmatprep.mubr.msk.bf16.mxu1 %vm2246_vm2, %v16260_v49  ;;  %v3782_v48 = vsel %vm2294_vm3, %v3777_v35, %v15444_v14  ;;  %v14343_v14 = vld [vmem:[%s17795_s3 + $0xf8] sm:$0xff]  }
 0x368   : > { %12638 = vmatmul.mubr.msk.bf16.gmra.mrb[16].mxu0 %vm2246_vm2, %v15641_v30  ;;  %v14341_v30 = vld [vmem:[%s17795_s3 + $0xe8] sm:$0xff]  }
 0x369   : > { %12641 = vmatprep.mubr.msk.bf16.mxu0 %vm2246_vm2, %v15678_v31  ;;  %v14342_v31 = vld [vmem:[%s17795_s3 + $0xf0] sm:$0xff]  }
 0x36d   : > { %12546 = vmatmul.mubr.msk.bf16.gmra.mrb[20].mxu1 %vm2246_vm2, %v2809_v15 }
 0x370   : > { %12642 = vmatmul.mubr.msk.bf16.gmra.mrb[20].mxu0 %vm2246_vm2, %v15719_v53 }
 0x371   : > { %12653 = vmatprep.mubr.msk.bf16.mxu0 %vm2246_vm2, %v3782_v48  ;;  %v18063_v48 = vld [vmem:[#allocation5_spill] sm:$0xff] }
 0x378   : > { %12654 = vmatmul.mubr.msk.bf16.vlgmr.msra.gmra.mrb[0].mxu0 %vm2246_vm2, %v15482_v47  ;;  %v14344_v47 = vld [vmem:[%s17795_s3 + $0x100] sm:$0xff]  }
 0x379   : > { %12657 = vmatprep.mubr.msk.bf16.mxu0 %vm2246_vm2, %v15516_v56  ;;  %12678 = vmatpush3.bf16.msra.mxu0 %v14340_v5  ;;  %v18060_v56 = vshll.u32 %v15719_v53, 16 }
 0x37a   : > { %12679 = vmatprep.subr.bf16.mxu0 %v14341_v30 }
 0x37d   : > { %12680 = vmatpush3.bf16.msra.mxu0 %v14341_v30  ;;  %v18064_v30 = vld [vmem:[#allocation12_spill] sm:$0xff] }
 0x37e   : > { %12681 = vmatprep.subr.bf16.mxu0 %v14342_v31 }
 0x380   : > { %12658 = vmatmul.mubr.msk.bf16.gmra.mrb[4].mxu0 %vm2246_vm2, %v15536_v39  ;;  %v16307_v39 = vrot.slane %v18060_v56, 1  ;;  %v18065_v56 = vld [vmem:[#allocation14_spill] sm:$0xff] }
 0x381   : > { %12661 = vmatprep.mubr.msk.bf16.mxu0 %vm2246_vm2, %v15555_v25  ;;  %12682 = vmatpush3.bf16.msra.mxu0 %v14342_v31  ;;  %v3761_v25 = vld [vmem:[#allocation2 + $0x68] sm:$0x1] }
 0x382   : > { %12683 = vmatprep.subr.bf16.mxu0 %v14343_v14  ;;  %v3867_v5 = vshll.u32 %v3761_v25, 16 }
 0x385   : > { %12684 = vmatpush3.bf16.msra.mxu0 %v14343_v14 }
 0x386   : > { %12709 = vmatprep.subr.bf16.mxu0 %v14344_v47 }
 0x388   : > { %12662 = vmatmul.mubr.msk.bf16.gmra.mrb[8].mxu0 %vm2246_vm2, %v15582_v62  ;;  %v3862_v62 = vsel %vm2294_vm3, %v15735_v60, %v16307_v39  ;;  %v14345_v60 = vld [vmem:[%s17795_s3 + $0x108] sm:$0xff]  }
 0x389   : > { %12665 = vmatprep.mubr.msk.bf16.mxu0 %vm2246_vm2, %v15605_v10  ;;  %v3869_v10 = vrot.slane %v3867_v5, 1  ;;  %v4629_v5 = vld [vmem:[#allocation2 + $0x8] sm:$0xfc] }
 0x390   : > { %12666 = vmatmul.mubr.msk.bf16.gmra.mrb[12].mxu0 %vm2246_vm2, %v15632_v42  ;;  %v4084_v42 = vld [vmem:[#allocation2 + $0x8] sm:$0xfe] }
 0x391   : > { %12669 = vmatprep.mubr.msk.bf16.mxu0 %vm2246_vm2, %v15661_v2  ;;  %v18061_v2 = vshrl.u32 %v15719_v53, 16  ;;  %v4107_v15 = vrot.slane %v4084_v42, 1 }
 0x393   : > { %v16318_v16 = vor.u32 %v18061_v2, %v16307_v39  ;;  %v18068_v2 = vld [vmem:[#allocation21_spill] sm:$0xff] }
 0x395   : > { %v3870_v50 = vsel %vm2294_vm3, %v16318_v16, %v3869_v10  ;;  %v18067_v10 = vld [vmem:[#allocation19_spill] sm:$0xff] }
 0x398   : > { %12670 = vmatmul.mubr.msk.bf16.gmra.mrb[16].mxu0 %vm2246_vm2, %v15697_v32  ;;  %v4109_v32 = vsel %vm2784_vm6, %v4107_v15, %v15997_v58  ;;  %v14347_v58 = vld [vmem:[%s17795_s3 + $0x118] sm:$0xff]  }
 0x399   : > { %12673 = vmatprep.mubr.msk.bf16.mxu0 %vm2246_vm2, %v3862_v62  ;;  %v4641_v62 = vrot.slane %v4629_v5, 2 }
 0x39b   : > { %v4643_v15 = vsel %vm3320_vm5, %v4641_v62, %v18068_v2 }
 0x3a0   : > { %12674 = vmatmul.mubr.msk.bf16.gmra.mrb[20].mxu0 %vm2246_vm2, %v3870_v50  ;;  %v14353_v50 = vld [vmem:[%s17795_s3 + $0x148] sm:$0xff]  }
 0x3a1   : > { %12685 = vmatprep.mubr.msk.bf16.mxu0 %vm2246_vm2, %v4109_v32  ;;  %v18069_v32 = vld [vmem:[#allocation26_spill] sm:$0xff] }
 0x3a8   : > { %12686 = vmatmul.mubr.msk.bf16.vlgmr.msra.gmra.mrb[0].mxu0 %vm2246_vm2, %v16020_v28  ;;  %v14348_v28 = vld [vmem:[%s17795_s3 + $0x120] sm:$0xff]  }
 0x3a9   : > { %12689 = vmatprep.mubr.msk.bf16.mxu0 %vm2246_vm2, %v16023_v0  ;;  %12710 = vmatpush3.bf16.msra.mxu0 %v14344_v47  ;;  %v4356_v0 = vshrl.u32 %v4084_v42, 16 }
 0x3aa   : > { %12711 = vmatprep.subr.bf16.mxu0 %v14345_v60 }
 0x3ad   : > { %12712 = vmatpush3.bf16.msra.mxu0 %v14345_v60  ;;  %v18070_v60 = vld [vmem:[#allocation32_spill] sm:$0xff] }
 0x3ae   : > { %12713 = vmatprep.subr.bf16.mxu0 %v14346_v26 }
 0x3b0   : > { %12690 = vmatmul.mubr.msk.bf16.gmra.mrb[4].mxu0 %vm2246_vm2, %v16034_v55  ;;  %v4359_v55 = vshll.u32 %v4084_v42, 16 }
 0x3b1   : > { %12693 = vmatprep.mubr.msk.bf16.mxu0 %vm2246_vm2, %v16141_v54  ;;  %12714 = vmatpush3.bf16.msra.mxu0 %v14346_v26  ;;  %v16355_v54 = vrot.slane %v15719_v53, 1  ;;  %v14354_v26 = vld [vmem:[%s17795_s3 + $0x150] sm:$0xff]  }
 0x3b2   : > { %12715 = vmatprep.subr.bf16.mxu0 %v14347_v58  ;;  %v4361_v4 = vrot.slane %v4359_v55, 2  ;;  %v14356_v55 = vld [vmem:[%s17795_s3 + $0x160] sm:$0xff]  }
 0x3b5   : > { %12716 = vmatpush3.bf16.msra.mxu0 %v14347_v58  ;;  %v14355_v58 = vld [vmem:[%s17795_s3 + $0x158] sm:$0xff]  }
 0x3b6   : > { %12741 = vmatprep.subr.bf16.mxu0 %v14348_v28 }
 0x3b8   : > { %12694 = vmatmul.mubr.msk.bf16.gmra.mrb[8].mxu0 %vm2246_vm2, %v16161_v17  ;;  %v4129_v17 = vsel %vm2784_vm6, %v16251_v3, %v16355_v54  ;;  %v14349_v3 = vld [vmem:[%s17795_s3 + $0x128] sm:$0xff]  }
 0x3b9   : > { %12697 = vmatprep.mubr.msk.bf16.mxu0 %vm2246_vm2, %v16236_v20  ;;  %v4358_v20 = vrot.slane %v4356_v0, 1  ;;  %v18072_v0 = vld [vmem:[#allocation37_spill] sm:$0xff] }
 0x3bb   : > { %v4362_v51 = vor.u32 %v4361_v4, %v4358_v20  ;;  %v18075_v4 = vld [vmem:[#allocation39_spill] sm:$0xff] }
 0x3bd   : > { %v4366_v35 = vsel %vm3033_vm4, %v4362_v51, %v15452_v12  ;;  %v14351_v12 = vld [vmem:[%s17795_s3 + $0x138] sm:$0xff]  }
 0x3c0   : > { %12698 = vmatmul.mubr.msk.bf16.gmra.mrb[12].mxu0 %vm2246_vm2, %v16241_v34  ;;  %v4130_v34 = vrot.slane %v3761_v25, 1  ;;  %v18066_v25 = vld [vmem:[#allocation22_spill] sm:$0xff] }
 0x3c1   : > { %12701 = vmatprep.mubr.msk.bf16.mxu0 %vm2246_vm2, %v16254_v29 }
 0x3c2   : > { %v4131_v29 = vsel %vm2784_vm6, %v16355_v54, %v4130_v34 }
 0x3c8   : > { %12702 = vmatmul.mubr.msk.bf16.gmra.mrb[16].mxu0 %vm2246_vm2, %v16260_v49  ;;  %v14350_v49 = vld [vmem:[%s17795_s3 + $0x130] sm:$0xff]  }
 0x3c9   : > { %12705 = vmatprep.mubr.msk.bf16.mxu0 %vm2246_vm2, %v4129_v17  ;;  %v18073_v17 = vld [vmem:[#allocation38_spill] sm:$0xff] }
 0x3d0   : > { %12706 = vmatmul.mubr.msk.bf16.gmra.mrb[20].mxu0 %vm2246_vm2, %v4131_v29 }
 0x3d1   : > { %12717 = vmatprep.mubr.msk.bf16.mxu0 %vm2246_vm2, %v4366_v35  ;;  %v18079_v35 = vld [vmem:[#allocation40_spill] sm:$0xff] }
 0x3d8   : > { %12718 = vmatmul.mubr.msk.bf16.vlgmr.msra.gmra.mrb[0].mxu0 %vm2246_vm2, %v15494_v18  ;;  %v14352_v18 = vld [vmem:[%s17795_s3 + $0x140] sm:$0xff]  }
 0x3d9   : > { %12721 = vmatprep.mubr.msk.bf16.mxu0 %vm2246_vm2, %v15523_v21  ;;  %12742 = vmatpush3.bf16.msra.mxu0 %v14348_v28  ;;  %v18062_v21 = vld [vmem:[#allocation9_spill] sm:$0xff]  ;;  %v18071_v28 = vld [vmem:[#allocation35_spill] sm:$0xff] }
 0x3da   : > { %12743 = vmatprep.subr.bf16.mxu0 %v14349_v3 }
 0x3dd   : > { %12744 = vmatpush3.bf16.msra.mxu0 %v14349_v3 }
 0x3de   : > { %12745 = vmatprep.subr.bf16.mxu0 %v14350_v49 }
 0x3e0   : > { %12722 = vmatmul.mubr.msk.bf16.gmra.mrb[4].mxu0 %vm2246_vm2, %v15544_v61  ;;  %v4345_v61 = vld [vmem:[#allocation2 + $0x68] sm:$0x3] }
 0x3e1   : > { %12725 = vmatprep.mubr.msk.bf16.mxu0 %vm2246_vm2, %v15563_v43  ;;  %12746 = vmatpush3.bf16.msra.mxu0 %v14350_v49  ;;  %v4408_v43 = vshrl.u32 %v4345_v61, 16  ;;  %v4411_v31 = vshll.u32 %v4345_v61, 16  ;;  %v18081_v49 = vld [vmem:[#allocation45_spill] sm:$0xff] }
 0x3e2   : > { %12747 = vmatprep.subr.bf16.mxu0 %v14351_v12 }
 0x3e3   : > { %v4410_v14 = vrot.slane %v4408_v43, 1  ;;  %v4413_v47 = vrot.slane %v4411_v31, 2  ;;  %v18087_v31 = vld [vmem:[#allocation44_spill] sm:$0xff] }
 0x3e5   : > { %12748 = vmatpush3.bf16.msra.mxu0 %v14351_v12 }
 0x3e6   : > { %12773 = vmatprep.subr.bf16.mxu0 %v14352_v18 }
 0x3e8   : > { %12726 = vmatmul.mubr.msk.bf16.gmra.mrb[8].mxu0 %vm2246_vm2, %v15590_v8  ;;  %v4414_v8 = vor.u32 %v4413_v47, %v4410_v14 }
 0x3e9   : > { %12729 = vmatprep.mubr.msk.bf16.mxu0 %vm2246_vm2, %v18062_v21 }
 0x3ea   : > { %v4415_v42 = vsel %vm3033_vm4, %v18067_v10, %v4414_v8  ;;  %v4664_v8 = vrot.slane %v4345_v61, 2  ;;  %v18092_v10 = vld [vmem:[#allocation53_spill] sm:$0xff]  ;;  %v14357_v61 = vld [vmem:[%s17795_s3 + $0x168] sm:$0xff]  }
 0x3f0   : > { %12730 = vmatmul.mubr.msk.bf16.gmra.mrb[12].mxu0 %vm2246_vm2, %v18063_v48  ;;  %v16452_v48 = vrot.slane %v15719_v53, 2 }
 0x3f1   : > { %12733 = vmatprep.mubr.msk.bf16.mxu0 %vm2246_vm2, %v18064_v30  ;;  %v18085_v30 = vld [vmem:[#allocation46_spill] sm:$0xff] }
 0x3f2   : > { %v4663_v14 = vsel %vm3320_vm5, %v18087_v31, %v16452_v48  ;;  %v4665_v5 = vsel %vm3320_vm5, %v16452_v48, %v4664_v8  ;;  %v14499_v31 = vld [vmem:[#allocation2 + $0x38] sm:$0xff]  ;;  %v14501_v8 = vld [vmem:[#allocation2 + $0x48] sm:$0xff] }
 0x3f8   : > { %12734 = vmatmul.mubr.msk.bf16.gmra.mrb[16].mxu0 %vm2246_vm2, %v18065_v56 }
 0x3f9   : > { %12737 = vmatprep.mubr.msk.bf16.mxu0 %vm2246_vm2, %v18066_v25 }
 0x400   : > { %12738 = vmatmul.mubr.msk.bf16.gmra.mrb[20].mxu0 %vm2246_vm2, %v4415_v42 }
 0x401   : > { %12749 = vmatprep.mubr.msk.bf16.mxu0 %vm2246_vm2, %v4643_v15 }
 0x408   : > { %12750 = vmatmul.mubr.msk.bf16.vlgmr.msra.gmra.mrb[0].mxu0 %vm2246_vm2, %v18069_v32 }
 0x409   : > { %12753 = vmatprep.mubr.msk.bf16.mxu0 %vm2246_vm2, %v18070_v60  ;;  %12774 = vmatpush3.bf16.msra.mxu0 %v14352_v18 }
 0x40a   : > { %12775 = vmatprep.subr.bf16.mxu0 %v14353_v50 }
 0x40d   : > { %12776 = vmatpush3.bf16.msra.mxu0 %v14353_v50  ;;  %v14496_v50 = vld [vmem:[#allocation2 + $0x18] sm:$0xff] }
 0x40e   : > { %12777 = vmatprep.subr.bf16.mxu0 %v14354_v26 }
 0x410   : > { %12754 = vmatmul.mubr.msk.bf16.gmra.mrb[4].mxu0 %vm2246_vm2, %v18071_v28 }
 0x411   : > { %12757 = vmatprep.mubr.msk.bf16.mxu0 %vm2246_vm2, %v18072_v0  ;;  %12778 = vmatpush3.bf16.msra.mxu0 %v14354_v26  ;;  %v14359_v0 = vld [vmem:[%s17795_s3 + $0x178] sm:$0xff]  }
 0x412   : > { %12779 = vmatprep.subr.bf16.mxu0 %v14355_v58 }
 0x415   : > { %12780 = vmatpush3.bf16.msra.mxu0 %v14355_v58  ;;  %v14358_v58 = vld [vmem:[%s17795_s3 + $0x170] sm:$0xff]  }
 0x416   : > { %12805 = vmatprep.subr.bf16.mxu0 %v14356_v55 }
 0x418   : > { %12758 = vmatmul.mubr.msk.bf16.gmra.mrb[8].mxu0 %vm2246_vm2, %v18073_v17  ;;  %v16429_v20 = vpop.f32.mrb[0].mxu1  ;;  %v14497_v17 = vld [vmem:[#allocation2 + $0x28] sm:$0xff] }
 0x419   : > { %18074 = vst [vmem:[#allocation9_spill] sm:$0xff] %v16429_v20  ;;  %12761 = vmatprep.mubr.msk.bf16.mxu0 %vm2246_vm2, %v18075_v4  ;;  %v16433_v34 = vpop.f32.mrb[1].mxu1 }
 0x41a   : > { %18076 = vst [vmem:[#allocation5_spill] sm:$0xff] %v16433_v34  ;;  %v16435_v51 = vpop.f32.mrb[2].mxu1 }
 0x41b   : > { %18077 = vst [vmem:[#allocation12_spill] sm:$0xff] %v16435_v51  ;;  %v16437_v29 = vpop.f32.mrb[3].mxu1 }
 0x41c   : > { %18078 = vst [vmem:[#allocation14_spill] sm:$0xff] %v16437_v29 }
 0x420   : > { %12762 = vmatmul.mubr.msk.bf16.gmra.mrb[12].mxu0 %vm2246_vm2, %v18079_v35  ;;  %v16441_v3 = vpop.f32.mrb[4].mxu1 }
 0x421   : > { %18080 = vst [vmem:[#allocation22_spill] sm:$0xff] %v16441_v3  ;;  %12765 = vmatprep.mubr.msk.bf16.mxu0 %vm2246_vm2, %v18081_v49  ;;  %v16445_v12 = vpop.f32.mrb[5].mxu1  ;;  %v14360_v49 = vld [vmem:[%s17795_s3 + $0x180] sm:$0xff]   ;;  %v16721_v3 = vld [vmem:[#allocation2 + $0x68] sm:$0xff] }
 0x422   : > { %18082 = vst [vmem:[#allocation19_spill] sm:$0xff] %v16445_v12  ;;  %v16447_v18 = vpop.f32.mrb[6].mxu1  ;;  %v16705_v12 = vld [vmem:[#allocation2 + $0x58] sm:$0xff]  ;;  %v16724_v29 = vrot.slane %v16721_v3, 1 }
 0x423   : > { %18083 = vst [vmem:[#allocation21_spill] sm:$0xff] %v16447_v18  ;;  %v16449_v21 = vpop.f32.mrb[7].mxu1 }
 0x424   : > { %18084 = vst [vmem:[#allocation26_spill] sm:$0xff] %v16449_v21  ;;  %v16702_v21 = vld [vmem:[#allocation2 + $0x50] sm:$0xff] }
 0x425   : > { %v5464_v18 = vrot.slane %v16702_v21, 1 }
 0x428   : > { %12766 = vmatmul.mubr.msk.bf16.gmra.mrb[16].mxu0 %vm2246_vm2, %v18085_v30  ;;  %v16456_v43 = vpop.f32.mrb[8].mxu1 }
 0x429   : > { %18086 = vst [vmem:[#allocation32_spill] sm:$0xff] %v16456_v43  ;;  %12769 = vmatprep.mubr.msk.bf16.mxu0 %vm2246_vm2, %v4663_v14  ;;  %v16462_v47 = vpop.f32.mrb[9].mxu1  ;;  %v14500_v14 = vld [vmem:[#allocation2 + $0x40] sm:$0xff] }
 0x42a   : > { %18088 = vst [vmem:[#allocation35_spill] sm:$0xff] %v16462_v47  ;;  %v16464_v56 = vpop.f32.mrb[10].mxu1  ;;  %v16689_v47 = vld [vmem:[#allocation2 + $0x48] sm:$0xff] }
 0x42b   : > { %18089 = vst [vmem:[#allocation37_spill] sm:$0xff] %v16464_v56  ;;  %v16466_v25 = vpop.f32.mrb[11].mxu1  ;;  %v16686_v56 = vld [vmem:[#allocation2 + $0x40] sm:$0xff]  ;;  %v5462_v43 = vrot.slane %v16689_v47, 1 }
 0x42c   : > { %18090 = vst [vmem:[#allocation38_spill] sm:$0xff] %v16466_v25 }
 0x430   : > { %12770 = vmatmul.mubr.msk.bf16.gmra.mrb[20].mxu0 %vm2246_vm2, %v4665_v5  ;;  %v16471_v62 = vpop.f32.mrb[12].mxu1  ;;  %v14502_v5 = vld [vmem:[#allocation2 + $0x50] sm:$0xff] }
 0x431   : > { %18091 = vst [vmem:[#allocation39_spill] sm:$0xff] %v16471_v62  ;;  %12781 = vmatprep.mubr.msk.bf16.mxu0 %vm2246_vm2, %v18092_v10  ;;  %v16475_v42 = vpop.f32.mrb[13].mxu1  ;;  %v5091_v10 = vld [vmem:[#allocation2 + $0x10] sm:$0xff]  ;;  %v14367_v62 = vld [vmem:[%s17795_s3 + $0x1b8] sm:$0xff]  }
 0x432   : > { %18093 = vst [vmem:[#allocation40_spill] sm:$0xff] %v16475_v42  ;;  %v16477_v2 = vpop.f32.mrb[14].mxu1 }
 0x433   : > { %18094 = vst [vmem:[#allocation45_spill] sm:$0xff] %v16477_v2  ;;  %v16479_v15 = vpop.f32.mrb[15].mxu1  ;;  %v16646_v2 = vld [vmem:[#allocation2 + $0x28] sm:$0xff] }
 0x434   : > { %18095 = vst [vmem:[#allocation46_spill] sm:$0xff] %v16479_v15 }
 0x438   : > { %12782 = vmatmul.mubr.msk.bf16.vlgmr.msra.gmra.mrb[0].mxu0 %vm2246_vm2, %v14496_v50  ;;  %v16485_v32 = vpop.f32.mrb[16].mxu1  ;;  %v14503_v50 = vld [vmem:[#allocation2 + $0x58] sm:$0xff] }
 0x439   : > { %18096 = vst [vmem:[#allocation44_spill] sm:$0xff] %v16485_v32  ;;  %12785 = vmatprep.mubr.msk.bf16.mxu0 %vm2246_vm2, %v16143_v13  ;;  %v16489_v60 = vpop.f32.mrb[17].mxu1  ;;  %12806 = vmatpush3.bf16.msra.mxu0 %v14356_v55  ;;  %v14498_v55 = vld [vmem:[#allocation2 + $0x30] sm:$0xff] }
 0x43a   : > { %18097 = vst [vmem:[#allocation53_spill] sm:$0xff] %v16489_v60  ;;  %v16491_v26 = vpop.f32.mrb[18].mxu1  ;;  %12807 = vmatprep.subr.bf16.mxu0 %v14357_v61 }
 0x43b   : > { %18098 = vst [vmem:[#allocation75_spill] sm:$0xff] %v16491_v26  ;;  %v16496_v28 = vpop.f32.mrb[19].mxu1 }
 0x43c   : > { %18099 = vst [vmem:[#allocation76_spill] sm:$0xff] %v16496_v28 }
 0x43d   : > { %12808 = vmatpush3.bf16.msra.mxu0 %v14357_v61  ;;  %v5116_v61 = vshll.u32 %v5091_v10, 16 }
 0x43e   : > { %12809 = vmatprep.subr.bf16.mxu0 %v14358_v58 }
 0x440   : > { %12786 = vmatmul.mubr.msk.bf16.gmra.mrb[4].mxu0 %vm2246_vm2, %v14497_v17  ;;  %v16502_v13 = vpop.f32.mrb[20].mxu1 }
 0x441   : > { %18100 = vst [vmem:[#allocation77_spill] sm:$0xff] %v16502_v13  ;;  %12789 = vmatprep.mubr.msk.bf16.mxu0 %vm2246_vm2, %v14498_v55  ;;  %v16505_v4 = vpop.f32.mrb[21].mxu1  ;;  %12810 = vmatpush3.bf16.msra.mxu0 %v14358_v58  ;;  %v5118_v58 = vrot.slane %v5116_v61, 1  ;;  %v18104_v55 = vld [vmem:[#allocation24_spill] sm:$0xff]  ;;  %v18111_v61 = vld [vmem:[#allocation15_spill] sm:$0xff] }
 0x442   : > { %18101 = vst [vmem:[#allocation78_spill] sm:$0xff] %v16505_v4  ;;  %v16507_v35 = vpop.f32.mrb[22].mxu1  ;;  %12811 = vmatprep.subr.bf16.mxu0 %v14359_v0 }
 0x443   : > { %18102 = vst [vmem:[#allocation79_spill] sm:$0xff] %v16507_v35  ;;  %v16512_v30 = vpop.f32.mrb[23].mxu1  ;;  %v18108_v35 = vld [vmem:[#allocation4_spill] sm:$0xff] }
 0x444   : > { %18103 = vst [vmem:[#allocation80_spill] sm:$0xff] %v16512_v30  ;;  %v18109_v4 = vshll.u32 %v18108_v35, 16 }
 0x445   : > { %12812 = vmatpush3.bf16.msra.mxu0 %v14359_v0  ;;  %v5114_v0 = vshrl.u32 %v5091_v10, 16  ;;  %v14361_v10 = vld [vmem:[%s17795_s3 + $0x188] sm:$0xff]  }
 0x446   : > { %12837 = vmatprep.subr.bf16.mxu0 %v14360_v49 }
 0x447   : > { %v5119_v17 = vor.u32 %v5118_v58, %v5114_v0 }
 0x448   : > { %12790 = vmatmul.mubr.msk.bf16.gmra.mrb[8].mxu0 %vm2246_vm2, %v14499_v31  ;;  %v18105_v31 = vld [vmem:[#allocation13_spill] sm:$0xff] }
 0x449   : > { %12793 = vmatprep.mubr.msk.bf16.mxu0 %vm2246_vm2, %v14500_v14  ;;  %v5124_v14 = vsel %vm2294_vm3, %v5119_v17, %v18105_v31  ;;  %v14362_v31 = vld [vmem:[%s17795_s3 + $0x190] sm:$0xff]  }
 0x450   : > { %12794 = vmatmul.mubr.msk.bf16.gmra.mrb[12].mxu0 %vm2246_vm2, %v14501_v8  ;;  %v18106_v8 = vld [vmem:[#allocation3_spill] sm:$0xff] }
 0x451   : > { %12797 = vmatprep.mubr.msk.bf16.mxu0 %vm2246_vm2, %v14502_v5  ;;  %v18107_v5 = vshll.u32 %v18106_v8, 16  ;;  %v18110_v13 = vshrl.u32 %v18106_v8, 16 }
 0x453   : > { %v5131_v30 = vrot.slane %v18107_v5, 1  ;;  %v18116_v5 = vshrl.u32 %v18108_v35, 16  ;;  %v18118_v35 = vld [vmem:[#allocation17_spill] sm:$0xff] }
 0x455   : > { %v16537_v58 = vsel %vm2294_vm3, %v18111_v61, %v5131_v30 }
 0x458   : > { %12798 = vmatmul.mubr.msk.bf16.gmra.mrb[16].mxu0 %vm2246_vm2, %v14503_v50  ;;  %v5139_v50 = vrot.slane %v18109_v4, 1  ;;  %v18112_v4 = vld [vmem:[#allocation11_spill] sm:$0xff] }
 0x459   : > { %12801 = vmatprep.mubr.msk.bf16.mxu0 %vm2246_vm2, %v15719_v53  ;;  %v5135_v53 = vor.u32 %v18110_v13, %v5131_v30  ;;  %v18113_v13 = vshll.u32 %v18112_v4, 16  ;;  %v18114_v30 = vld [vmem:[#allocation16_spill] sm:$0xff] }
 0x45a   : > { %v5143_v61 = vor.u32 %v18116_v5, %v5139_v50 }
 0x45b   : > { %v16542_v0 = vsel %vm2294_vm3, %v5135_v53, %v5139_v50  ;;  %v5147_v17 = vrot.slane %v18113_v13, 1  ;;  %v18117_v53 = vshrl.u32 %v18112_v4, 16  ;;  %v18119_v50 = vshll.u32 %v18118_v35, 16  ;;  %v14364_v4 = vld [vmem:[%s17795_s3 + $0x1a0] sm:$0xff]  }
 0x45d   : > { %v5151_v28 = vor.u32 %v18117_v53, %v5147_v17  ;;  %v16561_v13 = vsel %vm2294_vm3, %v5143_v61, %v5147_v17  ;;  %v18120_v17 = vld [vmem:[#allocation18_spill] sm:$0xff]  ;;  %v18122_v53 = vshrl.u32 %v18114_v30, 16 }
 0x45e   : > { %v18121_v5 = vshll.u32 %v18120_v17, 16 }
 0x460   : > { %12802 = vmatmul.mubr.msk.bf16.gmra.mrb[20].mxu0 %vm2246_vm2, %v18104_v55  ;;  %v5171_v61 = vrot.slane %v18121_v5, 1  ;;  %v18124_v5 = vld [vmem:[#allocation20_spill] sm:$0xff] }
 0x461   : > { %12813 = vmatprep.mubr.msk.bf16.mxu0 %vm2246_vm2, %v5124_v14  ;;  %v18115_v14 = vshll.u32 %v18114_v30, 16  ;;  %v18125_v30 = vshll.u32 %v18124_v5, 16 }
 0x463   : > { %v5155_v8 = vrot.slane %v18115_v14, 1 }
 0x465   : > { %v16566_v14 = vsel %vm2294_vm3, %v5151_v28, %v5155_v8  ;;  %v5159_v26 = vor.u32 %v18122_v53, %v5155_v8  ;;  %v18123_v28 = vshrl.u32 %v18118_v35, 16  ;;  %v5179_v8 = vrot.slane %v18125_v30, 1 }
 0x466   : > { %v18130_v30 = vshll.u32 %v18104_v55, 16 }
 0x468   : > { %12814 = vmatmul.mubr.msk.bf16.vlgmr.msra.gmra.mrb[0].mxu0 %vm2246_vm2, %v16537_v58 }
 0x469   : > { %12817 = vmatprep.mubr.msk.bf16.mxu0 %vm2246_vm2, %v16542_v0  ;;  %12838 = vmatpush3.bf16.msra.mxu0 %v14360_v49  ;;  %v14363_v49 = vld [vmem:[%s17795_s3 + $0x198] sm:$0xff]  }
 0x46a   : > { %12839 = vmatprep.subr.bf16.mxu0 %v14361_v10 }
 0x46d   : > { %12840 = vmatpush3.bf16.msra.mxu0 %v14361_v10  ;;  %v5163_v10 = vrot.slane %v18119_v50, 1 }
 0x46e   : > { %12841 = vmatprep.subr.bf16.mxu0 %v14362_v31 }
 0x46f   : > { %v5167_v60 = vor.u32 %v18123_v28, %v5163_v10  ;;  %v18128_v28 = vshrl.u32 %v18120_v17, 16  ;;  %v16613_v17 = vld [vmem:[#allocation2 + $0x70] sm:$0x1] }
 0x470   : > { %12818 = vmatmul.mubr.msk.bf16.gmra.mrb[4].mxu0 %vm2246_vm2, %v16561_v13  ;;  %v5472_v1 = vrot.slane %v16613_v17, 1 }
 0x471   : > { %12821 = vmatprep.mubr.msk.bf16.mxu0 %vm2246_vm2, %v16566_v14  ;;  %12842 = vmatpush3.bf16.msra.mxu0 %v14362_v31  ;;  %v16582_v31 = vsel %vm2294_vm3, %v5159_v26, %v5163_v10  ;;  %v16587_v50 = vsel %vm2294_vm3, %v5167_v60, %v5171_v61  ;;  %v5175_v32 = vor.u32 %v18128_v28, %v5171_v61  ;;  %v18129_v26 = vshrl.u32 %v18124_v5, 16 }
 0x472   : > { %12843 = vmatprep.subr.bf16.mxu0 %v14363_v49 }
 0x473   : > { %v5183_v10 = vor.u32 %v18129_v26, %v5179_v8  ;;  %v16600_v15 = vsel %vm2294_vm3, %v5175_v32, %v5179_v8  ;;  %v5209_v8 = vshll.u32 %v16613_v17, 16  ;;  %v18140_v17 = vld [vmem:[#allocation30_spill] sm:$0xff] }
 0x475   : > { %12844 = vmatpush3.bf16.msra.mxu0 %v14363_v49  ;;  %v18126_v49 = vld [vmem:[#allocation23_spill] sm:$0xff]  ;;  %v5211_v26 = vrot.slane %v5209_v8, 1  ;;  %v16641_v8 = vld [vmem:[#allocation2 + $0x20] sm:$0xff] }
 0x476   : > { %12869 = vmatprep.subr.bf16.mxu0 %v14364_v4  ;;  %v18127_v53 = vshll.u32 %v18126_v49, 16  ;;  %v18131_v61 = vshrl.u32 %v18126_v49, 16 }
 0x478   : > { %12822 = vmatmul.mubr.msk.bf16.gmra.mrb[8].mxu0 %vm2246_vm2, %v16582_v31  ;;  %v5187_v35 = vrot.slane %v18127_v53, 1  ;;  %v16611_v53 = vrot.slane %v18130_v30, 1  ;;  %v16628_v30 = vld [vmem:[#allocation2 + $0x18] sm:$0xff] }
 0x479   : > { %12825 = vmatprep.mubr.msk.bf16.mxu0 %vm2246_vm2, %v16587_v50  ;;  %v5450_v49 = vrot.slane %v16628_v30, 1  ;;  %v5984_v9 = vrot.slane %v16628_v30, 2 }
 0x47a   : > { %v16605_v60 = vsel %vm2294_vm3, %v5183_v10, %v5187_v35  ;;  %v16617_v5 = vor.u32 %v18131_v61, %v5187_v35  ;;  %v5204_v28 = vsel %vm2294_vm3, %v16318_v16, %v16611_v53  ;;  %v5426_v10 = vld [vmem:[#allocation2 + $0x10] sm:$0xfe]  ;;  %v18132_v35 = vshrl.u32 %v18104_v55, 16 }
 0x47b   : > { %v5449_v61 = vrot.slane %v5426_v10, 1  ;;  %v5454_v55 = vrot.slane %v16646_v2, 1  ;;  %v5698_v51 = vshrl.u32 %v5426_v10, 16  ;;  %v5701_v34 = vshll.u32 %v5426_v10, 16 }
 0x47c   : > { %v5196_v32 = vsel %vm2294_vm3, %v16617_v5, %v16307_v39  ;;  %v16634_v39 = vor.u32 %v18132_v35, %v16611_v53  ;;  %v14365_v35 = vld [vmem:[%s17795_s3 + $0x1a8] sm:$0xff]   ;;  %v5473_v10 = vsel %vm2784_vm6, %v16724_v29, %v5472_v1  ;;  %v14372_v1 = vld [vmem:[%s17795_s3 + $0x1e0] sm:$0xff]   ;;  %v5985_v52 = vsel %vm3320_vm5, %v5983_v45, %v5984_v9 }
 0x47d   : > { %v5451_v16 = vsel %vm2784_vm6, %v5449_v61, %v5450_v49  ;;  %v5700_v20 = vrot.slane %v5698_v51, 1  ;;  %v5703_v33 = vrot.slane %v5701_v34, 2  ;;  %v18135_v34 = vld [vmem:[#allocation7_spill] sm:$0xff]  ;;  %v18139_v51 = vld [vmem:[#allocation29_spill] sm:$0xff] }
 0x47f   : > { %v5704_v22 = vor.u32 %v5703_v33, %v5700_v20  ;;  %v14370_v33 = vld [vmem:[%s17795_s3 + $0x1d0] sm:$0xff]  }
 0x480   : > { %12826 = vmatmul.mubr.msk.bf16.gmra.mrb[12].mxu0 %vm2246_vm2, %v16600_v15  ;;  %v18138_v20 = vld [vmem:[#allocation28_spill] sm:$0xff] }
 0x481   : > { %12829 = vmatprep.mubr.msk.bf16.mxu0 %vm2246_vm2, %v16605_v60  ;;  %v5708_v37 = vsel %vm3033_vm4, %v5704_v22, %v18133_v19  ;;  %v18136_v22 = vld [vmem:[#allocation25_spill] sm:$0xff]  ;;  %v18137_v19 = vld [vmem:[#allocation27_spill] sm:$0xff] }
 0x488   : > { %12830 = vmatmul.mubr.msk.bf16.gmra.mrb[16].mxu0 %vm2246_vm2, %v5196_v32  ;;  %v5212_v32 = vsel %vm2294_vm3, %v16634_v39, %v5211_v26 }
 0x489   : > { %12833 = vmatprep.mubr.msk.bf16.mxu0 %vm2246_vm2, %v5204_v28  ;;  %v16644_v28 = vrot.slane %v16641_v8, 1 }
 0x48b   : > { %v5453_v26 = vsel %vm2784_vm6, %v5450_v49, %v16644_v28  ;;  %v16657_v61 = vsel %vm2784_vm6, %v16644_v28, %v5454_v55  ;;  %v16667_v49 = vld [vmem:[#allocation2 + $0x38] sm:$0xff] }
 0x490   : > { %12834 = vmatmul.mubr.msk.bf16.gmra.mrb[20].mxu0 %vm2246_vm2, %v5212_v32  ;;  %v14366_v32 = vld [vmem:[%s17795_s3 + $0x1b0] sm:$0xff]  }
 0x491   : > { %12845 = vmatprep.mubr.msk.bf16.mxu0 %vm2246_vm2, %v5451_v16  ;;  %v16664_v16 = vld [vmem:[#allocation2 + $0x30] sm:$0xff] }
 0x492   : > { %v5456_v42 = vrot.slane %v16664_v16, 1  ;;  %v5990_v45 = vrot.slane %v16664_v16, 2 }
 0x498   : > { %12846 = vmatmul.mubr.msk.bf16.vlgmr.msra.gmra.mrb[0].mxu0 %vm2246_vm2, %v5453_v26  ;;  %v5458_v26 = vrot.slane %v16667_v49, 1 }
 0x499   : > { %12849 = vmatprep.mubr.msk.bf16.mxu0 %vm2246_vm2, %v16657_v61  ;;  %12870 = vmatpush3.bf16.msra.mxu0 %v14364_v4  ;;  %v16674_v4 = vsel %vm2784_vm6, %v5454_v55, %v5456_v42  ;;  %v5460_v55 = vrot.slane %v16686_v56, 1 }
 0x49a   : > { %12871 = vmatprep.subr.bf16.mxu0 %v14365_v35  ;;  %v16679_v25 = vsel %vm2784_vm6, %v5456_v42, %v5458_v26 }
 0x49b   : > { %v16693_v42 = vsel %vm2784_vm6, %v5458_v26, %v5460_v55  ;;  %v16711_v26 = vsel %vm2784_vm6, %v5462_v43, %v5464_v18 }
 0x49d   : > { %12872 = vmatpush3.bf16.msra.mxu0 %v14365_v35  ;;  %v14368_v35 = vld [vmem:[%s17795_s3 + $0x1c0] sm:$0xff]  }
 0x49e   : > { %12873 = vmatprep.subr.bf16.mxu0 %v14366_v32 }
 0x4a0   : > { %12850 = vmatmul.mubr.msk.bf16.gmra.mrb[4].mxu0 %vm2246_vm2, %v16674_v4 }
 0x4a1   : > { %12853 = vmatprep.mubr.msk.bf16.mxu0 %vm2246_vm2, %v16679_v25  ;;  %12874 = vmatpush3.bf16.msra.mxu0 %v14366_v32  ;;  %v16698_v32 = vsel %vm2784_vm6, %v5460_v55, %v5462_v43 }
 0x4a2   : > { %12875 = vmatprep.subr.bf16.mxu0 %v14367_v62 }
 0x4a5   : > { %12876 = vmatpush3.bf16.msra.mxu0 %v14367_v62  ;;  %v16708_v62 = vrot.slane %v16705_v12, 1 }
 0x4a6   : > { %12901 = vmatprep.subr.bf16.mxu0 %v14368_v35 }
 0x4a7   : > { %v16717_v55 = vsel %vm2784_vm6, %v5464_v18, %v16708_v62  ;;  %v5469_v43 = vsel %vm2784_vm6, %v16708_v62, %v16355_v54  ;;  %v5471_v18 = vsel %vm2784_vm6, %v16355_v54, %v16724_v29  ;;  %v14369_v54 = vld [vmem:[%s17795_s3 + $0x1c8] sm:$0xff]  }
 0x4a8   : > { %12854 = vmatmul.mubr.msk.bf16.gmra.mrb[8].mxu0 %vm2246_vm2, %v16693_v42 }
 0x4a9   : > { %12857 = vmatprep.mubr.msk.bf16.mxu0 %vm2246_vm2, %v16698_v32 }
 0x4b0   : > { %12858 = vmatmul.mubr.msk.bf16.gmra.mrb[12].mxu0 %vm2246_vm2, %v16711_v26 }
 0x4b1   : > { %12861 = vmatprep.mubr.msk.bf16.mxu0 %vm2246_vm2, %v16717_v55 }
 0x4b8   : > { %12862 = vmatmul.mubr.msk.bf16.gmra.mrb[16].mxu0 %vm2246_vm2, %v5469_v43  ;;  %v18134_v43 = vld [vmem:[#allocation6_spill] sm:$0xff] }
 0x4b9   : > { %12865 = vmatprep.mubr.msk.bf16.mxu0 %vm2246_vm2, %v5471_v18  ;;  %v18141_v18 = vld [vmem:[#allocation33_spill] sm:$0xff] }
 0x4c0   : > { %12866 = vmatmul.mubr.msk.bf16.gmra.mrb[20].mxu0 %vm2246_vm2, %v5473_v10 }
 0x4c1   : > { %12877 = vmatprep.mubr.msk.bf16.mxu0 %vm2246_vm2, %v5708_v37  ;;  %v14371_v37 = vld [vmem:[%s17795_s3 + $0x1d8] sm:$0xff]  }
 0x4c8   : > { %12878 = vmatmul.mubr.msk.bf16.vlgmr.msra.gmra.mrb[0].mxu0 %vm2246_vm2, %v18134_v43 }
 0x4c9   : > { %12881 = vmatprep.mubr.msk.bf16.mxu0 %vm2246_vm2, %v18135_v34  ;;  %12902 = vmatpush3.bf16.msra.mxu0 %v14368_v35  ;;  %v5687_v35 = vld [vmem:[#allocation2 + $0x70] sm:$0x3] }
 0x4ca   : > { %12903 = vmatprep.subr.bf16.mxu0 %v14369_v54  ;;  %v5750_v10 = vshrl.u32 %v5687_v35, 16 }
 0x4cc   : > { %v5752_v43 = vrot.slane %v5750_v10, 1  ;;  %v16780_v10 = vrot.slane %v16641_v8, 2 }
 0x4cd   : > { %12904 = vmatpush3.bf16.msra.mxu0 %v14369_v54  ;;  %v5753_v54 = vshll.u32 %v5687_v35, 16 }
 0x4ce   : > { %12905 = vmatprep.subr.bf16.mxu0 %v14370_v33  ;;  %v5987_v7 = vsel %vm3320_vm5, %v5984_v9, %v16780_v10  ;;  %v14375_v9 = vld [vmem:[%s17795_s3 + $0x1f8] sm:$0xff]  }
 0x4d0   : > { %12882 = vmatmul.mubr.msk.bf16.gmra.mrb[4].mxu0 %vm2246_vm2, %v18136_v22 }
 0x4d1   : > { %12885 = vmatprep.mubr.msk.bf16.mxu0 %vm2246_vm2, %v18137_v19  ;;  %12906 = vmatpush3.bf16.msra.mxu0 %v14370_v33  ;;  %v5755_v33 = vrot.slane %v5753_v54, 2  ;;  %v14373_v54 = vld [vmem:[%s17795_s3 + $0x1e8] sm:$0xff]  }
 0x4d2   : > { %12907 = vmatprep.subr.bf16.mxu0 %v14371_v37 }
 0x4d3   : > { %v5756_v40 = vor.u32 %v5755_v33, %v5752_v43  ;;  %v14376_v43 = vld [vmem:[%s17795_s3 + $0x200] sm:$0xff]   ;;  %v5994_v33 = vrot.slane %v16686_v56, 2 }
 0x4d5   : > { %12908 = vmatpush3.bf16.msra.mxu0 %v14371_v37  ;;  %v18143_v37 = vld [vmem:[#allocation36_spill] sm:$0xff]  ;;  %v5757_v44 = vsel %vm3033_vm4, %v18144_v23, %v5756_v40  ;;  %v5992_v23 = vrot.slane %v16667_v49, 2 }
 0x4d6   : > { %12933 = vmatprep.subr.bf16.mxu0 %v14372_v1 }
 0x4d8   : > { %12886 = vmatmul.mubr.msk.bf16.gmra.mrb[8].mxu0 %vm2246_vm2, %v18138_v20 }
 0x4d9   : > { %12889 = vmatprep.mubr.msk.bf16.mxu0 %vm2246_vm2, %v18139_v51 }
 0x4e0   : > { %12890 = vmatmul.mubr.msk.bf16.gmra.mrb[12].mxu0 %vm2246_vm2, %v18140_v17 }
 0x4e1   : > { %12893 = vmatprep.mubr.msk.bf16.mxu0 %vm2246_vm2, %v18141_v18 }
 0x4e8   : > { %12894 = vmatmul.mubr.msk.bf16.gmra.mrb[16].mxu0 %vm2246_vm2, %v18142_v46  ;;  %v5988_v46 = vrot.slane %v16646_v2, 2 }
 0x4e9   : > { %12897 = vmatprep.mubr.msk.bf16.mxu0 %vm2246_vm2, %v18143_v37  ;;  %v5996_v37 = vrot.slane %v16689_v47, 2 }
 0x4ea   : > { %v16804_v40 = vsel %vm3320_vm5, %v5988_v46, %v5990_v45 }
 0x4f0   : > { %12898 = vmatmul.mubr.msk.bf16.gmra.mrb[20].mxu0 %vm2246_vm2, %v5757_v44  ;;  %v16791_v44 = vsel %vm3320_vm5, %v16780_v10, %v5988_v46  ;;  %v16819_v46 = vsel %vm3320_vm5, %v5992_v23, %v5994_v33 }
 0x4f1   : > { %12909 = vmatprep.mubr.msk.bf16.mxu0 %vm2246_vm2, %v5985_v52  ;;  %v14374_v52 = vld [vmem:[%s17795_s3 + $0x1f0] sm:$0xff]  }
 0x4f8   : > { %12910 = vmatmul.mubr.msk.bf16.vlgmr.msra.gmra.mrb[0].mxu0 %vm2246_vm2, %v5987_v7  ;;  %v5998_v7 = vrot.slane %v16702_v21, 2 }
 0x4f9   : > { %12913 = vmatprep.mubr.msk.bf16.mxu0 %vm2246_vm2, %v16791_v44  ;;  %12934 = vmatpush3.bf16.msra.mxu0 %v14372_v1  ;;  %v16809_v1 = vsel %vm3320_vm5, %v5990_v45, %v5992_v23 }
 0x4fa   : > { %12935 = vmatprep.subr.bf16.mxu0 %v14373_v54  ;;  %v16833_v45 = vsel %vm3320_vm5, %v5996_v37, %v5998_v7 }
 0x4fd   : > { %12936 = vmatpush3.bf16.msra.mxu0 %v14373_v54  ;;  %v16824_v54 = vsel %vm3320_vm5, %v5994_v33, %v5996_v37 }
 0x4fe   : > { %12937 = vmatprep.subr.bf16.mxu0 %v14374_v52 }
 0x500   : > { %12914 = vmatmul.mubr.msk.bf16.gmra.mrb[4].mxu0 %vm2246_vm2, %v16804_v40 }
 0x501   : > { %12917 = vmatprep.mubr.msk.bf16.mxu0 %vm2246_vm2, %v16809_v1  ;;  %12938 = vmatpush3.bf16.msra.mxu0 %v14374_v52  ;;  %v16830_v52 = vrot.slane %v16705_v12, 2 }
 0x502   : > { %12939 = vmatprep.subr.bf16.mxu0 %v14375_v9 }
 0x503   : > { %v16839_v23 = vsel %vm3320_vm5, %v5998_v7, %v16830_v52  ;;  %v6003_v33 = vsel %vm3320_vm5, %v16830_v52, %v16452_v48  ;;  %v6006_v7 = vrot.slane %v5687_v35, 2  ;;  %v16890_v35 = vld [vmem:[#allocation2 + $0x70] sm:$0xff] }
 0x505   : > { %12940 = vmatpush3.bf16.msra.mxu0 %v14375_v9  ;;  %v16844_v9 = vrot.slane %v16721_v3, 2 }
 0x506   : > { %12965 = vmatprep.subr.bf16.mxu0 %v14376_v43 }
 0x507   : > { %v6005_v37 = vsel %vm3320_vm5, %v16452_v48, %v16844_v9  ;;  %v6007_v41 = vsel %vm3320_vm5, %v16844_v9, %v6006_v7  ;;  %v14378_v48 = vld [vmem:[%s17795_s3 + $0x210] sm:$0xff]  }
 0x508   : > { %12918 = vmatmul.mubr.msk.bf16.gmra.mrb[8].mxu0 %vm2246_vm2, %v16819_v46 }
 0x509   : > { %12921 = vmatprep.mubr.msk.bf16.mxu0 %vm2246_vm2, %v16824_v54 }
 0x510   : > { %12922 = vmatmul.mubr.msk.bf16.gmra.mrb[12].mxu0 %vm2246_vm2, %v16833_v45 }
 0x511   : > { %12925 = vmatprep.mubr.msk.bf16.mxu0 %vm2246_vm2, %v16839_v23 }
 0x518   : > { %12926 = vmatmul.mubr.msk.bf16.gmra.mrb[16].mxu0 %vm2246_vm2, %v6003_v33  ;;  %v14382_v33 = vld [vmem:[%s17795_s3 + $0x230] sm:$0xff]  }
 0x519   : > { %12929 = vmatprep.mubr.msk.bf16.mxu0 %vm2246_vm2, %v6005_v37  ;;  %v18146_v37 = vshll.u32 %v15915_v6, 16 }
 0x51b   : > { %v16932_v7 = vrot.slane %v18146_v37, 1 }
 0x520   : > { %12930 = vmatmul.mubr.msk.bf16.gmra.mrb[20].mxu0 %vm2246_vm2, %v6007_v41  ;;  %v14379_v41 = vld [vmem:[%s17795_s3 + $0x218] sm:$0xff]  }
 0x521   : > { %12941 = vmatprep.mubr.msk.bf16.mxu0 %vm2246_vm2, %v16628_v30  ;;  %v14380_v30 = vld [vmem:[%s17795_s3 + $0x220] sm:$0xff]  }
 0x528   : > { %12942 = vmatmul.mubr.msk.bf16.vlgmr.msra.gmra.mrb[0].mxu0 %vm2246_vm2, %v16641_v8 }
 0x529   : > { %12945 = vmatprep.mubr.msk.bf16.mxu0 %vm2246_vm2, %v16646_v2  ;;  %12966 = vmatpush3.bf16.msra.mxu0 %v14376_v43  ;;  %v14381_v43 = vld [vmem:[%s17795_s3 + $0x228] sm:$0xff]  }
 0x52a   : > { %12967 = vmatprep.subr.bf16.mxu0 %v14377_v11 }
 0x52d   : > { %12968 = vmatpush3.bf16.msra.mxu0 %v14377_v11  ;;  %v14514_v11 = vld [vmem:[#allocation2 + $0x60] sm:$0xff] }
 0x52e   : > { %12969 = vmatprep.subr.bf16.mxu0 %v14378_v48 }
 0x530   : > { %12946 = vmatmul.mubr.msk.bf16.gmra.mrb[4].mxu0 %vm2246_vm2, %v16664_v16 }
 0x531   : > { %12949 = vmatprep.mubr.msk.bf16.mxu0 %vm2246_vm2, %v16667_v49  ;;  %12970 = vmatpush3.bf16.msra.mxu0 %v14378_v48 }
 0x532   : > { %12971 = vmatprep.subr.bf16.mxu0 %v14379_v41 }
 0x535   : > { %12972 = vmatpush3.bf16.msra.mxu0 %v14379_v41 }
 0x536   : > { %12997 = vmatprep.subr.bf16.mxu0 %v14380_v30 }
 0x538   : > { %12950 = vmatmul.mubr.msk.bf16.gmra.mrb[8].mxu0 %vm2246_vm2, %v16686_v56 }
 0x539   : > { %12953 = vmatprep.mubr.msk.bf16.mxu0 %vm2246_vm2, %v16689_v47 }
 0x540   : > { %12954 = vmatmul.mubr.msk.bf16.gmra.mrb[12].mxu0 %vm2246_vm2, %v16702_v21 }
 0x541   : > { %12957 = vmatprep.mubr.msk.bf16.mxu0 %vm2246_vm2, %v16705_v12 }
 0x548   : > { %12958 = vmatmul.mubr.msk.bf16.gmra.mrb[16].mxu0 %vm2246_vm2, %v14514_v11  ;;  %v6768_v11 = vld [vmem:[#allocation2 + $0x18] sm:$0xfe] }
 0x549   : > { %12961 = vmatprep.mubr.msk.bf16.mxu0 %vm2246_vm2, %v16721_v3 }
 0x550   : > { %12962 = vmatmul.mubr.msk.bf16.gmra.mrb[20].mxu0 %vm2246_vm2, %v16890_v35 }
 0x551   : > { %12973 = vmatprep.mubr.msk.bf16.mxu0 %vm2246_vm2, %v16537_v58  ;;  %v14383_v58 = vld [vmem:[%s17795_s3 + $0x238] sm:$0xff]  }
 0x558   : > { %12974 = vmatmul.mubr.msk.bf16.vlgmr.msra.gmra.mrb[0].mxu0 %vm2246_vm2, %v16542_v0  ;;  %v14384_v0 = vld [vmem:[%s17795_s3 + $0x240] sm:$0xff]  }
 0x559   : > { %12977 = vmatprep.mubr.msk.bf16.mxu0 %vm2246_vm2, %v16561_v13  ;;  %12998 = vmatpush3.bf16.msra.mxu0 %v14380_v30  ;;  %v18145_v13 = vshll.u32 %v15910_v63, 16 }
 0x55a   : > { %12999 = vmatprep.subr.bf16.mxu0 %v14381_v43 }
 0x55d   : > { %13000 = vmatpush3.bf16.msra.mxu0 %v14381_v43 }
 0x55e   : > { %13001 = vmatprep.subr.bf16.mxu0 %v14382_v33 }
 0x560   : > { %12978 = vmatmul.mubr.msk.bf16.gmra.mrb[4].mxu0 %vm2246_vm2, %v16566_v14  ;;  %v16922_v14 = vrot.slane %v18145_v13, 1  ;;  %v7043_v13 = vshll.u32 %v6768_v11, 16 }
 0x561   : > { %12981 = vmatprep.mubr.msk.bf16.mxu0 %vm2246_vm2, %v16582_v31  ;;  %13002 = vmatpush3.bf16.msra.mxu0 %v14382_v33  ;;  %v6791_v33 = vrot.slane %v6768_v11, 1 }
 0x562   : > { %13003 = vmatprep.subr.bf16.mxu0 %v14383_v58  ;;  %v6530_v31 = vsel %vm2294_vm3, %v16617_v5, %v16922_v14  ;;  %v6546_v5 = vsel %vm2294_vm3, %v16634_v39, %v16932_v7  ;;  %v14385_v39 = vld [vmem:[%s17795_s3 + $0x248] sm:$0xff]  }
 0x565   : > { %13004 = vmatpush3.bf16.msra.mxu0 %v14383_v58  ;;  %v6793_v58 = vsel %vm2784_vm6, %v6791_v33, %v16644_v28  ;;  %v14387_v28 = vld [vmem:[%s17795_s3 + $0x258] sm:$0xff]  }
 0x566   : > { %13029 = vmatprep.subr.bf16.mxu0 %v14384_v0 }
 0x568   : > { %12982 = vmatmul.mubr.msk.bf16.gmra.mrb[8].mxu0 %vm2246_vm2, %v16587_v50  ;;  %v6445_v50 = vld [vmem:[#allocation2 + $0x78] sm:$0x1] }
 0x569   : > { %12985 = vmatprep.mubr.msk.bf16.mxu0 %vm2246_vm2, %v16600_v15  ;;  %v18147_v15 = vshrl.u32 %v15910_v63, 16  ;;  %v6551_v41 = vshll.u32 %v6445_v50, 16  ;;  %v18148_v63 = vshrl.u32 %v15915_v6, 16  ;;  %v14386_v6 = vld [vmem:[%s17795_s3 + $0x250] sm:$0xff]   ;;  %v6814_v37 = vrot.slane %v6445_v50, 1 }
 0x56a   : > { %v14390_v50 = vld [vmem:[%s17795_s3 + $0x270] sm:$0xff]  }
 0x56b   : > { %v16937_v48 = vor.u32 %v18147_v15, %v16922_v14  ;;  %v6553_v30 = vrot.slane %v6551_v41, 1  ;;  %v16950_v43 = vor.u32 %v18148_v63, %v16932_v7  ;;  %v18149_v41 = vld [vmem:[#allocation10_spill] sm:$0xff] }
 0x570   : > { %12986 = vmatmul.mubr.msk.bf16.gmra.mrb[12].mxu0 %vm2246_vm2, %v16605_v60  ;;  %v6538_v60 = vsel %vm2294_vm3, %v16937_v48, %v16611_v53  ;;  %v6554_v53 = vsel %vm2294_vm3, %v16950_v43, %v6553_v30  ;;  %v14391_v30 = vld [vmem:[%s17795_s3 + $0x278] sm:$0xff]  }
 0x571   : > { %12989 = vmatprep.mubr.msk.bf16.mxu0 %vm2246_vm2, %v6530_v31  ;;  %v7045_v31 = vrot.slane %v7043_v13, 2 }
 0x578   : > { %12990 = vmatmul.mubr.msk.bf16.gmra.mrb[16].mxu0 %vm2246_vm2, %v6538_v60 }
 0x579   : > { %12993 = vmatprep.mubr.msk.bf16.mxu0 %vm2246_vm2, %v6546_v5 }
 0x580   : > { %12994 = vmatmul.mubr.msk.bf16.gmra.mrb[20].mxu0 %vm2246_vm2, %v6554_v53  ;;  %v18151_v53 = vld [vmem:[#allocation42_spill] sm:$0xff] }
 0x581   : > { %13005 = vmatprep.mubr.msk.bf16.mxu0 %vm2246_vm2, %v6793_v58  ;;  %v18152_v58 = vld [vmem:[#allocation43_spill] sm:$0xff] }
 0x588   : > { %13006 = vmatmul.mubr.msk.bf16.vlgmr.msra.gmra.mrb[0].mxu0 %vm2246_vm2, %v16657_v61  ;;  %v14388_v61 = vld [vmem:[%s17795_s3 + $0x260] sm:$0xff]  }
 0x589   : > { %13009 = vmatprep.mubr.msk.bf16.mxu0 %vm2246_vm2, %v16674_v4  ;;  %13030 = vmatpush3.bf16.msra.mxu0 %v14384_v0  ;;  %v16982_v4 = vld [vmem:[#allocation2 + $0x60] sm:$0xff]  ;;  %v16994_v0 = vrot.slane %v16890_v35, 1 }
 0x58a   : > { %13031 = vmatprep.subr.bf16.mxu0 %v14385_v39 }
 0x58b   : > { %v6815_v60 = vsel %vm2784_vm6, %v16994_v0, %v6814_v37 }
 0x58d   : > { %13032 = vmatpush3.bf16.msra.mxu0 %v14385_v39  ;;  %v7313_v39 = vld [vmem:[#allocation2 + $0x18] sm:$0xfc] }
 0x58e   : > { %13033 = vmatprep.subr.bf16.mxu0 %v14386_v6 }
 0x590   : > { %13010 = vmatmul.mubr.msk.bf16.gmra.mrb[4].mxu0 %vm2246_vm2, %v16679_v25  ;;  %v16985_v25 = vrot.slane %v16982_v4, 1 }
 0x591   : > { %13013 = vmatprep.mubr.msk.bf16.mxu0 %vm2246_vm2, %v16693_v42  ;;  %13034 = vmatpush3.bf16.msra.mxu0 %v14386_v6 }
 0x592   : > { %13035 = vmatprep.subr.bf16.mxu0 %v14387_v28  ;;  %v6809_v42 = vsel %vm2784_vm6, %v16708_v62, %v16985_v25 }
 0x595   : > { %13036 = vmatpush3.bf16.msra.mxu0 %v14387_v28  ;;  %v14393_v28 = vld [vmem:[%s17795_s3 + $0x288] sm:$0xff]  }
 0x596   : > { %13061 = vmatprep.subr.bf16.mxu0 %v14388_v61 }
 0x598   : > { %13014 = vmatmul.mubr.msk.bf16.gmra.mrb[8].mxu0 %vm2246_vm2, %v16698_v32  ;;  %v7040_v32 = vshrl.u32 %v6768_v11, 16 }
 0x599   : > { %13017 = vmatprep.mubr.msk.bf16.mxu0 %vm2246_vm2, %v16711_v26  ;;  %v6811_v26 = vsel %vm2784_vm6, %v16985_v25, %v16724_v29 }
 0x59a   : > { %v7042_v62 = vrot.slane %v7040_v32, 1  ;;  %v18156_v32 = vshrl.u32 %v16008_v27, 16 }
 0x59c   : > { %v7046_v15 = vor.u32 %v7045_v31, %v7042_v62  ;;  %v14401_v62 = vld [vmem:[%s17795_s3 + $0x2c8] sm:$0xff]  }
 0x59e   : > { %v7050_v5 = vsel %vm3033_vm4, %v7046_v15, %v18149_v41  ;;  %v18158_v15 = vld [vmem:[#allocation47_spill] sm:$0xff] }
 0x5a0   : > { %13018 = vmatmul.mubr.msk.bf16.gmra.mrb[12].mxu0 %vm2246_vm2, %v16717_v55  ;;  %v6813_v55 = vsel %vm2784_vm6, %v16724_v29, %v16994_v0  ;;  %v14389_v29 = vld [vmem:[%s17795_s3 + $0x268] sm:$0xff]  }
 0x5a1   : > { %13021 = vmatprep.mubr.msk.bf16.mxu0 %vm2246_vm2, %v6809_v42 }
 0x5a8   : > { %13022 = vmatmul.mubr.msk.bf16.gmra.mrb[16].mxu0 %vm2246_vm2, %v6811_v26  ;;  %v18157_v26 = vshrl.u32 %v16000_v36, 16 }
 0x5a9   : > { %13025 = vmatprep.mubr.msk.bf16.mxu0 %vm2246_vm2, %v6813_v55 }
 0x5b0   : > { %13026 = vmatmul.mubr.msk.bf16.gmra.mrb[20].mxu0 %vm2246_vm2, %v6815_v60  ;;  %v18159_v60 = vshll.u32 %v18158_v15, 16 }
 0x5b1   : > { %13037 = vmatprep.mubr.msk.bf16.mxu0 %vm2246_vm2, %v7050_v5  ;;  %v18160_v5 = vld [vmem:[#allocation48_spill] sm:$0xff] }
 0x5b2   : > { %v7831_v41 = vrot.slane %v18159_v60, 1  ;;  %v14521_v60 = vld [vmem:[#allocation2 + $0x40] sm:$0xff] }
 0x5b8   : > { %13038 = vmatmul.mubr.msk.bf16.vlgmr.msra.gmra.mrb[0].mxu0 %vm2246_vm2, %v18135_v34  ;;  %v14392_v34 = vld [vmem:[%s17795_s3 + $0x280] sm:$0xff]  }
 0x5b9   : > { %13041 = vmatprep.mubr.msk.bf16.mxu0 %vm2246_vm2, %v18136_v22  ;;  %13062 = vmatpush3.bf16.msra.mxu0 %v14388_v61  ;;  %v7029_v22 = vld [vmem:[#allocation2 + $0x78] sm:$0x3] }
 0x5ba   : > { %13063 = vmatprep.subr.bf16.mxu0 %v14389_v29  ;;  %v7095_v11 = vshll.u32 %v7029_v22, 16  ;;  %v17125_v61 = vld [vmem:[#allocation2 + $0x78] sm:$0xff] }
 0x5bc   : > { %v7097_v33 = vrot.slane %v7095_v11, 2 }
 0x5bd   : > { %13064 = vmatpush3.bf16.msra.mxu0 %v14389_v29  ;;  %v18161_v29 = vshll.u32 %v18160_v5, 16 }
 0x5be   : > { %13065 = vmatprep.subr.bf16.mxu0 %v14390_v50 }
 0x5c0   : > { %13042 = vmatmul.mubr.msk.bf16.gmra.mrb[4].mxu0 %vm2246_vm2, %v18137_v19  ;;  %v18150_v19 = vld [vmem:[#allocation41_spill] sm:$0xff] }
 0x5c1   : > { %13045 = vmatprep.mubr.msk.bf16.mxu0 %vm2246_vm2, %v18138_v20  ;;  %13066 = vmatpush3.bf16.msra.mxu0 %v14390_v50  ;;  %v7092_v20 = vshrl.u32 %v7029_v22, 16  ;;  %v7839_v50 = vrot.slane %v18161_v29, 1  ;;  %v14407_v29 = vld [vmem:[%s17795_s3 + $0x2f8] sm:$0xff]  }
 0x5c2   : > { %13067 = vmatprep.subr.bf16.mxu0 %v14391_v30 }
 0x5c3   : > { %v7094_v63 = vrot.slane %v7092_v20, 1  ;;  %v14403_v20 = vld [vmem:[%s17795_s3 + $0x2d8] sm:$0xff]  }
 0x5c5   : > { %13068 = vmatpush3.bf16.msra.mxu0 %v14391_v30  ;;  %v18162_v30 = vshrl.u32 %v16011_v57, 16 }
 0x5c6   : > { %13093 = vmatprep.subr.bf16.mxu0 %v14392_v34 }
 0x5c8   : > { %13046 = vmatmul.mubr.msk.bf16.gmra.mrb[8].mxu0 %vm2246_vm2, %v18139_v51  ;;  %v7098_v51 = vor.u32 %v7097_v33, %v7094_v63 }
 0x5c9   : > { %13049 = vmatprep.mubr.msk.bf16.mxu0 %vm2246_vm2, %v18140_v17  ;;  %v7325_v17 = vrot.slane %v7313_v39, 2 }
 0x5cb   : > { %v7327_v6 = vsel %vm3320_vm5, %v7325_v17, %v16780_v10  ;;  %v14395_v10 = vld [vmem:[%s17795_s3 + $0x298] sm:$0xff]  }
 0x5d0   : > { %13050 = vmatmul.mubr.msk.bf16.gmra.mrb[12].mxu0 %vm2246_vm2, %v18141_v18  ;;  %v7099_v18 = vsel %vm3033_vm4, %v15950_v59, %v7098_v51  ;;  %v14394_v59 = vld [vmem:[%s17795_s3 + $0x290] sm:$0xff]   ;;  %v18166_v51 = vld [vmem:[#allocation50_spill] sm:$0xff] }
 0x5d1   : > { %13053 = vmatprep.mubr.msk.bf16.mxu0 %vm2246_vm2, %v18150_v19  ;;  %v18167_v39 = vshll.u32 %v18166_v51, 16 }
 0x5d3   : > { %v7855_v17 = vrot.slane %v18167_v39, 1  ;;  %v8154_v39 = vrot.slane %v17125_v61, 1 }
 0x5d8   : > { %13054 = vmatmul.mubr.msk.bf16.gmra.mrb[16].mxu0 %vm2246_vm2, %v18151_v53 }
 0x5d9   : > { %13057 = vmatprep.mubr.msk.bf16.mxu0 %vm2246_vm2, %v18152_v58  ;;  %v14404_v58 = vld [vmem:[%s17795_s3 + $0x2e0] sm:$0xff]  }
 0x5e0   : > { %13058 = vmatmul.mubr.msk.bf16.gmra.mrb[20].mxu0 %vm2246_vm2, %v7099_v18  ;;  %v18168_v18 = vshrl.u32 %v18160_v5, 16 }
 0x5e1   : > { %13069 = vmatprep.mubr.msk.bf16.mxu0 %vm2246_vm2, %v7327_v6 }
 0x5e2   : > { %v7843_v6 = vor.u32 %v18168_v18, %v7839_v50 }
 0x5e8   : > { %13070 = vmatmul.mubr.msk.bf16.vlgmr.msra.gmra.mrb[0].mxu0 %vm2246_vm2, %v16791_v44  ;;  %v14396_v44 = vld [vmem:[%s17795_s3 + $0x2a0] sm:$0xff]  }
 0x5e9   : > { %13073 = vmatprep.mubr.msk.bf16.mxu0 %vm2246_vm2, %v16804_v40  ;;  %13094 = vmatpush3.bf16.msra.mxu0 %v14392_v34  ;;  %v7343_v40 = vsel %vm3320_vm5, %v16830_v52, %v16167_v38  ;;  %v14398_v52 = vld [vmem:[%s17795_s3 + $0x2b0] sm:$0xff]  }
 0x5ea   : > { %13095 = vmatprep.subr.bf16.mxu0 %v14393_v28 }
 0x5ed   : > { %13096 = vmatpush3.bf16.msra.mxu0 %v14393_v28 }
 0x5ee   : > { %13097 = vmatprep.subr.bf16.mxu0 %v14394_v59 }
 0x5f0   : > { %13074 = vmatmul.mubr.msk.bf16.gmra.mrb[4].mxu0 %vm2246_vm2, %v16809_v1  ;;  %v7345_v1 = vsel %vm3320_vm5, %v16167_v38, %v16844_v9  ;;  %v14397_v38 = vld [vmem:[%s17795_s3 + $0x2a8] sm:$0xff]  }
 0x5f1   : > { %13077 = vmatprep.mubr.msk.bf16.mxu0 %vm2246_vm2, %v16819_v46  ;;  %13098 = vmatpush3.bf16.msra.mxu0 %v14394_v59  ;;  %v7347_v46 = vsel %vm3320_vm5, %v16844_v9, %v16186_v24 }
 0x5f2   : > { %13099 = vmatprep.subr.bf16.mxu0 %v14395_v10 }
 0x5f5   : > { %13100 = vmatpush3.bf16.msra.mxu0 %v14395_v10 }
 0x5f6   : > { %13125 = vmatprep.subr.bf16.mxu0 %v14396_v44 }
 0x5f8   : > { %13078 = vmatmul.mubr.msk.bf16.gmra.mrb[8].mxu0 %vm2246_vm2, %v16824_v54  ;;  %v7348_v54 = vrot.slane %v7029_v22, 2  ;;  %v18163_v22 = vshrl.u32 %v18158_v15, 16  ;;  %v14406_v15 = vld [vmem:[%s17795_s3 + $0x2f0] sm:$0xff]  }
 0x5f9   : > { %13081 = vmatprep.mubr.msk.bf16.mxu0 %vm2246_vm2, %v16833_v45 }
 0x5fa   : > { %v7349_v45 = vsel %vm3320_vm5, %v16186_v24, %v7348_v54  ;;  %v7835_v19 = vor.u32 %v18163_v22, %v7831_v41  ;;  %v18172_v54 = vshrl.u32 %v18166_v51, 16  ;;  %v14523_v22 = vld [vmem:[#allocation2 + $0x50] sm:$0xff] }
 0x5fc   : > { %v7840_v63 = vsel %vm2294_vm3, %v7835_v19, %v7839_v50  ;;  %v8144_v19 = vrot.slane %v14523_v22, 1 }
 0x600   : > { %13082 = vmatmul.mubr.msk.bf16.gmra.mrb[12].mxu0 %vm2246_vm2, %v16839_v23 }
 0x601   : > { %13085 = vmatprep.mubr.msk.bf16.mxu0 %vm2246_vm2, %v7343_v40  ;;  %v18170_v40 = vld [vmem:[#allocation51_spill] sm:$0xff] }
 0x608   : > { %13086 = vmatmul.mubr.msk.bf16.gmra.mrb[16].mxu0 %vm2246_vm2, %v7345_v1  ;;  %v18171_v1 = vshll.u32 %v18170_v40, 16 }
 0x609   : > { %13089 = vmatprep.mubr.msk.bf16.mxu0 %vm2246_vm2, %v7347_v46 }
 0x60a   : > { %v7871_v46 = vrot.slane %v18171_v1, 1  ;;  %v18177_v1 = vld [vmem:[#allocation54_spill] sm:$0xff] }
 0x610   : > { %13090 = vmatmul.mubr.msk.bf16.gmra.mrb[20].mxu0 %vm2246_vm2, %v7349_v45  ;;  %v7859_v45 = vor.u32 %v18172_v54, %v7855_v17  ;;  %v18178_v54 = vld [vmem:[#allocation55_spill] sm:$0xff] }
 0x611   : > { %13101 = vmatprep.mubr.msk.bf16.mxu0 %vm2246_vm2, %v16641_v8  ;;  %v14399_v8 = vld [vmem:[%s17795_s3 + $0x2b8] sm:$0xff]  }
 0x618   : > { %13102 = vmatmul.mubr.msk.bf16.vlgmr.msra.gmra.mrb[0].mxu0 %vm2246_vm2, %v16646_v2  ;;  %v14400_v2 = vld [vmem:[%s17795_s3 + $0x2c0] sm:$0xff]  }
 0x619   : > { %13105 = vmatprep.mubr.msk.bf16.mxu0 %vm2246_vm2, %v16664_v16  ;;  %13126 = vmatpush3.bf16.msra.mxu0 %v14396_v44 }
 0x61a   : > { %13127 = vmatprep.subr.bf16.mxu0 %v14397_v38 }
 0x61d   : > { %13128 = vmatpush3.bf16.msra.mxu0 %v14397_v38  ;;  %v7864_v38 = vsel %vm2294_vm3, %v7859_v45, %v16922_v14  ;;  %v18179_v45 = vld [vmem:[#allocation56_spill] sm:$0xff] }
 0x61e   : > { %13129 = vmatprep.subr.bf16.mxu0 %v14398_v52 }
 0x620   : > { %13106 = vmatmul.mubr.msk.bf16.gmra.mrb[4].mxu0 %vm2246_vm2, %v16667_v49 }
 0x621   : > { %13109 = vmatprep.mubr.msk.bf16.mxu0 %vm2246_vm2, %v16686_v56  ;;  %13130 = vmatpush3.bf16.msra.mxu0 %v14398_v52  ;;  %v7775_v56 = vld [vmem:[#allocation2 + $0x20] sm:$0xff]  ;;  %v7872_v52 = vsel %vm2294_vm3, %v16937_v48, %v7871_v46 }
 0x622   : > { %13131 = vmatprep.subr.bf16.mxu0 %v14399_v8  ;;  %v7800_v16 = vshll.u32 %v7775_v56, 16  ;;  %v7798_v23 = vshrl.u32 %v7775_v56, 16 }
 0x624   : > { %v7802_v49 = vrot.slane %v7800_v16, 1  ;;  %v18175_v16 = vshrl.u32 %v18170_v40, 16 }
 0x625   : > { %13132 = vmatpush3.bf16.msra.mxu0 %v14399_v8  ;;  %v18173_v8 = vld [vmem:[#allocation52_spill] sm:$0xff] }
 0x626   : > { %13157 = vmatprep.subr.bf16.mxu0 %v14400_v2 }
 0x628   : > { %13110 = vmatmul.mubr.msk.bf16.gmra.mrb[8].mxu0 %vm2246_vm2, %v16689_v47  ;;  %v18153_v47 = vshll.u32 %v16008_v27, 16 }
 0x629   : > { %13113 = vmatprep.mubr.msk.bf16.mxu0 %vm2246_vm2, %v16702_v21  ;;  %v7803_v21 = vor.u32 %v7802_v49, %v7798_v23  ;;  %v7875_v49 = vor.u32 %v18175_v16, %v7871_v46  ;;  %v17193_v23 = vld [vmem:[#allocation2 + $0x80] sm:$0x1]  ;;  %v18183_v16 = vld [vmem:[#allocation60_spill] sm:$0xff] }
 0x62a   : > { %v7807_v9 = vrot.slane %v18153_v47, 1  ;;  %v7893_v14 = vshll.u32 %v17193_v23, 16 }
 0x62b   : > { %v7880_v47 = vsel %vm2294_vm3, %v7875_v49, %v16932_v7  ;;  %v18184_v49 = vld [vmem:[#allocation61_spill] sm:$0xff] }
 0x62c   : > { %v7811_v13 = vor.u32 %v18156_v32, %v7807_v9 }
 0x630   : > { %13114 = vmatmul.mubr.msk.bf16.gmra.mrb[12].mxu0 %vm2246_vm2, %v16705_v12  ;;  %v7808_v12 = vsel %vm2294_vm3, %v7803_v21, %v7807_v9  ;;  %v18176_v9 = vshrl.u32 %v18173_v8, 16 }
 0x631   : > { %13117 = vmatprep.mubr.msk.bf16.mxu0 %vm2246_vm2, %v16982_v4 }
 0x638   : > { %13118 = vmatmul.mubr.msk.bf16.gmra.mrb[16].mxu0 %vm2246_vm2, %v16721_v3  ;;  %v18154_v3 = vshll.u32 %v16000_v36, 16  ;;  %v14402_v36 = vld [vmem:[%s17795_s3 + $0x2d0] sm:$0xff]  }
 0x639   : > { %13121 = vmatprep.mubr.msk.bf16.mxu0 %vm2246_vm2, %v16890_v35  ;;  %v18155_v35 = vshll.u32 %v16011_v57, 16  ;;  %v18164_v57 = vld [vmem:[#allocation49_spill] sm:$0xff] }
 0x63a   : > { %v7815_v4 = vrot.slane %v18154_v3, 1  ;;  %v18165_v33 = vshll.u32 %v18164_v57, 16  ;;  %v18169_v28 = vshrl.u32 %v18164_v57, 16  ;;  %v8110_v3 = vld [vmem:[#allocation2 + $0x20] sm:$0xfe] }
 0x63b   : > { %v7823_v42 = vrot.slane %v18155_v35, 1  ;;  %v8385_v18 = vshll.u32 %v8110_v3, 16 }
 0x63c   : > { %v7819_v55 = vor.u32 %v18157_v26, %v7815_v4  ;;  %v7816_v31 = vsel %vm2294_vm3, %v7811_v13, %v7815_v4  ;;  %v7847_v53 = vrot.slane %v18165_v33, 1  ;;  %v14518_v4 = vld [vmem:[#allocation2 + $0x28] sm:$0xff]  ;;  %v14519_v13 = vld [vmem:[#allocation2 + $0x30] sm:$0xff]  ;;  %v14520_v26 = vld [vmem:[#allocation2 + $0x38] sm:$0xff] }
 0x63d   : > { %v7827_v34 = vor.u32 %v18162_v30, %v7823_v42  ;;  %v8134_v35 = vrot.slane %v14518_v4, 1  ;;  %v14525_v33 = vld [vmem:[#allocation2 + $0x68] sm:$0xff] }
 0x63e   : > { %v7824_v37 = vsel %vm2294_vm3, %v7819_v55, %v7823_v42  ;;  %v7851_v59 = vor.u32 %v18169_v28, %v7847_v53  ;;  %v7848_v10 = vsel %vm2294_vm3, %v7843_v6, %v7847_v53  ;;  %v8133_v42 = vrot.slane %v8110_v3, 1 }
 0x63f   : > { %v7832_v11 = vsel %vm2294_vm3, %v7827_v34, %v7831_v41  ;;  %v8138_v55 = vrot.slane %v14520_v26, 1  ;;  %v8140_v41 = vrot.slane %v14521_v60, 1  ;;  %v14408_v34 = vld [vmem:[%s17795_s3 + $0x300] sm:$0xff]   ;;  %v8150_v53 = vrot.slane %v14525_v33, 1  ;;  %v18197_v60 = vld [vmem:[#allocation73_spill] sm:$0xff]  ;;  %v18201_v33 = vld [vmem:[#allocation12_spill] sm:$0xff] }
 0x640   : > { %13122 = vmatmul.mubr.msk.bf16.gmra.mrb[20].mxu0 %vm2246_vm2, %v17125_v61  ;;  %v7856_v44 = vsel %vm2294_vm3, %v7851_v59, %v7855_v17  ;;  %v8135_v7 = vsel %vm2784_vm6, %v8133_v42, %v8134_v35  ;;  %v8382_v17 = vshrl.u32 %v8110_v3, 16  ;;  %v8155_v28 = vsel %vm2784_vm6, %v16994_v0, %v8154_v39  ;;  %v18187_v3 = vld [vmem:[#allocation65_spill] sm:$0xff]  ;;  %v18190_v26 = vld [vmem:[#allocation66_spill] sm:$0xff] }
 0x641   : > { %13133 = vmatprep.mubr.msk.bf16.mxu0 %vm2246_vm2, %v7808_v12  ;;  %v7895_v12 = vrot.slane %v7893_v14, 1  ;;  %v8141_v50 = vsel %vm2784_vm6, %v8138_v55, %v8140_v41  ;;  %v8151_v51 = vsel %vm2784_vm6, %v16985_v25, %v8150_v53  ;;  %v8153_v6 = vsel %vm2784_vm6, %v8150_v53, %v16994_v0  ;;  %v14409_v0 = vld [vmem:[%s17795_s3 + $0x308] sm:$0xff]  }
 0x642   : > { %v8384_v59 = vrot.slane %v8382_v17, 1 }
 0x648   : > { %13134 = vmatmul.mubr.msk.bf16.vlgmr.msra.gmra.mrb[0].mxu0 %vm2246_vm2, %v7816_v31 }
 0x649   : > { %13137 = vmatprep.mubr.msk.bf16.mxu0 %vm2246_vm2, %v7824_v37  ;;  %13158 = vmatpush3.bf16.msra.mxu0 %v14400_v2  ;;  %v18174_v2 = vshll.u32 %v18173_v8, 16  ;;  %v18180_v8 = vld [vmem:[#allocation57_spill] sm:$0xff] }
 0x64a   : > { %13159 = vmatprep.subr.bf16.mxu0 %v14401_v62 }
 0x64b   : > { %v7887_v56 = vrot.slane %v18174_v2, 1  ;;  %v18181_v2 = vld [vmem:[#allocation58_spill] sm:$0xff] }
 0x64d   : > { %13160 = vmatpush3.bf16.msra.mxu0 %v14401_v62  ;;  %v7888_v48 = vsel %vm2294_vm3, %v16950_v43, %v7887_v56  ;;  %v7891_v21 = vor.u32 %v18176_v9, %v7887_v56  ;;  %v8136_v43 = vrot.slane %v14519_v13, 1  ;;  %v14405_v62 = vld [vmem:[%s17795_s3 + $0x2e8] sm:$0xff]   ;;  %v18189_v13 = vrot.slane %v16008_v27, 2 }
 0x64e   : > { %13161 = vmatprep.subr.bf16.mxu0 %v14402_v36  ;;  %v18182_v56 = vld [vmem:[#allocation59_spill] sm:$0xff] }
 0x64f   : > { %v7896_v32 = vsel %vm2294_vm3, %v7891_v21, %v7895_v12  ;;  %v8137_v31 = vsel %vm2784_vm6, %v8134_v35, %v8136_v43  ;;  %v8139_v37 = vsel %vm2784_vm6, %v8136_v43, %v8138_v55  ;;  %v18186_v12 = vld [vmem:[#allocation64_spill] sm:$0xff]  ;;  %v8655_v35 = vld [vmem:[#allocation2 + $0x20] sm:$0xfc]  ;;  %v18191_v55 = vld [vmem:[#allocation67_spill] sm:$0xff] }
 0x650   : > { %13138 = vmatmul.mubr.msk.bf16.gmra.mrb[4].mxu0 %vm2246_vm2, %v7832_v11  ;;  %v8667_v42 = vrot.slane %v8655_v35, 2  ;;  %v18195_v27 = vld [vmem:[#allocation71_spill] sm:$0xff] }
 0x651   : > { %13141 = vmatprep.mubr.msk.bf16.mxu0 %vm2246_vm2, %v7840_v63  ;;  %13162 = vmatpush3.bf16.msra.mxu0 %v14402_v36  ;;  %v14522_v36 = vld [vmem:[#allocation2 + $0x48] sm:$0xff] }
 0x652   : > { %13163 = vmatprep.subr.bf16.mxu0 %v14403_v20  ;;  %v8142_v5 = vrot.slane %v14522_v36, 1  ;;  %v8669_v43 = vsel %vm3320_vm5, %v8667_v42, %v18189_v13  ;;  %v18198_v36 = vld [vmem:[#allocation74_spill] sm:$0xff] }
 0x654   : > { %v8143_v30 = vsel %vm2784_vm6, %v8140_v41, %v8142_v5  ;;  %v8145_v63 = vsel %vm2784_vm6, %v8142_v5, %v8144_v19  ;;  %v8688_v41 = vrot.slane %v17125_v61, 2 }
 0x655   : > { %13164 = vmatpush3.bf16.msra.mxu0 %v14403_v20  ;;  %v14524_v20 = vld [vmem:[#allocation2 + $0x58] sm:$0xff] }
 0x656   : > { %13189 = vmatprep.subr.bf16.mxu0 %v14404_v58  ;;  %v8146_v11 = vrot.slane %v14524_v20, 1  ;;  %v8689_v5 = vsel %vm3320_vm5, %v16186_v24, %v8688_v41  ;;  %v18199_v24 = vld [vmem:[#allocation9_spill] sm:$0xff] }
 0x657   : > { %v18200_v20 = vld [vmem:[#allocation5_spill] sm:$0xff] }
 0x658   : > { %13142 = vmatmul.mubr.msk.bf16.gmra.mrb[8].mxu0 %vm2246_vm2, %v7848_v10  ;;  %v8147_v57 = vsel %vm2784_vm6, %v8144_v19, %v8146_v11  ;;  %v8387_v10 = vrot.slane %v8385_v18, 2 }
 0x659   : > { %13145 = vmatprep.mubr.msk.bf16.mxu0 %vm2246_vm2, %v7856_v44 }
 0x65a   : > { %v8388_v44 = vor.u32 %v8387_v10, %v8384_v59 }
 0x65c   : > { %v8392_v46 = vsel %vm3033_vm4, %v8388_v44, %v18177_v1  ;;  %v18203_v1 = vld [vmem:[#allocation22_spill] sm:$0xff] }
 0x660   : > { %13146 = vmatmul.mubr.msk.bf16.gmra.mrb[12].mxu0 %vm2246_vm2, %v7864_v38  ;;  %v14410_v38 = vld [vmem:[%s17795_s3 + $0x310] sm:$0xff]  }
 0x661   : > { %13149 = vmatprep.mubr.msk.bf16.mxu0 %vm2246_vm2, %v7872_v52  ;;  %v14411_v52 = vld [vmem:[%s17795_s3 + $0x318] sm:$0xff]  }
 0x668   : > { %13150 = vmatmul.mubr.msk.bf16.gmra.mrb[16].mxu0 %vm2246_vm2, %v7880_v47  ;;  %v18185_v47 = vld [vmem:[#allocation63_spill] sm:$0xff] }
 0x669   : > { %13153 = vmatprep.mubr.msk.bf16.mxu0 %vm2246_vm2, %v7888_v48 }
 0x670   : > { %13154 = vmatmul.mubr.msk.bf16.gmra.mrb[20].mxu0 %vm2246_vm2, %v7896_v32  ;;  %v18188_v32 = vld [vmem:[#allocation62_spill] sm:$0xff] }
 0x671   : > { %13165 = vmatprep.mubr.msk.bf16.mxu0 %vm2246_vm2, %v8135_v7 }
 0x678   : > { %13166 = vmatmul.mubr.msk.bf16.vlgmr.msra.gmra.mrb[0].mxu0 %vm2246_vm2, %v8137_v31  ;;  %v18193_v31 = vld [vmem:[#allocation69_spill] sm:$0xff] }
 0x679   : > { %13169 = vmatprep.mubr.msk.bf16.mxu0 %vm2246_vm2, %v8139_v37  ;;  %13190 = vmatpush3.bf16.msra.mxu0 %v14404_v58  ;;  %v8149_v58 = vsel %vm2784_vm6, %v8146_v11, %v16985_v25  ;;  %v8156_v25 = vrot.slane %v17193_v23, 1  ;;  %v8371_v23 = vld [vmem:[#allocation2 + $0x80] sm:$0x3] }
 0x67a   : > { %13191 = vmatprep.subr.bf16.mxu0 %v14405_v62  ;;  %v8434_v14 = vshrl.u32 %v8371_v23, 16  ;;  %v8437_v48 = vshll.u32 %v8371_v23, 16  ;;  %v18194_v37 = vld [vmem:[#allocation70_spill] sm:$0xff] }
 0x67b   : > { %v8157_v40 = vsel %vm2784_vm6, %v8154_v39, %v8156_v25  ;;  %v18202_v39 = vld [vmem:[#allocation14_spill] sm:$0xff] }
 0x67c   : > { %v8436_v9 = vrot.slane %v8434_v14, 1  ;;  %v8439_v21 = vrot.slane %v8437_v48, 2  ;;  %v18207_v48 = vmov 0  }
 0x67d   : > { %13192 = vmatpush3.bf16.msra.mxu0 %v14405_v62  ;;  %v18192_v62 = vld [vmem:[#allocation68_spill] sm:$0xff] }
 0x67e   : > { %13193 = vmatprep.subr.bf16.mxu0 %v14406_v15  ;;  %v8440_v4 = vor.u32 %v8439_v21, %v8436_v9 }
 0x680   : > { %13170 = vmatmul.mubr.msk.bf16.gmra.mrb[4].mxu0 %vm2246_vm2, %v8141_v50  ;;  %v8441_v7 = vsel %vm3033_vm4, %v18188_v32, %v8440_v4  ;;  %v18208_v32 = vld [vmem:[#allocation32_spill] sm:$0xff] }
 0x681   : > { %13173 = vmatprep.mubr.msk.bf16.mxu0 %vm2246_vm2, %v8143_v30  ;;  %13194 = vmatpush3.bf16.msra.mxu0 %v14406_v15  ;;  %v18196_v15 = vld [vmem:[#allocation72_spill] sm:$0xff]  ;;  %v14414_v30 = vld [vmem:[%s17797_s5 + $0x4] ss:$8 sps:$4 sm:$0xff]  }
 0x682   : > { %13195 = vmatprep.subr.bf16.mxu0 %v14407_v29  ;;  %11786 = vmatprep.mubr.msk.bf16.mxu1 %vm2246_vm2, %v14414_v30 }
 0x685   : > { %13196 = vmatpush3.bf16.msra.mxu0 %v14407_v29  ;;  %v8690_v29 = vrot.slane %v8371_v23, 2  ;;  %v18206_v23 = vld [vmem:[#allocation26_spill] sm:$0xff] }
 0x686   : > { %13221 = vmatprep.subr.bf16.mxu0 %v14408_v34 }
 0x687   : > { %v8691_v50 = vsel %vm3320_vm5, %v8688_v41, %v8690_v29  ;;  %v18211_v41 = vld [vmem:[#allocation38_spill] sm:$0xff] }
 0x688   : > { %13174 = vmatmul.mubr.msk.bf16.gmra.mrb[8].mxu0 %vm2246_vm2, %v8145_v63 }
 0x689   : > { %13177 = vmatprep.mubr.msk.bf16.mxu0 %vm2246_vm2, %v8147_v57 }
 0x690   : > { %13178 = vmatmul.mubr.msk.bf16.gmra.mrb[12].mxu0 %vm2246_vm2, %v8149_v58 }
 0x691   : > { %13181 = vmatprep.mubr.msk.bf16.mxu0 %vm2246_vm2, %v8151_v51 }
 0x698   : > { %13182 = vmatmul.mubr.msk.bf16.gmra.mrb[16].mxu0 %vm2246_vm2, %v8153_v6 }
 0x699   : > { %13185 = vmatprep.mubr.msk.bf16.mxu0 %vm2246_vm2, %v8155_v28 }
 0x6a0   : > { %13186 = vmatmul.mubr.msk.bf16.gmra.mrb[20].mxu0 %vm2246_vm2, %v8157_v40 }
 0x6a1   : > { %13197 = vmatprep.mubr.msk.bf16.mxu0 %vm2246_vm2, %v8392_v46 }
 0x6a8   : > { %13198 = vmatmul.mubr.msk.bf16.vlgmr.msra.gmra.mrb[0].mxu0 %vm2246_vm2, %v18178_v54 }
 0x6a9   : > { %13201 = vmatprep.mubr.msk.bf16.mxu0 %vm2246_vm2, %v18179_v45  ;;  %13222 = vmatpush3.bf16.msra.mxu0 %v14408_v34  ;;  %v17318_v34 = vld [vmem:[%s17796_s4] ss:$0 sm:$0xff]  ;;  %v18204_v45 = vld [vmem:[#allocation19_spill] sm:$0xff] }
 0x6aa   : > { %13223 = vmatprep.subr.bf16.mxu0 %v14409_v0 }
 0x6ad   : > { %13224 = vmatpush3.bf16.msra.mxu0 %v14409_v0 }
 0x6ae   : > { %13225 = vmatprep.subr.bf16.mxu0 %v14410_v38 }
 0x6b0   : > { %13202 = vmatmul.mubr.msk.bf16.gmra.mrb[4].mxu0 %vm2246_vm2, %v18180_v8 }
 0x6b1   : > { %13205 = vmatprep.mubr.msk.bf16.mxu0 %vm2246_vm2, %v18181_v2  ;;  %13226 = vmatpush3.bf16.msra.mxu0 %v14410_v38  ;;  %v18205_v2 = vld [vmem:[#allocation21_spill] sm:$0xff] }
 0x6b2   : > { %13227 = vmatprep.subr.bf16.mxu0 %v14411_v52 }
 0x6b5   : > { %13228 = vmatpush3.bf16.msra.mxu0 %v14411_v52 }
 0x6b8   : > { %13206 = vmatmul.mubr.msk.bf16.gmra.mrb[8].mxu0 %vm2246_vm2, %v18182_v56 }
 0x6b9   : > { %13209 = vmatprep.mubr.msk.bf16.mxu0 %vm2246_vm2, %v18183_v16 }
 0x6c0   : > { %13210 = vmatmul.mubr.msk.bf16.gmra.mrb[12].mxu0 %vm2246_vm2, %v18184_v49 }
 0x6c1   : > { %13213 = vmatprep.mubr.msk.bf16.mxu0 %vm2246_vm2, %v18185_v47 }
 0x6c8   : > { %13214 = vmatmul.mubr.msk.bf16.gmra.mrb[16].mxu0 %vm2246_vm2, %v18186_v12 }
 0x6c9   : > { %13217 = vmatprep.mubr.msk.bf16.mxu0 %vm2246_vm2, %v18187_v3 }
 0x6d0   : > { %13218 = vmatmul.mubr.msk.bf16.gmra.mrb[20].mxu0 %vm2246_vm2, %v8441_v7 }
 0x6d1   : > { %13229 = vmatprep.mubr.msk.bf16.mxu0 %vm2246_vm2, %v8669_v43 }
 0x6d8   : > { %13230 = vmatmul.mubr.msk.bf16.vlgmr.msra.gmra.mrb[0].mxu0 %vm2246_vm2, %v18190_v26  ;;  %v18209_v26 = vld [vmem:[#allocation35_spill] sm:$0xff] }
 0x6d9   : > { %13233 = vmatprep.mubr.msk.bf16.mxu0 %vm2246_vm2, %v18191_v55 }
 0x6e0   : > { %13234 = vmatmul.mubr.msk.bf16.gmra.mrb[4].mxu0 %vm2246_vm2, %v18192_v62 }
 0x6e1   : > { %13237 = vmatprep.mubr.msk.bf16.mxu0 %vm2246_vm2, %v18193_v31 }
 0x6e8   : > { %13238 = vmatmul.mubr.msk.bf16.gmra.mrb[8].mxu0 %vm2246_vm2, %v18194_v37  ;;  %v18210_v37 = vld [vmem:[#allocation37_spill] sm:$0xff] }
 0x6e9   : > { %13241 = vmatprep.mubr.msk.bf16.mxu0 %vm2246_vm2, %v18195_v27 }
 0x6f0   : > { %13242 = vmatmul.mubr.msk.bf16.gmra.mrb[12].mxu0 %vm2246_vm2, %v18196_v15 }
 0x6f1   : > { %13245 = vmatprep.mubr.msk.bf16.mxu0 %vm2246_vm2, %v18197_v60 }
 0x6f8   : > { %13246 = vmatmul.mubr.msk.bf16.gmra.mrb[16].mxu0 %vm2246_vm2, %v18198_v36 }
 0x6f9   : > { %13249 = vmatprep.mubr.msk.bf16.mxu0 %vm2246_vm2, %v8689_v5 }
 0x700   : > { %13250 = vmatmul.mubr.msk.bf16.gmra.mrb[20].mxu0 %vm2246_vm2, %v8691_v50 }
 0x7ab   : > { %v13231_v61 = vpop.f32.mrb[0].mxu0 }
 0x7ac   : > { %v13442_v22 = vadd.f32 %v13231_v61, %v18199_v24  ;;  %v8786_v19 = vpop.f32.mrb[1].mxu0 }
 0x7ad   : > { %v13443_v11 = vadd.f32 %v8786_v19, %v18200_v20  ;;  %v13232_v63 = vpop.f32.mrb[2].mxu0  ;;  %v18212_v20 = vld [vmem:[#allocation39_spill] sm:$0xff] }
 0x7ae   : > { %v8914_v57 = vadd.f32 %v13442_v22, %v17318_v34  ;;  %v13444_v53 = vadd.f32 %v13232_v63, %v18201_v33  ;;  %v8789_v58 = vpop.f32.mrb[3].mxu0  ;;  %v18213_v33 = vld [vmem:[#allocation40_spill] sm:$0xff] }
 0x7af   : > { %v8912_v51 = vadd.f32 %v13443_v11, %v17318_v34  ;;  %v13445_v17 = vadd.f32 %v8789_v58, %v18202_v39  ;;  %v18214_v39 = vld [vmem:[#allocation45_spill] sm:$0xff] }
 0x7b0   : > { %v8915_v18 = vadd.f32 %v13444_v53, %v17318_v34  ;;  %v8938_v28 = vmax.f32 %v8914_v57, 0.0 }
 0x7b1   : > { %v8913_v6 = vadd.f32 %v13445_v17, %v17318_v34  ;;  %v8936_v10 = vmax.f32 %v8912_v51, 0.0 }
 0x7b2   : > { %v8939_v59 = vmax.f32 %v8915_v18, 0.0 }
 0x7b3   : > { %v8937_v25 = vmax.f32 %v8913_v6, 0.0  ;;  %v13235_v44 = vpop.f32.mrb[4].mxu0 }
 0x7b4   : > { %v17328_v40 = vpack.c.bf16 %v8939_v59, %v8938_v28  ;;  %v13446_v46 = vadd.f32 %v13235_v44, %v18203_v1  ;;  %v8802_v0 = vpop.f32.mrb[5].mxu0  ;;  %v18215_v28 = vld [vmem:[#allocation46_spill] sm:$0xff] }
 0x7b5   : > { %v17331_v54 = vpack.c.bf16 %v8937_v25, %v8936_v10  ;;  %v13447_v38 = vadd.f32 %v8802_v0, %v18204_v45  ;;  %v13236_v52 = vpop.f32.mrb[6].mxu0 }
 0x7b6   : > { %v8918_v8 = vadd.f32 %v13446_v46, %v17318_v34  ;;  %v13448_v56 = vadd.f32 %v13236_v52, %v18205_v2  ;;  %v8805_v16 = vpop.f32.mrb[7].mxu0  ;;  %v18216_v52 = vld [vmem:[#allocation44_spill] sm:$0xff] }
 0x7b7   : > { %v8916_v49 = vadd.f32 %v13447_v38, %v17318_v34  ;;  %v13449_v47 = vadd.f32 %v8805_v16, %v18206_v23  ;;  %9015 = vmatpush1.bf16.msra.mxu1 %v17331_v54  ;;  %v18217_v16 = vld [vmem:[#allocation53_spill] sm:$0xff] }
 0x7b8   : > { %v8919_v14 = vadd.f32 %v13448_v56, %v17318_v34  ;;  %9016 = vmatprep.subr.bf16.mxu1 %v18207_v48  ;;  %v8942_v21 = vmax.f32 %v8918_v8, 0.0 }
 0x7b9   : > { %v8917_v9 = vadd.f32 %v13449_v47, %v17318_v34  ;;  %v8940_v3 = vmax.f32 %v8916_v49, 0.0 }
 0x7ba   : > { %v8943_v12 = vmax.f32 %v8919_v14, 0.0  ;;  %v18218_v14 = vld [vmem:[#allocation75_spill] sm:$0xff] }
 0x7bb   : > { %v8941_v4 = vmax.f32 %v8917_v9, 0.0  ;;  %v13239_v35 = vpop.f32.mrb[8].mxu0  ;;  %9017 = vmatpush1.bf16.msra.mxu1 %v17328_v40 }
 0x7bc   : > { %v17343_v42 = vpack.c.bf16 %v8943_v12, %v8942_v21  ;;  %v13450_v7 = vadd.f32 %v13239_v35, %v18208_v32  ;;  %v8818_v13 = vpop.f32.mrb[9].mxu0  ;;  %9018 = vmatprep.subr.bf16.mxu1 %v18207_v48 }
 0x7bd   : > { %v17347_v43 = vpack.c.bf16 %v8941_v4, %v8940_v3  ;;  %v13451_v55 = vadd.f32 %v8818_v13, %v18209_v26  ;;  %v13240_v62 = vpop.f32.mrb[10].mxu0  ;;  %v18219_v3 = vld [vmem:[#allocation76_spill] sm:$0xff] }
 0x7be   : > { %v8922_v31 = vadd.f32 %v13450_v7, %v17318_v34  ;;  %v13452_v27 = vadd.f32 %v13240_v62, %v18210_v37  ;;  %v8821_v15 = vpop.f32.mrb[11].mxu0  ;;  %v18220_v37 = vld [vmem:[#allocation77_spill] sm:$0xff] }
 0x7bf   : > { %v8920_v60 = vadd.f32 %v13451_v55, %v17318_v34  ;;  %v13453_v36 = vadd.f32 %v8821_v15, %v18211_v41  ;;  %9019 = vmatpush1.bf16.msra.mxu1 %v17347_v43  ;;  %v18221_v41 = vld [vmem:[#allocation78_spill] sm:$0xff] }
 0x7c0   : > { %v8923_v5 = vadd.f32 %v13452_v27, %v17318_v34  ;;  %9020 = vmatprep.subr.bf16.mxu1 %v18207_v48  ;;  %v8946_v50 = vmax.f32 %v8922_v31, 0.0 }
 0x7c1   : > { %v8921_v29 = vadd.f32 %v13453_v36, %v17318_v34  ;;  %v8944_v61 = vmax.f32 %v8920_v60, 0.0 }
 0x7c2   : > { %v8947_v30 = vmax.f32 %v8923_v5, 0.0 }
 0x7c3   : > { %v8945_v24 = vmax.f32 %v8921_v29, 0.0  ;;  %v13243_v22 = vpop.f32.mrb[12].mxu0  ;;  %9021 = vmatpush1.bf16.msra.mxu1 %v17343_v42 }
 0x7c4   : > { %v17359_v19 = vpack.c.bf16 %v8947_v30, %v8946_v50  ;;  %v13454_v11 = vadd.f32 %v13243_v22, %v18212_v20  ;;  %v8834_v63 = vpop.f32.mrb[13].mxu0  ;;  %9022 = vmatprep.subr.bf16.mxu1 %v18207_v48  ;;  %v18222_v50 = vld [vmem:[#allocation79_spill] sm:$0xff]  ;;  %v18223_v22 = vld [vmem:[#allocation80_spill] sm:$0xff] }
 0x7c5   : > { %v17363_v57 = vpack.c.bf16 %v8945_v24, %v8944_v61  ;;  %v13455_v53 = vadd.f32 %v8834_v63, %v18213_v33  ;;  %v13244_v58 = vpop.f32.mrb[14].mxu0 }
 0x7c6   : > { %v8926_v51 = vadd.f32 %v13454_v11, %v17318_v34  ;;  %v13456_v17 = vadd.f32 %v13244_v58, %v18214_v39  ;;  %v8837_v18 = vpop.f32.mrb[15].mxu0 }
 0x7c7   : > { %v8924_v6 = vadd.f32 %v13455_v53, %v17318_v34  ;;  %v13457_v59 = vadd.f32 %v8837_v18, %v18215_v28  ;;  %9023 = vmatpush1.bf16.msra.mxu1 %v17363_v57  ;;  %v14417_v18 = vld [vmem:[%s17797_s5 + $0x14] ss:$8 sps:$4 sm:$0xff]   ;;  %v14420_v28 = vld [vmem:[%s17797_s5 + $0x24] ss:$8 sps:$4 sm:$0xff]  }
 0x7c8   : > { %v8927_v10 = vadd.f32 %v13456_v17, %v17318_v34  ;;  %9024 = vmatprep.subr.bf16.mxu1 %v18207_v48  ;;  %v8950_v44 = vmax.f32 %v8926_v51, 0.0 }
 0x7c9   : > { %v8925_v25 = vadd.f32 %v13457_v59, %v17318_v34  ;;  %v8948_v46 = vmax.f32 %v8924_v6, 0.0  ;;  %v14415_v6 = vld [vmem:[%s17797_s5 + $0x10] ss:$8 sps:$4 sm:$0xff]   ;;  %v14418_v59 = vld [vmem:[%s17797_s5 + $0x20] ss:$8 sps:$4 sm:$0xff]  }
 0x7ca   : > { %v8951_v1 = vmax.f32 %v8927_v10, 0.0  ;;  %v14423_v10 = vld [vmem:[%s17797_s5 + $0x34] ss:$8 sps:$4 sm:$0xff]  }
 0x7cb   : > { %v8949_v0 = vmax.f32 %v8925_v25, 0.0  ;;  %v13247_v45 = vpop.f32.mrb[16].mxu0  ;;  %9025 = vmatpush1.bf16.msra.mxu1 %v17359_v19  ;;  %v14421_v25 = vld [vmem:[%s17797_s5 + $0x30] ss:$8 sps:$4 sm:$0xff]  }
 0x7cc   : > { %v17375_v38 = vpack.c.bf16 %v8951_v1, %v8950_v44  ;;  %v13458_v8 = vadd.f32 %v13247_v45, %v18216_v52  ;;  %v8850_v2 = vpop.f32.mrb[17].mxu0  ;;  %9026 = vmatprep.subr.bf16.mxu1 %v18207_v48  ;;  %v14426_v44 = vld [vmem:[%s17797_s5 + $0x44] ss:$8 sps:$4 sm:$0xff]   ;;  %v14424_v1 = vld [vmem:[%s17797_s5 + $0x40] ss:$8 sps:$4 sm:$0xff]  }
 0x7cd   : > { %v17379_v56 = vpack.c.bf16 %v8949_v0, %v8948_v46  ;;  %v13459_v49 = vadd.f32 %v8850_v2, %v18217_v16  ;;  %v13248_v23 = vpop.f32.mrb[18].mxu0  ;;  %v14429_v46 = vld [vmem:[%s17797_s5 + $0x54] ss:$8 sps:$4 sm:$0xff]   ;;  %v14427_v0 = vld [vmem:[%s17797_s5 + $0x50] ss:$8 sps:$4 sm:$0xff]  }
 0x7ce   : > { %v8930_v47 = vadd.f32 %v13458_v8, %v17318_v34  ;;  %v13460_v9 = vadd.f32 %v13248_v23, %v18218_v14  ;;  %v8853_v21 = vpop.f32.mrb[19].mxu0  ;;  %v14432_v45 = vld [vmem:[%s17797_s5 + $0x64] ss:$8 sps:$4 sm:$0xff]   ;;  %v14430_v52 = vld [vmem:[%s17797_s5 + $0x60] ss:$8 sps:$4 sm:$0xff]  }
 0x7cf   : > { %v8928_v12 = vadd.f32 %v13459_v49, %v17318_v34  ;;  %v13461_v4 = vadd.f32 %v8853_v21, %v18219_v3  ;;  %9027 = vmatpush1.bf16.msra.mxu1 %v17379_v56  ;;  %v14435_v8 = vld [vmem:[%s17797_s5 + $0x74] ss:$8 sps:$4 sm:$0xff]   ;;  %v14433_v2 = vld [vmem:[%s17797_s5 + $0x70] ss:$8 sps:$4 sm:$0xff]   ;;  %v14438_v16 = vld [vmem:[%s17797_s5 + $0x84] ss:$8 sps:$4 sm:$0xff]  }
 0x7d0   : > { %v8931_v35 = vadd.f32 %v13460_v9, %v17318_v34  ;;  %9028 = vmatprep.subr.bf16.mxu1 %v18207_v48  ;;  %v8954_v7 = vmax.f32 %v8930_v47, 0.0 }
 0x7d1   : > { %v8929_v32 = vadd.f32 %v13461_v4, %v17318_v34  ;;  %v8952_v26 = vmax.f32 %v8928_v12, 0.0 }
 0x7d2   : > { %v8955_v13 = vmax.f32 %v8931_v35, 0.0 }
 0x7d3   : > { %v8953_v55 = vmax.f32 %v8929_v32, 0.0  ;;  %v13251_v62 = vpop.f32.mrb[20].mxu0  ;;  %9029 = vmatpush1.bf16.msra.mxu1 %v17375_v38 }
 0x7d4   : > { %v17391_v31 = vpack.c.bf16 %v8955_v13, %v8954_v7  ;;  %v13462_v27 = vadd.f32 %v13251_v62, %v18220_v37  ;;  %v8866_v15 = vpop.f32.mrb[21].mxu0  ;;  %9030 = vmatprep.subr.bf16.mxu1 %v18207_v48 }
 0x7d5   : > { %v17395_v60 = vpack.c.bf16 %v8953_v55, %v8952_v26  ;;  %v13463_v36 = vadd.f32 %v8866_v15, %v18221_v41  ;;  %v13252_v5 = vpop.f32.mrb[22].mxu0 }
 0x7d6   : > { %v8934_v29 = vadd.f32 %v13462_v27, %v17318_v34  ;;  %v13464_v30 = vadd.f32 %v13252_v5, %v18222_v50  ;;  %v8869_v61 = vpop.f32.mrb[23].mxu0 }
 0x7d7   : > { %v8932_v24 = vadd.f32 %v13463_v36, %v17318_v34  ;;  %v13465_v20 = vadd.f32 %v8869_v61, %v18223_v22  ;;  %9031 = vmatpush1.bf16.msra.mxu1 %v17395_v60 }
 0x7d8   : > { %v8935_v11 = vadd.f32 %v13464_v30, %v17318_v34  ;;  %9032 = vmatprep.subr.bf16.mxu1 %v18207_v48  ;;  %v8958_v33 = vmax.f32 %v8934_v29, 0.0 }
 0x7d9   : > { %v8933_v63 = vadd.f32 %v13465_v20, %v17318_v34  ;;  %v8956_v58 = vmax.f32 %v8932_v24, 0.0  ;;  %v14412_v34 = vld [vmem:[%s17797_s5] ss:$8 sps:$4 sm:$0xff]  }
 0x7da   : > { %v8959_v53 = vmax.f32 %v8935_v11, 0.0 }
 0x7db   : > { %v8957_v51 = vmax.f32 %v8933_v63, 0.0  ;;  %9033 = vmatpush1.bf16.msra.mxu1 %v17391_v31 }
 0x7dc   : > { %v17407_v39 = vpack.c.bf16 %v8959_v53, %v8958_v33  ;;  %9034 = vmatprep.subr.bf16.mxu1 %v18207_v48 }
 0x7dd   : > { %v17410_v17 = vpack.c.bf16 %v8957_v51, %v8956_v58 }
 0x7df   : > { %9035 = vmatpush1.bf16.msra.mxu1 %v17410_v17 }
 0x7e0   : > { %9036 = vmatprep.subr.bf16.mxu1 %v18207_v48 }
 0x7e3   : > { %9037 = vmatpush1.bf16.msra.mxu1 %v17407_v39 }
 0x7e4   : > { %9114 = vmatprep.subr.bf16.mxu1 %v18207_v48 }
 0x7e6   : > { %9047 = vmatmul.mubr.bf16.vlgmr.msra.gmra.mrb[24].mxu1 %v14412_v34 }
 0x7e7   : > { %9115 = vmatpush1.bf16.msra.mxu1 %v17331_v54  ;;  %11787 = vmatprep.mubr.msk.bf16.mxu1 %vm2246_vm2, %v14417_v18 }
 0x7e8   : > { %9116 = vmatprep.subr.bf16.mxu1 %v18207_v48 }
 0x7eb   : > { %9117 = vmatpush1.bf16.msra.mxu1 %v17328_v40 }
 0x7ec   : > { %9118 = vmatprep.subr.bf16.mxu1 %v18207_v48 }
 0x7ee   : > { %9055 = vmatmul.mubr.bf16.gmra.mrb[28].mxu1 %v14415_v6 }
 0x7ef   : > { %9119 = vmatpush1.bf16.msra.mxu1 %v17347_v43  ;;  %11788 = vmatprep.mubr.msk.bf16.mxu1 %vm2246_vm2, %v14420_v28 }
 0x7f0   : > { %9120 = vmatprep.subr.bf16.mxu1 %v18207_v48 }
 0x7f3   : > { %9121 = vmatpush1.bf16.msra.mxu1 %v17343_v42 }
 0x7f4   : > { %9122 = vmatprep.subr.bf16.mxu1 %v18207_v48 }
 0x7f6   : > { %9063 = vmatmul.mubr.bf16.gmra.mrb[32].mxu1 %v14418_v59 }
 0x7f7   : > { %9123 = vmatpush1.bf16.msra.mxu1 %v17363_v57  ;;  %11801 = vmatprep.mubr.msk.bf16.mxu1 %vm2246_vm2, %v14423_v10 }
 0x7f8   : > { %9124 = vmatprep.subr.bf16.mxu1 %v18207_v48 }
 0x7fb   : > { %9125 = vmatpush1.bf16.msra.mxu1 %v17359_v19 }
 0x7fc   : > { %9126 = vmatprep.subr.bf16.mxu1 %v18207_v48 }
 0x7ff   : > { %9127 = vmatpush1.bf16.msra.mxu1 %v17379_v56 }
 0x800   : > { %9128 = vmatprep.subr.bf16.mxu1 %v18207_v48 }
 0x803   : > { %9129 = vmatpush1.bf16.msra.mxu1 %v17375_v38 }
 0x804   : > { %9130 = vmatprep.subr.bf16.mxu1 %v18207_v48 }
 0x807   : > { %9131 = vmatpush1.bf16.msra.mxu1 %v17395_v60 }
 0x808   : > { %9132 = vmatprep.subr.bf16.mxu1 %v18207_v48 }
 0x80b   : > { %9133 = vmatpush1.bf16.msra.mxu1 %v17391_v31 }
 0x80c   : > { %9134 = vmatprep.subr.bf16.mxu1 %v18207_v48 }
 0x80f   : > { %9135 = vmatpush1.bf16.msra.mxu1 %v17410_v17 }
 0x810   : > { %9136 = vmatprep.subr.bf16.mxu1 %v18207_v48 }
 0x813   : > { %9137 = vmatpush1.bf16.msra.mxu1 %v17407_v39 }
 0x814   : > { %9220 = vmatprep.subr.bf16.mxu1 %v18207_v48 }
 0x816   : > { %9147 = vmatmul.mubr.bf16.vlgmr.msra.gmra.mrb[36].mxu1 %v14421_v25 }
 0x817   : > { %9221 = vmatpush1.bf16.msra.mxu1 %v17331_v54  ;;  %11802 = vmatprep.mubr.msk.bf16.mxu1 %vm2246_vm2, %v14426_v44 }
 0x818   : > { %9222 = vmatprep.subr.bf16.mxu1 %v18207_v48 }
 0x81b   : > { %9223 = vmatpush1.bf16.msra.mxu1 %v17328_v40 }
 0x81c   : > { %9224 = vmatprep.subr.bf16.mxu1 %v18207_v48 }
 0x81e   : > { %9155 = vmatmul.mubr.bf16.gmra.mrb[40].mxu1 %v14424_v1 }
 0x81f   : > { %9225 = vmatpush1.bf16.msra.mxu1 %v17347_v43  ;;  %11803 = vmatprep.mubr.msk.bf16.mxu1 %vm2246_vm2, %v14429_v46 }
 0x820   : > { %9226 = vmatprep.subr.bf16.mxu1 %v18207_v48 }
 0x823   : > { %9227 = vmatpush1.bf16.msra.mxu1 %v17343_v42 }
 0x824   : > { %9228 = vmatprep.subr.bf16.mxu1 %v18207_v48 }
 0x826   : > { %9163 = vmatmul.mubr.bf16.gmra.mrb[44].mxu1 %v14427_v0 }
 0x827   : > { %9229 = vmatpush1.bf16.msra.mxu1 %v17363_v57  ;;  %11816 = vmatprep.mubr.msk.bf16.mxu1 %vm2246_vm2, %v14432_v45 }
 0x828   : > { %9230 = vmatprep.subr.bf16.mxu1 %v18207_v48 }
 0x82b   : > { %9231 = vmatpush1.bf16.msra.mxu1 %v17359_v19 }
 0x82c   : > { %9232 = vmatprep.subr.bf16.mxu1 %v18207_v48 }
 0x82f   : > { %9233 = vmatpush1.bf16.msra.mxu1 %v17379_v56 }
 0x830   : > { %9234 = vmatprep.subr.bf16.mxu1 %v18207_v48 }
 0x833   : > { %9235 = vmatpush1.bf16.msra.mxu1 %v17375_v38 }
 0x834   : > { %9236 = vmatprep.subr.bf16.mxu1 %v18207_v48 }
 0x837   : > { %9237 = vmatpush1.bf16.msra.mxu1 %v17395_v60 }
 0x838   : > { %9238 = vmatprep.subr.bf16.mxu1 %v18207_v48 }
 0x83b   : > { %9239 = vmatpush1.bf16.msra.mxu1 %v17391_v31 }
 0x83c   : > { %9240 = vmatprep.subr.bf16.mxu1 %v18207_v48 }
 0x83f   : > { %9241 = vmatpush1.bf16.msra.mxu1 %v17410_v17 }
 0x840   : > { %9242 = vmatprep.subr.bf16.mxu1 %v18207_v48 }
 0x843   : > { %9243 = vmatpush1.bf16.msra.mxu1 %v17407_v39 }
 0x844   : > { %9326 = vmatprep.subr.bf16.mxu1 %v18207_v48 }
 0x846   : > { %9253 = vmatmul.mubr.bf16.vlgmr.msra.gmra.mrb[48].mxu1 %v14430_v52 }
 0x847   : > { %9327 = vmatpush1.bf16.msra.mxu1 %v17331_v54  ;;  %11817 = vmatprep.mubr.msk.bf16.mxu1 %vm2246_vm2, %v14435_v8  ;;  %v14436_v54 = vld [vmem:[%s17797_s5 + $0x80] ss:$8 sps:$4 sm:$0xff]  }
 0x848   : > { %9328 = vmatprep.subr.bf16.mxu1 %v18207_v48 }
 0x84b   : > { %9329 = vmatpush1.bf16.msra.mxu1 %v17328_v40  ;;  %v14441_v40 = vld [vmem:[%s17797_s5 + $0x94] ss:$8 sps:$4 sm:$0xff]  }
 0x84c   : > { %9330 = vmatprep.subr.bf16.mxu1 %v18207_v48 }
 0x84e   : > { %9261 = vmatmul.mubr.bf16.gmra.mrb[52].mxu1 %v14433_v2 }
 0x84f   : > { %9331 = vmatpush1.bf16.msra.mxu1 %v17347_v43  ;;  %11818 = vmatprep.mubr.msk.bf16.mxu1 %vm2246_vm2, %v14438_v16  ;;  %v14444_v43 = vld [vmem:[%s17797_s5 + $0xa4] ss:$8 sps:$4 sm:$0xff]  }
 0x850   : > { %9332 = vmatprep.subr.bf16.mxu1 %v18207_v48 }
 0x853   : > { %9333 = vmatpush1.bf16.msra.mxu1 %v17343_v42  ;;  %v14439_v42 = vld [vmem:[%s17797_s5 + $0x90] ss:$8 sps:$4 sm:$0xff]  }
 0x854   : > { %9334 = vmatprep.subr.bf16.mxu1 %v18207_v48 }
 0x856   : > { %9269 = vmatmul.mubr.bf16.gmra.mrb[56].mxu1 %v14436_v54 }
 0x857   : > { %9335 = vmatpush1.bf16.msra.mxu1 %v17363_v57  ;;  %11831 = vmatprep.mubr.msk.bf16.mxu1 %vm2246_vm2, %v14441_v40  ;;  %v14445_v57 = vld [vmem:[%s17797_s5 + $0xb0] ss:$8 sps:$4 sm:$0xff]  }
 0x858   : > { %9336 = vmatprep.subr.bf16.mxu1 %v18207_v48 }
 0x85b   : > { %9337 = vmatpush1.bf16.msra.mxu1 %v17359_v19  ;;  %v14442_v19 = vld [vmem:[%s17797_s5 + $0xa0] ss:$8 sps:$4 sm:$0xff]  }
 0x85c   : > { %9338 = vmatprep.subr.bf16.mxu1 %v18207_v48 }
 0x85f   : > { %9339 = vmatpush1.bf16.msra.mxu1 %v17379_v56 }
 0x860   : > { %9340 = vmatprep.subr.bf16.mxu1 %v18207_v48 }
 0x863   : > { %9341 = vmatpush1.bf16.msra.mxu1 %v17375_v38 }
 0x864   : > { %9342 = vmatprep.subr.bf16.mxu1 %v18207_v48 }
 0x867   : > { %9343 = vmatpush1.bf16.msra.mxu1 %v17395_v60 }
 0x868   : > { %9344 = vmatprep.subr.bf16.mxu1 %v18207_v48 }
 0x86b   : > { %9345 = vmatpush1.bf16.msra.mxu1 %v17391_v31 }
 0x86c   : > { %9346 = vmatprep.subr.bf16.mxu1 %v18207_v48 }
 0x86f   : > { %9347 = vmatpush1.bf16.msra.mxu1 %v17410_v17 }
 0x870   : > { %9348 = vmatprep.subr.bf16.mxu1 %v18207_v48  ;;  %v14447_v48 = vld [vmem:[%s17797_s5 + $0xb4] ss:$8 sps:$4 sm:$0xff]  }
 0x873   : > { %9349 = vmatpush1.bf16.msra.mxu1 %v17407_v39 }
 0x876   : > { %9359 = vmatmul.mubr.bf16.vlgmr.msra.gmra.mrb[60].mxu1 %v14439_v42 }
 0x877   : > { %11832 = vmatprep.mubr.msk.bf16.mxu1 %vm2246_vm2, %v14444_v43 }
 0x87e   : > { %9367 = vmatmul.mubr.bf16.gmra.mrb[64].mxu1 %v14442_v19  ;;  %v14448_v19 = vld [vmem:[%s17798_s6 + $0x10] sm:$0xff]  }
 0x87f   : > { %11833 = vmatprep.mubr.msk.bf16.mxu1 %vm2246_vm2, %v14447_v48 }
 0x886   : > { %9375 = vmatmul.mubr.bf16.gmra.mrb[68].mxu1 %v14445_v57 }
 0x887   : > { %13259 = vmatprep.mubr.msk.bf16.mxu1 %vm9423_vm7, %v14448_v19 }
 0x8b9   : > { %v9048_v38 = vpop.f32.mrb[24].mxu1 }
 0x8ba   : > { %v9050_v56 = vpop.f32.mrb[25].mxu1 }
 0x8bb   : > { %v9051_v49 = vpop.f32.mrb[26].mxu1 }
 0x8bc   : > { %v9053_v23 = vpop.f32.mrb[27].mxu1 }
 0x8c1   : > { %v9056_v47 = vpop.f32.mrb[28].mxu1 }
 0x8c2   : > { %v9058_v14 = vpop.f32.mrb[29].mxu1 }
 0x8c3   : > { %v9059_v9 = vpop.f32.mrb[30].mxu1 }
 0x8c4   : > { %v9061_v21 = vpop.f32.mrb[31].mxu1 }
 0x8c9   : > { %v9064_v12 = vpop.f32.mrb[32].mxu1 }
 0x8ca   : > { %v9066_v3 = vpop.f32.mrb[33].mxu1 }
 0x8cb   : > { %v9067_v4 = vpop.f32.mrb[34].mxu1  ;;  %v14449_v3 = vld [vmem:[%s17798_s6 + $0x18] sm:$0xff]  }
 0x8cc   : > { %v9069_v35 = vpop.f32.mrb[35].mxu1 }
 0x8cd   : > { %v14451_v35 = vld [vmem:[%s17798_s6 + $0x8] sm:$0xff]  }
 0x8e9   : > { %v9148_v32 = vpop.f32.mrb[36].mxu1 }
 0x8ea   : > { %v9171_v7 = vmax.f32 %v9048_v38, %v9148_v32  ;;  %v9150_v13 = vpop.f32.mrb[37].mxu1 }
 0x8eb   : > { %v9151_v26 = vpop.f32.mrb[38].mxu1 }
 0x8ec   : > { %v9172_v55 = vmax.f32 %v9051_v49, %v9151_v26  ;;  %v9153_v62 = vpop.f32.mrb[39].mxu1 }
 0x8f1   : > { %v9156_v31 = vpop.f32.mrb[40].mxu1 }
 0x8f2   : > { %v9173_v37 = vmax.f32 %v9056_v47, %v9156_v31  ;;  %v9158_v27 = vpop.f32.mrb[41].mxu1  ;;  %v14454_v31 = vld [vmem:[%s17798_s6 + $0x30] sm:$0xff]  }
 0x8f3   : > { %v9159_v15 = vpop.f32.mrb[42].mxu1 }
 0x8f4   : > { %v9174_v60 = vmax.f32 %v9059_v9, %v9159_v15  ;;  %v9161_v41 = vpop.f32.mrb[43].mxu1  ;;  %v14455_v15 = vld [vmem:[%s17798_s6 + $0x38] sm:$0xff]  }
 0x8f5   : > { %v14456_v41 = vld [vmem:[%s17798_s6 + $0x40] sm:$0xff]  }
 0x8f9   : > { %v9164_v36 = vpop.f32.mrb[44].mxu1 }
 0x8fa   : > { %v9175_v5 = vmax.f32 %v9064_v12, %v9164_v36  ;;  %v9166_v29 = vpop.f32.mrb[45].mxu1 }
 0x8fb   : > { %v9167_v50 = vpop.f32.mrb[46].mxu1  ;;  %v14457_v29 = vld [vmem:[%s17798_s6 + $0x48] sm:$0xff]  }
 0x8fc   : > { %v9176_v30 = vmax.f32 %v9067_v4, %v9167_v50  ;;  %v9169_v61 = vpop.f32.mrb[47].mxu1  ;;  %v14450_v4 = vld [vmem:[%s17798_s6] sm:$0xff]  }
 0x919   : > { %v9254_v24 = vpop.f32.mrb[48].mxu1 }
 0x91a   : > { %v9277_v22 = vmax.f32 %v9171_v7, %v9254_v24  ;;  %v9256_v20 = vpop.f32.mrb[49].mxu1  ;;  %v14452_v7 = vld [vmem:[%s17798_s6 + $0x20] sm:$0xff]  }
 0x91b   : > { %v9257_v11 = vpop.f32.mrb[50].mxu1  ;;  %v10706_v24 = vld [vmem:[%s17799_s7] sm:$0xff] }
 0x91c   : > { %v9278_v63 = vmax.f32 %v9172_v55, %v9257_v11  ;;  %v9259_v33 = vpop.f32.mrb[51].mxu1  ;;  %v14453_v55 = vld [vmem:[%s17798_s6 + $0x28] sm:$0xff]   ;;  %v10708_v11 = vld [vmem:[%s17799_s7 + $0x10] sm:$0xff] }
 0x91d   : > { %v14459_v33 = vld [vmem:[%s17798_s6 + $0x58] sm:$0xff]  }
 0x921   : > { %v9262_v53 = vpop.f32.mrb[52].mxu1 }
 0x922   : > { %v9279_v58 = vmax.f32 %v9173_v37, %v9262_v53  ;;  %v9264_v51 = vpop.f32.mrb[53].mxu1 }
 0x923   : > { %v9265_v39 = vpop.f32.mrb[54].mxu1  ;;  %v10709_v51 = vld [vmem:[%s17799_s7 + $0x18] sm:$0xff] }
 0x924   : > { %v9280_v17 = vmax.f32 %v9174_v60, %v9265_v39  ;;  %v9267_v34 = vpop.f32.mrb[55].mxu1  ;;  %v10837_v39 = vld [vmem:[%s17803_s11] sm:$0x3] }
 0x925   : > { %v10741_v34 = vld [vmem:[%s17801_s9 + $0x8] sm:$0xff] }
 0x929   : > { %v9270_v18 = vpop.f32.mrb[56].mxu1 }
 0x92a   : > { %v9281_v6 = vmax.f32 %v9175_v5, %v9270_v18  ;;  %v9272_v28 = vpop.f32.mrb[57].mxu1 }
 0x92b   : > { %v9273_v59 = vpop.f32.mrb[58].mxu1 }
 0x92c   : > { %v9282_v10 = vmax.f32 %v9176_v30, %v9273_v59  ;;  %v9275_v25 = vpop.f32.mrb[59].mxu1  ;;  %v14458_v30 = vld [vmem:[%s17798_s6 + $0x50] sm:$0xff]  }
 0x92d   : > { %v14462_v59 = vld [vmem:[%s17798_s6 + $0x70] sm:$0xff]  }
 0x949   : > { %v9360_v44 = vpop.f32.mrb[60].mxu1 }
 0x94a   : > { %v9383_v1 = vmax.f32 %v9277_v22, %v9360_v44  ;;  %v9362_v46 = vpop.f32.mrb[61].mxu1  ;;  %v10707_v22 = vld [vmem:[%s17799_s7 + $0x8] sm:$0xff]  ;;  %v14463_v44 = vld [vmem:[%s17798_s6 + $0x78] sm:$0xff]  }
 0x94b   : > { %v9363_v0 = vpop.f32.mrb[62].mxu1  ;;  %v14464_v46 = vld [vmem:[%s17798_s6 + $0x80] sm:$0xff]  }
 0x94c   : > { %v9384_v45 = vmax.f32 %v9278_v63, %v9363_v0  ;;  %v9365_v52 = vpop.f32.mrb[63].mxu1  ;;  %v10740_v63 = vld [vmem:[%s17801_s9] sm:$0xff] }
 0x94d   : > { %v14465_v52 = vld [vmem:[%s17798_s6 + $0x88] sm:$0xff]  }
 0x94e   : > { %v17567_v8 = vpack.c.bf16 %v9384_v45, %v9383_v1 }
 0x950   : > { %9414 = vrot.lane.b32.xlu0 %v17567_v8, %s14535_s29 }
 0x951   : > { %v9368_v2 = vpop.f32.mrb[64].mxu1 }
 0x952   : > { %v9385_v16 = vmax.f32 %v9279_v58, %v9368_v2  ;;  %v9370_v54 = vpop.f32.mrb[65].mxu1  ;;  %v14460_v58 = vld [vmem:[%s17798_s6 + $0x60] sm:$0xff]   ;;  %v14466_v2 = vld [vmem:[%s17798_s6 + $0x90] sm:$0xff]  }
 0x953   : > { %v9371_v40 = vpop.f32.mrb[66].mxu1 }
 0x954   : > { %v9386_v42 = vmax.f32 %v9280_v17, %v9371_v40  ;;  %v9373_v43 = vpop.f32.mrb[67].mxu1  ;;  %v14467_v40 = vld [vmem:[%s17798_s6 + $0x98] sm:$0xff]  }
 0x955   : > { %v14468_v43 = vld [vmem:[%s17798_s6 + $0xa0] sm:$0xff]  }
 0x956   : > { %v17573_v48 = vpack.c.bf16 %v9386_v42, %v9385_v16 }
 0x958   : > { %9416 = vrot.lane.b32.xlu0 %v17573_v48, %s14535_s29 }
 0x959   : > { %v9376_v57 = vpop.f32.mrb[68].mxu1 }
 0x95a   : > { %v9387_v38 = vmax.f32 %v9281_v6, %v9376_v57  ;;  %v9378_v56 = vpop.f32.mrb[69].mxu1  ;;  %v14461_v6 = vld [vmem:[%s17798_s6 + $0x68] sm:$0xff]  }
 0x95b   : > { %v9379_v49 = vpop.f32.mrb[70].mxu1  ;;  %v14469_v57 = vld [vmem:[%s17798_s6 + $0xa8] sm:$0xff]   ;;  %v14470_v56 = vld [vmem:[%s17798_s6 + $0xb0] sm:$0xff]  }
 0x95c   : > { %v9388_v23 = vmax.f32 %v9282_v10, %v9379_v49  ;;  %9561 = vrot.lane.b32.xlu0 %v17573_v48, %s14536_s14  ;;  %v9381_v47 = vpop.f32.mrb[71].mxu1 }
 0x95d   : > { %v14471_v47 = vld [vmem:[%s17798_s6 + $0xb8] sm:$0xff]  }
 0x95e   : > { %v17578_v14 = vpack.c.bf16 %v9388_v23, %v9387_v38 }
 0x960   : > { %9642 = vrot.lane.b32.xlu0 %v17567_v8, %s14537_s17  ;;  %9418 = vrot.lane.b32.xlu1 %v17578_v14, %s14535_s29  ;;  %s14549_s29 = smov 8  }
 0x964   : > { %9646 = vrot.lane.b32.xlu0 %v17578_v14, %s14537_s17  ;;  %9559 = vrot.lane.b32.xlu1 %v17567_v8, %s14536_s14 }
 0x968   : > { %9727 = vrot.lane.b32.xlu0 %v17573_v48, %s14538_s15  ;;  %9563 = vrot.lane.b32.xlu1 %v17578_v14, %s14536_s14  ;;  %s10980_s14 = sshll.u32 %s18227_s22, 1 }
 0x96c   : > { %9808 = vrot.lane.b32.xlu0 %v17567_v8, %s14539_s16  ;;  %9644 = vrot.lane.b32.xlu1 %v17573_v48, %s14537_s17 }
 0x970   : > { %9812 = vrot.lane.b32.xlu0 %v17578_v14, %s14539_s16  ;;  %9725 = vrot.lane.b32.xlu1 %v17567_v8, %s14538_s15 }
 0x974   : > { %9893 = vrot.lane.b32.xlu0 %v17573_v48, %s14540_s18  ;;  %9729 = vrot.lane.b32.xlu1 %v17578_v14, %s14538_s15 }
 0x978   : > { %9974 = vrot.lane.b32.xlu0 %v17567_v8, %s14541_s19  ;;  %9810 = vrot.lane.b32.xlu1 %v17573_v48, %s14539_s16  ;;  %s416_s16 = scalar_lea.vmem %s17804_s12, %s10980_s14 }
 0x97c   : > { %9978 = vrot.lane.b32.xlu0 %v17578_v14, %s14541_s19  ;;  %9891 = vrot.lane.b32.xlu1 %v17567_v8, %s14540_s18 }
 0x980   : > { %10059 = vrot.lane.b32.xlu0 %v17573_v48, %s14542_s20  ;;  %9895 = vrot.lane.b32.xlu1 %v17578_v14, %s14540_s18 }
 0x984   : > { %10140 = vrot.lane.b32.xlu0 %v17567_v8, %s14543_s23  ;;  %9976 = vrot.lane.b32.xlu1 %v17573_v48, %s14541_s19 }
 0x988   : > { %10144 = vrot.lane.b32.xlu0 %v17578_v14, %s14543_s23  ;;  %10057 = vrot.lane.b32.xlu1 %v17567_v8, %s14542_s20 }
 0x98c   : > { %10225 = vrot.lane.b32.xlu0 %v17573_v48, %s14544_s24  ;;  %10061 = vrot.lane.b32.xlu1 %v17578_v14, %s14542_s20 }
 0x990   : > { %10306 = vrot.lane.b32.xlu0 %v17567_v8, %s14545_s25  ;;  %10142 = vrot.lane.b32.xlu1 %v17573_v48, %s14543_s23 }
 0x994   : > { %10310 = vrot.lane.b32.xlu0 %v17578_v14, %s14545_s25  ;;  %10223 = vrot.lane.b32.xlu1 %v17567_v8, %s14544_s24 }
 0x998   : > { %10391 = vrot.lane.b32.xlu0 %v17573_v48, %s14546_s26  ;;  %10227 = vrot.lane.b32.xlu1 %v17578_v14, %s14544_s24 }
 0x99c   : > { %10472 = vrot.lane.b32.xlu0 %v17567_v8, %s14547_s27  ;;  %10308 = vrot.lane.b32.xlu1 %v17573_v48, %s14545_s25 }
 0x9a0   : > { %10476 = vrot.lane.b32.xlu0 %v17578_v14, %s14547_s27  ;;  %10389 = vrot.lane.b32.xlu1 %v17567_v8, %s14546_s26 }
 0x9a4   : > { %10557 = vrot.lane.b32.xlu0 %v17573_v48, %s14548_s28  ;;  %10393 = vrot.lane.b32.xlu1 %v17578_v14, %s14546_s26 }
 0x9a8   : > { %10638 = vrot.lane.b32.xlu0 %v17567_v8, %s14549_s29  ;;  %10474 = vrot.lane.b32.xlu1 %v17573_v48, %s14547_s27 }
 0x9ac   : > { %10642 = vrot.lane.b32.xlu0 %v17578_v14, %s14549_s29  ;;  %10555 = vrot.lane.b32.xlu1 %v17567_v8, %s14548_s28 }
 0x9b0   : > { %10559 = vrot.lane.b32.xlu1 %v17578_v14, %s14548_s28  ;;  %10717 = vperm.xlu0 %14106, %v10707_v22  }
 0x9b4   : > { %10640 = vrot.lane.b32.xlu1 %v17573_v48, %s14549_s29  ;;  %10744 = vperm.xlu0 %14106, %v10740_v63  }
 0x9b8   : > { %10712 = vperm.xlu1 %14105, %v10706_v24   ;;  %10840 = vperm.xlu0 %14106, %v10837_v39  }
 0x9bc   : > { %10722 = vperm.xlu1 %14105, %v10708_v11  }
 0x9c0   : > { %10727 = vperm.xlu1 %14105, %v10709_v51  }
 0x9c2   : > { %v9415_v9 = vpop.permute.xlu0 %9414 }
 0x9c3   : > { %13253 = vmatprep.subr.bf16.mxu1 %v9415_v9 }
 0x9c4   : > { %13254 = vmatpush3.bf16.msra.mxu1 %v9415_v9  ;;  %10749 = vperm.xlu1 %14105, %v10741_v34   ;;  %v14472_v9 = vld [vmem:[%s17798_s6 + $0xc0] sm:$0xff]  }
 0x9ca   : > { %v9417_v21 = vpop.permute.xlu0 %9416 }
 0x9cb   : > { %13255 = vmatprep.subr.bf16.mxu1 %v9417_v21 }
 0x9cc   : > { %13256 = vmatpush3.bf16.msra.mxu1 %v9417_v21 }
 0x9ce   : > { %v9562_v13 = vpop.permute.xlu0 %9561 }
 0x9d2   : > { %v9419_v12 = vpop.permute.xlu1 %9418  ;;  %v9643_v62 = vpop.permute.xlu0 %9642 }
 0x9d3   : > { %13257 = vmatprep.subr.bf16.mxu1 %v9419_v12 }
 0x9d4   : > { %13258 = vmatpush3.bf16.msra.mxu1 %v9419_v12 }
 0x9d5   : > { %13263 = vmatprep.subr.bf16.mxu1 %v17567_v8 }
 0x9d6   : > { %v9560_v32 = vpop.permute.xlu1 %9559  ;;  %v9647_v27 = vpop.permute.xlu0 %9646 }
 0x9d7   : > { %13260 = vmatmul.mubr.msk.bf16.vlgmr.msra.gmra.mrb[72].mxu1 %vm9423_vm7, %v14449_v3  ;;  %v14473_v3 = vld [vmem:[%s17798_s6 + $0xc8] sm:$0xff]  }
 0x9d8   : > { %13264 = vmatpush3.bf16.msra.mxu1 %v17567_v8  ;;  %13269 = vmatprep.mubr.msk.bf16.mxu1 %vm9423_vm7, %v14450_v4 }
 0x9d9   : > { %13265 = vmatprep.subr.bf16.mxu1 %v17573_v48 }
 0x9da   : > { %v9564_v26 = vpop.permute.xlu1 %9563  ;;  %v9728_v36 = vpop.permute.xlu0 %9727 }
 0x9dc   : > { %13266 = vmatpush3.bf16.msra.mxu1 %v17573_v48 }
 0x9dd   : > { %13267 = vmatprep.subr.bf16.mxu1 %v17578_v14 }
 0x9de   : > { %v9645_v37 = vpop.permute.xlu1 %9644  ;;  %v9809_v50 = vpop.permute.xlu0 %9808 }
 0x9e0   : > { %13268 = vmatpush3.bf16.msra.mxu1 %v17578_v14 }
 0x9e1   : > { %13273 = vmatprep.subr.bf16.mxu1 %v9560_v32 }
 0x9e2   : > { %v9726_v60 = vpop.permute.xlu1 %9725  ;;  %v9813_v20 = vpop.permute.xlu0 %9812 }
 0x9e3   : > { %13270 = vmatmul.mubr.msk.bf16.vlgmr.msra.gmra.mrb[72].mxu1 %vm9423_vm7, %v14451_v35  ;;  %v14474_v35 = vld [vmem:[%s17798_s6 + $0xd0] sm:$0xff]  }
 0x9e4   : > { %13274 = vmatpush3.bf16.msra.mxu1 %v9560_v32  ;;  %13279 = vmatprep.mubr.msk.bf16.mxu1 %vm9423_vm7, %v14452_v7 }
 0x9e5   : > { %13275 = vmatprep.subr.bf16.mxu1 %v9562_v13 }
 0x9e6   : > { %v9730_v5 = vpop.permute.xlu1 %9729  ;;  %v9894_v17 = vpop.permute.xlu0 %9893 }
 0x9e8   : > { %13276 = vmatpush3.bf16.msra.mxu1 %v9562_v13  ;;  %v14475_v13 = vld [vmem:[%s17798_s6 + $0xd8] sm:$0xff]  }
 0x9e9   : > { %13277 = vmatprep.subr.bf16.mxu1 %v9564_v26 }
 0x9ea   : > { %v9811_v61 = vpop.permute.xlu1 %9810  ;;  %v9975_v28 = vpop.permute.xlu0 %9974 }
 0x9ec   : > { %13278 = vmatpush3.bf16.msra.mxu1 %v9564_v26 }
 0x9ed   : > { %13283 = vmatprep.subr.bf16.mxu1 %v9643_v62 }
 0x9ee   : > { %v9892_v53 = vpop.permute.xlu1 %9891  ;;  %v9979_v25 = vpop.permute.xlu0 %9978 }
 0x9ef   : > { %13280 = vmatmul.mubr.msk.bf16.vlgmr.msra.gmra.mrb[72].mxu1 %vm9423_vm7, %v14453_v55  ;;  %v14476_v55 = vld [vmem:[%s17798_s6 + $0xe0] sm:$0xff]  }
 0x9f0   : > { %13284 = vmatpush3.bf16.msra.mxu1 %v9643_v62  ;;  %13289 = vmatprep.mubr.msk.bf16.mxu1 %vm9423_vm7, %v14454_v31 }
 0x9f1   : > { %13285 = vmatprep.subr.bf16.mxu1 %v9645_v37 }
 0x9f2   : > { %v9896_v18 = vpop.permute.xlu1 %9895  ;;  %v10060_v0 = vpop.permute.xlu0 %10059 }
 0x9f4   : > { %13286 = vmatpush3.bf16.msra.mxu1 %v9645_v37  ;;  %v14477_v37 = vld [vmem:[%s17798_s6 + $0xe8] sm:$0xff]  }
 0x9f5   : > { %13287 = vmatprep.subr.bf16.mxu1 %v9647_v27 }
 0x9f6   : > { %v9977_v10 = vpop.permute.xlu1 %9976  ;;  %v10141_v8 = vpop.permute.xlu0 %10140 }
 0x9f8   : > { %13288 = vmatpush3.bf16.msra.mxu1 %v9647_v27 }
 0x9f9   : > { %13293 = vmatprep.subr.bf16.mxu1 %v9726_v60 }
 0x9fa   : > { %v10058_v1 = vpop.permute.xlu1 %10057  ;;  %v10145_v54 = vpop.permute.xlu0 %10144 }
 0x9fb   : > { %13290 = vmatmul.mubr.msk.bf16.vlgmr.msra.gmra.mrb[72].mxu1 %vm9423_vm7, %v14455_v15  ;;  %v14478_v15 = vld [vmem:[%s17798_s6 + $0xf0] sm:$0xff]  }
 0x9fc   : > { %13294 = vmatpush3.bf16.msra.mxu1 %v9726_v60  ;;  %13299 = vmatprep.mubr.msk.bf16.mxu1 %vm9423_vm7, %v14456_v41 }
 0x9fd   : > { %13295 = vmatprep.subr.bf16.mxu1 %v9728_v36 }
 0x9fe   : > { %v10062_v45 = vpop.permute.xlu1 %10061  ;;  %v10226_v19 = vpop.permute.xlu0 %10225 }
 0xa00   : > { %13296 = vmatpush3.bf16.msra.mxu1 %v9728_v36  ;;  %v14479_v36 = vld [vmem:[%s17798_s6 + $0xf8] sm:$0xff]  }
 0xa01   : > { %13297 = vmatprep.subr.bf16.mxu1 %v9730_v5 }
 0xa02   : > { %v10143_v16 = vpop.permute.xlu1 %10142  ;;  %v10307_v38 = vpop.permute.xlu0 %10306 }
 0xa04   : > { %13298 = vmatpush3.bf16.msra.mxu1 %v9730_v5  ;;  %v10738_v5 = vld [vmem:[%s17800_s8] sm:$0xff] }
 0xa05   : > { %13303 = vmatprep.subr.bf16.mxu1 %v9809_v50 }
 0xa06   : > { %v10224_v42 = vpop.permute.xlu1 %10223  ;;  %v10311_v23 = vpop.permute.xlu0 %10310 }
 0xa07   : > { %13300 = vmatmul.mubr.msk.bf16.vlgmr.msra.gmra.mrb[72].mxu1 %vm9423_vm7, %v14457_v29 }
 0xa08   : > { %13304 = vmatpush3.bf16.msra.mxu1 %v9809_v50  ;;  %13309 = vmatprep.mubr.msk.bf16.mxu1 %vm9423_vm7, %v14458_v30 }
 0xa09   : > { %13305 = vmatprep.subr.bf16.mxu1 %v9811_v61 }
 0xa0a   : > { %v10228_v48 = vpop.permute.xlu1 %10227  ;;  %v10392_v21 = vpop.permute.xlu0 %10391 }
 0xa0c   : > { %13306 = vmatpush3.bf16.msra.mxu1 %v9811_v61 }
 0xa0d   : > { %13307 = vmatprep.subr.bf16.mxu1 %v9813_v20 }
 0xa0e   : > { %v10309_v49 = vpop.permute.xlu1 %10308  ;;  %v10473_v4 = vpop.permute.xlu0 %10472 }
 0xa10   : > { %13308 = vmatpush3.bf16.msra.mxu1 %v9813_v20 }
 0xa11   : > { %13313 = vmatprep.subr.bf16.mxu1 %v9892_v53 }
 0xa12   : > { %v10390_v14 = vpop.permute.xlu1 %10389  ;;  %v10477_v7 = vpop.permute.xlu0 %10476 }
 0xa13   : > { %13310 = vmatmul.mubr.msk.bf16.vlgmr.msra.gmra.mrb[72].mxu1 %vm9423_vm7, %v14459_v33 }
 0xa14   : > { %13314 = vmatpush3.bf16.msra.mxu1 %v9892_v53  ;;  %13319 = vmatprep.mubr.msk.bf16.mxu1 %vm9423_vm7, %v14460_v58 }
 0xa15   : > { %13315 = vmatprep.subr.bf16.mxu1 %v9894_v17 }
 0xa16   : > { %v10394_v12 = vpop.permute.xlu1 %10393  ;;  %v10558_v62 = vpop.permute.xlu0 %10557 }
 0xa18   : > { %13316 = vmatpush3.bf16.msra.mxu1 %v9894_v17 }
 0xa19   : > { %13317 = vmatprep.subr.bf16.mxu1 %v9896_v18 }
 0xa1a   : > { %v10475_v32 = vpop.permute.xlu1 %10474  ;;  %v10639_v27 = vpop.permute.xlu0 %10638 }
 0xa1c   : > { %13318 = vmatpush3.bf16.msra.mxu1 %v9896_v18 }
 0xa1d   : > { %13323 = vmatprep.subr.bf16.mxu1 %v9975_v28 }
 0xa1e   : > { %v10556_v26 = vpop.permute.xlu1 %10555  ;;  %v10643_v41 = vpop.permute.xlu0 %10642 }
 0xa1f   : > { %13320 = vmatmul.mubr.msk.bf16.vlgmr.msra.gmra.mrb[72].mxu1 %vm9423_vm7, %v14461_v6 }
 0xa20   : > { %13324 = vmatpush3.bf16.msra.mxu1 %v9975_v28  ;;  %13329 = vmatprep.mubr.msk.bf16.mxu1 %vm9423_vm7, %v14462_v59  ;;  %v10739_v28 = vld [vmem:[%s17800_s8 + $0x8] sm:$0xff]  ;;  %v14550_v59 = vmov 0.0|0.0  }
 0xa21   : > { %13325 = vmatprep.subr.bf16.mxu1 %v9977_v10 }
 0xa22   : > { %v10560_v31 = vpop.permute.xlu1 %10559 }
 0xa24   : > { %13326 = vmatpush3.bf16.msra.mxu1 %v9977_v10  ;;  %v14552_v10 = vmov 0.0  }
 0xa25   : > { %13327 = vmatprep.subr.bf16.mxu1 %v9979_v25 }
 0xa26   : > { %v10641_v60 = vpop.permute.xlu1 %10640 }
 0xa28   : > { %13328 = vmatpush3.bf16.msra.mxu1 %v9979_v25 }
 0xa29   : > { %13333 = vmatprep.subr.bf16.mxu1 %v10058_v1 }
 0xa2b   : > { %13330 = vmatmul.mubr.msk.bf16.vlgmr.msra.gmra.mrb[72].mxu1 %vm9423_vm7, %v14463_v44 }
 0xa2c   : > { %13334 = vmatpush3.bf16.msra.mxu1 %v10058_v1  ;;  %13339 = vmatprep.mubr.msk.bf16.mxu1 %vm9423_vm7, %v14464_v46 }
 0xa2d   : > { %13335 = vmatprep.subr.bf16.mxu1 %v10060_v0 }
 0xa2f   : > { %v10718_v63 = vpop.permute.xlu0 %10717 }
 0xa30   : > { %13336 = vmatpush3.bf16.msra.mxu1 %v10060_v0 }
 0xa31   : > { %13337 = vmatprep.subr.bf16.mxu1 %v10062_v45 }
 0xa33   : > { %v10745_v1 = vpop.permute.xlu0 %10744 }
 0xa34   : > { %13338 = vmatpush3.bf16.msra.mxu1 %v10062_v45 }
 0xa35   : > { %13343 = vmatprep.subr.bf16.mxu1 %v10141_v8 }
 0xa37   : > { %13340 = vmatmul.mubr.msk.bf16.vlgmr.msra.gmra.mrb[72].mxu1 %vm9423_vm7, %v14465_v52  ;;  %v10713_v29 = vpop.permute.xlu1 %10712 }
 0xa38   : > { %13344 = vmatpush3.bf16.msra.mxu1 %v10141_v8  ;;  %13349 = vmatprep.mubr.msk.bf16.mxu1 %vm9423_vm7, %v14466_v2 }
 0xa39   : > { %13345 = vmatprep.subr.bf16.mxu1 %v10143_v16 }
 0xa3b   : > { %v10723_v50 = vpop.permute.xlu1 %10722 }
 0xa3c   : > { %13346 = vmatpush3.bf16.msra.mxu1 %v10143_v16  ;;  %v10836_v16 = vld [vmem:[%s17802_s10] sm:$0x3] }
 0xa3d   : > { %13347 = vmatprep.subr.bf16.mxu1 %v10145_v54 }
 0xa3f   : > { %v10728_v22 = vpop.permute.xlu1 %10727 }
 0xa40   : > { %13348 = vmatpush3.bf16.msra.mxu1 %v10145_v54  ;;  %v10841_v54 = vpop.permute.xlu0 %10840 }
 0xa41   : > { %13353 = vmatprep.subr.bf16.mxu1 %v10224_v42 }
 0xa43   : > { %13350 = vmatmul.mubr.msk.bf16.vlgmr.msra.gmra.mrb[72].mxu1 %vm9423_vm7, %v14467_v40  ;;  %v10750_v25 = vpop.permute.xlu1 %10749 }
 0xa44   : > { %13354 = vmatpush3.bf16.msra.mxu1 %v10224_v42  ;;  %13359 = vmatprep.mubr.msk.bf16.mxu1 %vm9423_vm7, %v14468_v43 }
 0xa45   : > { %13355 = vmatprep.subr.bf16.mxu1 %v10226_v19 }
 0xa48   : > { %13356 = vmatpush3.bf16.msra.mxu1 %v10226_v19 }
 0xa49   : > { %13357 = vmatprep.subr.bf16.mxu1 %v10228_v48 }
 0xa4c   : > { %13358 = vmatpush3.bf16.msra.mxu1 %v10228_v48 }
 0xa4d   : > { %13363 = vmatprep.subr.bf16.mxu1 %v10307_v38 }
 0xa4f   : > { %13360 = vmatmul.mubr.msk.bf16.vlgmr.msra.gmra.mrb[72].mxu1 %vm9423_vm7, %v14469_v57 }
 0xa50   : > { %13364 = vmatpush3.bf16.msra.mxu1 %v10307_v38  ;;  %13369 = vmatprep.mubr.msk.bf16.mxu1 %vm9423_vm7, %v14470_v56 }
 0xa51   : > { %13365 = vmatprep.subr.bf16.mxu1 %v10309_v49 }
 0xa54   : > { %13366 = vmatpush3.bf16.msra.mxu1 %v10309_v49 }
 0xa55   : > { %13367 = vmatprep.subr.bf16.mxu1 %v10311_v23 }
 0xa58   : > { %13368 = vmatpush3.bf16.msra.mxu1 %v10311_v23 }
 0xa59   : > { %13373 = vmatprep.subr.bf16.mxu1 %v10390_v14 }
 0xa5b   : > { %13370 = vmatmul.mubr.msk.bf16.vlgmr.msra.gmra.mrb[72].mxu1 %vm9423_vm7, %v14471_v47 }
 0xa5c   : > { %13374 = vmatpush3.bf16.msra.mxu1 %v10390_v14  ;;  %13379 = vmatprep.mubr.msk.bf16.mxu1 %vm9423_vm7, %v14472_v9 }
 0xa5d   : > { %13375 = vmatprep.subr.bf16.mxu1 %v10392_v21 }
 0xa60   : > { %13376 = vmatpush3.bf16.msra.mxu1 %v10392_v21 }
 0xa61   : > { %13377 = vmatprep.subr.bf16.mxu1 %v10394_v12 }
 0xa64   : > { %13378 = vmatpush3.bf16.msra.mxu1 %v10394_v12 }
 0xa65   : > { %13383 = vmatprep.subr.bf16.mxu1 %v10473_v4 }
 0xa67   : > { %13380 = vmatmul.mubr.msk.bf16.vlgmr.msra.gmra.mrb[72].mxu1 %vm9423_vm7, %v14473_v3 }
 0xa68   : > { %13384 = vmatpush3.bf16.msra.mxu1 %v10473_v4  ;;  %13389 = vmatprep.mubr.msk.bf16.mxu1 %vm9423_vm7, %v14474_v35 }
 0xa69   : > { %13385 = vmatprep.subr.bf16.mxu1 %v10475_v32 }
 0xa6c   : > { %13386 = vmatpush3.bf16.msra.mxu1 %v10475_v32 }
 0xa6d   : > { %13387 = vmatprep.subr.bf16.mxu1 %v10477_v7 }
 0xa70   : > { %13388 = vmatpush3.bf16.msra.mxu1 %v10477_v7 }
 0xa71   : > { %13393 = vmatprep.subr.bf16.mxu1 %v10556_v26 }
 0xa73   : > { %13390 = vmatmul.mubr.msk.bf16.vlgmr.msra.gmra.mrb[72].mxu1 %vm9423_vm7, %v14475_v13 }
 0xa74   : > { %13394 = vmatpush3.bf16.msra.mxu1 %v10556_v26  ;;  %13399 = vmatprep.mubr.msk.bf16.mxu1 %vm9423_vm7, %v14476_v55 }
 0xa75   : > { %13395 = vmatprep.subr.bf16.mxu1 %v10558_v62 }
 0xa78   : > { %13396 = vmatpush3.bf16.msra.mxu1 %v10558_v62 }
 0xa79   : > { %13397 = vmatprep.subr.bf16.mxu1 %v10560_v31 }
 0xa7c   : > { %13398 = vmatpush3.bf16.msra.mxu1 %v10560_v31 }
 0xa7d   : > { %13403 = vmatprep.subr.bf16.mxu1 %v10639_v27 }
 0xa7f   : > { %13400 = vmatmul.mubr.msk.bf16.vlgmr.msra.gmra.mrb[72].mxu1 %vm9423_vm7, %v14477_v37 }
 0xa80   : > { %13404 = vmatpush3.bf16.msra.mxu1 %v10639_v27  ;;  %13409 = vmatprep.mubr.msk.bf16.mxu1 %vm9423_vm7, %v14478_v15 }
 0xa81   : > { %13405 = vmatprep.subr.bf16.mxu1 %v10641_v60 }
 0xa84   : > { %13406 = vmatpush3.bf16.msra.mxu1 %v10641_v60 }
 0xa85   : > { %13407 = vmatprep.subr.bf16.mxu1 %v10643_v41 }
 0xa88   : > { %13408 = vmatpush3.bf16.msra.mxu1 %v10643_v41 }
 0xa8b   : > { %13410 = vmatmul.mubr.msk.bf16.vlgmr.msra.gmra.mrb[72].mxu1 %vm9423_vm7, %v14479_v36 }
 0xa8c   : > { %13421 = vmatprep.mubr.msk.f32.mxu1 %vm10752_vm8, %v10738_v5 }
 0xb5e   : > { %v13411_v30 = vpop.f32.mrb[72].mxu1 }
 0xb5f   : > { %v10732_v61 = vadd.f32 %v13411_v30, %v10723_v50  ;;  %v10687_v24 = vpop.f32.mrb[73].mxu1 }
 0xb60   : > { %v10730_v20 = vadd.f32 %v10713_v29, %v10687_v24  ;;  %v13412_v11 = vpop.f32.mrb[74].mxu1 }
 0xb61   : > { %v10733_v33 = vadd.f32 %v13412_v11, %v10728_v22  ;;  %v10690_v53 = vpop.f32.mrb[75].mxu1  ;;  %v10736_v51 = vmax.f32 %v10732_v61, 0.0 }
 0xb62   : > { %v10731_v58 = vadd.f32 %v10718_v63, %v10690_v53  ;;  %v10734_v17 = vmax.f32 %v10730_v20, 0.0 }
 0xb63   : > { %v10737_v39 = vmax.f32 %v10733_v33, 0.0 }
 0xb64   : > { %v10735_v34 = vmax.f32 %v10731_v58, 0.0 }
 0xb65   : > { %v13435_v18 = vpack.c.bf16 %v10737_v39, %v10736_v51 }
 0xb66   : > { %v13431_v6 = vpack.c.bf16 %v10735_v34, %v10734_v17 }
 0xb68   : > { %13432 = vmatprep.subr.bf16.mxu1 %v13431_v6 }
 0xb69   : > { %13434 = vmatpush3.bf16.msra.mxu1 %v13431_v6 }
 0xb6a   : > { %13436 = vmatprep.subr.bf16.mxu1 %v13435_v18 }
 0xb6d   : > { %13438 = vmatpush3.bf16.msra.mxu1 %v13435_v18 }
 0xb6e   : > { %13439 = vmatprep.subr.bf16.mxu1 %v14550_v59 }
 0xb70   : > { %13422 = vmatmul.mubr.msk.f32.vlgmr.msra.gmra.mrb[76].mxu1 %vm10752_vm8, %v10739_v28 }
 0xb71   : > { %13428 = vmatprep.mubr.msk.f32.mxu1 %vm14551_vm9, %v14552_v10 }
 0xc43   : > { %v13423_v44 = vpop.f32.mrb[76].mxu1 }
 0xc44   : > { %v10831_v46 = vadd.f32 %v13423_v44, %v10750_v25  ;;  %v10825_v0 = vpop.f32.mrb[77].mxu1 }
 0xc45   : > { %v10826_v45 = vadd.f32 %v10825_v0, %v10745_v1 }
 0xc46   : > { %v10835_v52 = vmax.f32 %v10831_v46, 0.0 }
 0xc47   : > { %v10834_v8 = vmax.f32 %v10826_v45, 0.0 }
 0xc49   : > { %v13440_v2 = vpack.c.bf16 %v10835_v52, %v10834_v8 }
 0xc4b   : > { %13441 = vmatpush3.bf16.msra.mxu1 %v13440_v2 }
 0xc4e   : > { %13429 = vmatmul.mubr.msk.f32.vlgmr.msra.gmra.mrb[78].mxu1 %vm10843_vm10, %v10836_v16 }
 0xd21   : > { %v10913_v40 = vpop.f32.mrb[78].mxu1 }
 0xd22   : > { %v10914_v42 = vadd.f32 %v10913_v40, %v10841_v54  ;;  %v13430_v43 = vpop.f32.mrb[79].mxu1 }
 0xd24   : > { %10918 = vst.msk [vmem:[%s416_s16] sm:$0x3] %vm10917_vm11, %v10914_v42 }
 0xd25 PF: > { %s22_s21 = sadd.s32 1, %s14532_s21  }
 0xd26   : > { %p19_p5 = scmp.ge.s32.totalorder %s22_s21, 4  }
 0xd28   :  { %21 = sbr.rel (!%p19_p5) target bundleno = 1 (0x1), region = 140 }

</bundles_post_ra>
